<compile_context>
chip_gen: v6e
topology: v6e:2x2x1
jax: 0.10.0
libtpu: 0.0.40
codegen_flags: <defaults>
</compile_context>

<pallas_src>
import functools

import jax
import jax.numpy as jnp
import numpy as np
from jax import lax
from jax.experimental import pallas as pl
from jax.experimental.pallas import tpu as pltpu


# ----------------------------------------------------------------------------
# Host-side one-time weight packing (no runtime transposes / reshapes)
# ----------------------------------------------------------------------------
def prepare_params(params):
    """Pack PyTorch-layout LeNet weights into the GEMM layouts the fused
    kernel consumes.  Called once, outside the jitted forward.  GEMM weights
    are stored bf16 (MXU-native), biases stay f32."""
    w1, b1, w2, b2, w3, b3, w4, b4 = [np.asarray(p, dtype=np.float32) for p in params]

    # conv1 -> banded GEMM matrix.  Row block ki (128 rows, lane-padded input
    # width) corresponds to image row (oh + ki).  Output column layout is
    # [even-ow block (128) | odd-ow block (128)], col = parity*128 + (ow//2)*10
    # + co, so the kernel max-pools the width dim with one aligned maximum of
    # the two 128-column halves.  Padded rows/cols stay exactly zero.
    t1 = np.zeros((5 * 128, 256), np.float32)
    for ki in range(5):
        for kj in range(5):
            for ow in range(24):
                col0 = (ow % 2) * 128 + (ow // 2) * 10
                t1[ki * 128 + ow + kj, col0:col0 + 10] = w1[:, 0, ki, kj]
    b1r = np.zeros((1, 256), np.float32)
    for parity in range(2):
        for pw in range(12):
            b1r[0, parity * 128 + pw * 10: parity * 128 + pw * 10 + 10] = b1

    # conv2 -> banded GEMM matrix.  Row block ki (128 rows) corresponds to
    # pooled row (oh + ki) with columns pw*10 + ci (lane-padded to 128);
    # output columns ow*20 + co (lane-padded to 256).
    t2 = np.zeros((3 * 128, 256), np.float32)
    for ki in range(3):
        for kj in range(3):
            for ci in range(10):
                for ow in range(10):
                    t2[ki * 128 + (ow + kj) * 10 + ci, ow * 20: ow * 20 + 20] = (
                        w2[:, ci, ki, kj]
                    )
    b2r = np.zeros((1, 256), np.float32)
    for ow in range(10):
        b2r[0, ow * 20: ow * 20 + 20] = b2

    # fc1 (2000 -> 500): pre-permute the input dim from PyTorch's NCHW flatten
    # order (co*100 + oh*10 + ow) to the kernel's flatten order
    # (oh*256 + ow*20 + co, including the lane padding).  N padded 500 -> 512.
    w3p = np.zeros((10 * 256, 512), np.float32)
    blk = np.transpose(w3.reshape(500, 20, 10, 10), (2, 3, 1, 0)).reshape(10, 200, 500)
    for oh in range(10):
        w3p[oh * 256: oh * 256 + 200, 0:500] = blk[oh]
    b3r = np.zeros((1, 512), np.float32)
    b3r[0, :500] = b3

    # fc2 pre-transposed, K padded 500 -> 512 (matches a3's zero-padded cols,
    # which contribute nothing), N padded 10 -> 128 for a lane-dense store.
    w4p = np.zeros((512, 128), np.float32)
    w4p[0:500, 0:10] = w4.T
    b4r = np.zeros((1, 128), np.float32)
    b4r[0, :10] = b4

    bf = lambda a: jnp.asarray(a, jnp.bfloat16)
    f32 = lambda a: jnp.asarray(a, jnp.float32)
    return (bf(t1), f32(b1r), bf(t2), f32(b2r), bf(w3p), f32(b3r), bf(w4p), f32(b4r))


# ----------------------------------------------------------------------------
# Fused Pallas kernel: whole LeNet forward for one batch tile
# ----------------------------------------------------------------------------
def _make_lenet_kernel(batch_tile: int, activation: str):
    BT = batch_tile
    if activation == "relu":
        act = lambda v: jnp.maximum(v, 0.0)
    else:  # "tanh"
        act = jnp.tanh

    def bdot(a, b):
        # LHS is tiny -> cast to bf16 (matches default MXU behavior); weights
        # are already bf16; accumulate in f32.
        return jnp.dot(a.astype(jnp.bfloat16), b, preferred_element_type=jnp.float32)

    def kernel(xe_ref, xo_ref, t1_ref, b1_ref, t2_ref, b2_ref,
               w3_hbm, b3_ref, w4_ref, b4_ref, o_ref, w3_vmem, w3_sem):
        # Kick off the big fc1 weight DMA immediately; it overlaps with
        # conv1 / pool / conv2 below and is awaited right before the fc1 dot.
        w3_copy = pltpu.make_async_copy(w3_hbm, w3_vmem, w3_sem)
        w3_copy.start()

        xe = xe_ref[...]        # (BT, 14, 128) even image rows, lane-padded, f32
        xo = xo_ref[...]        # (BT, 14, 128) odd  image rows

        # ---- layer1: Conv(1->10, 5x5) + act as ONE batched GEMM.
        # Even conv rows 2j read image rows 2j..2j+4; odd rows 2j+1 read
        # 2j+1..2j+5.  Both parities are stacked into the same LHS so t1's
        # weight tiles are pushed once per batch tile.
        cat_e = jnp.concatenate(
            [xe[:, 0:12], xo[:, 0:12], xe[:, 1:13], xo[:, 1:13], xe[:, 2:14]],
            axis=2)                                            # (BT, 12, 640)
        cat_o = jnp.concatenate(
            [xo[:, 0:12], xe[:, 1:13], xo[:, 1:13], xe[:, 2:14], xo[:, 2:14]],
            axis=2)                                            # (BT, 12, 640)
        cat1 = jnp.concatenate([cat_e, cat_o], axis=1)         # (BT, 24, 640)
        y1 = act(bdot(cat1.reshape(BT * 24, 640), t1_ref[...]) + b1_ref[...])
        y1 = y1.reshape(BT, 24, 256)

        # ---- layer2a: fused 2x2 max-pool.  Rows: even vs odd halves of the
        # stacked GEMM output; columns: [even-ow | odd-ow] halves packed by
        # prepare_params.
        rmax = jnp.maximum(y1[:, 0:12], y1[:, 12:24])                 # (BT, 12, 256)
        p1 = jnp.maximum(rmax[:, :, 0:128], rmax[:, :, 128:256])      # (BT, 12, 128)

        # ---- layer2b: Conv(10->20, 3x3) + act as ONE batched GEMM.  Rows are
        # zero-padded 10 -> 16 per sample so the (BT*16, 384) reshape stays
        # sublane-aligned; pad rows are never read afterwards.
        cat2 = jnp.concatenate([p1[:, 0:10], p1[:, 1:11], p1[:, 2:12]],
                               axis=2)                                # (BT, 10, 384)
        cat2 = jnp.concatenate(
            [cat2, jnp.zeros((BT, 6, 384), jnp.float32)], axis=1)     # (BT, 16, 384)
        a2 = act(bdot(cat2.reshape(BT * 16, 384), t2_ref[...]) + b2_ref[...])
        a2 = a2.reshape(BT, 16, 256)                                  # rows 10..15 unused

        # ---- flatten to (BT, 2560): 10 lane-aligned slices + one lane concat
        # + one unit-dim reshape for the whole tile (PyTorch's NCHW .view
        # order is folded into w3p).
        flat = jnp.concatenate(
            [a2[:, oh:oh + 1, :] for oh in range(10)], axis=2).reshape(BT, 2560)

        # ---- layer3: Linear(2000->500 padded 512) + act ----
        w3_copy.wait()                       # DMA hid behind the conv compute
        a3 = act(bdot(flat, w3_vmem[...]) + b3_ref[...])              # (BT, 512)

        # ---- layer4: Linear(500->10 padded 128) + act; single lane-dense store.
        a4 = act(bdot(a3, w4_ref[...]) + b4_ref[...])                 # (BT, 128)
        o_ref[...] = a4.astype(o_ref.dtype)

    return kernel


@functools.partial(jax.jit, static_argnames=("activation",))
def lenet_forward(x, packed, activation="relu"):
    """x: (B, 1, 28, 28) NCHW, packed = prepare_params(params)."""
    t1, b1r, t2, b2r, w3p, b3r, w4p, b4r = packed
    B = x.shape[0]
    BT = B if B <= 8 else 8            # batch tile (full batching for small B)
    G = (B + BT - 1) // BT
    Bp = G * BT

    # Tiny input-side glue: drop the unit channel, pad batch to the tile,
    # lane-pad 28 -> 128 and split image rows by parity so the kernel needs
    # no strided access.
    img = x[:, 0].astype(jnp.float32)                              # (B, 28, 28)
    imgp = jnp.pad(img, ((0, Bp - B), (0, 0), (0, 128 - 28)))      # (Bp, 28, 128)
    xe = imgp[:, 0::2, :]                                          # (Bp, 14, 128)
    xo = imgp[:, 1::2, :]                                          # (Bp, 14, 128)

    def const_spec(arr):
        nd = arr.ndim
        return pl.BlockSpec(arr.shape, lambda i, _nd=nd: (0,) * _nd)

    out = pl.pallas_call(
        _make_lenet_kernel(BT, activation),
        out_shape=jax.ShapeDtypeStruct((Bp, 128), jnp.float32),
        grid=(G,),
        in_specs=[
            pl.BlockSpec((BT, 14, 128), lambda i: (i, 0, 0)),      # xe
            pl.BlockSpec((BT, 14, 128), lambda i: (i, 0, 0)),      # xo
            const_spec(t1),                                        # conv1 weights
            const_spec(b1r),
            const_spec(t2),                                        # conv2 weights
            const_spec(b2r),
            pl.BlockSpec(memory_space=pl.ANY),                     # fc1 weights stay in HBM
            const_spec(b3r),
            const_spec(w4p),                                       # fc2 weights
            const_spec(b4r),
        ],
        out_specs=pl.BlockSpec((BT, 128), lambda i: (i, 0)),
        scratch_shapes=[
            pltpu.VMEM(w3p.shape, w3p.dtype),                      # fc1 weight landing buffer
            pltpu.SemaphoreType.DMA(()),
        ],
        compiler_params=pltpu.CompilerParams(
            dimension_semantics=("parallel",),                     # v7x: split batch tiles over TCs
            vmem_limit_bytes=16 * 1024 * 1024),
    )(xe, xo, t1, b1r, t2, b2r, w3p, b3r, w4p, b4r)

    return out[:B, :10]


# ----------------------------------------------------------------------------
# Pure-JAX reference (high precision, for correctness check)
# ----------------------------------------------------------------------------
def lenet_reference(x, params, activation="relu"):
    w1, b1, w2, b2, w3, b3, w4, b4 = params
    act = (lambda v: jnp.maximum(v, 0.0)) if activation == "relu" else jnp.tanh

    dn1 = lax.conv_dimension_numbers(x.shape, w1.shape, ("NCHW", "OIHW", "NCHW"))
    y = lax.conv_general_dilated(
        x, w1, (1, 1), "VALID", dimension_numbers=dn1,
        precision=lax.Precision.HIGHEST)
    y = act(y + b1[None, :, None, None])
    y = lax.reduce_window(y, -jnp.inf, lax.max, (1, 1, 2, 2), (1, 1, 2, 2), "VALID")
    dn2 = lax.conv_dimension_numbers(y.shape, w2.shape, ("NCHW", "OIHW", "NCHW"))
    y = lax.conv_general_dilated(
        y, w2, (1, 1), "VALID", dimension_numbers=dn2,
        precision=lax.Precision.HIGHEST)
    y = act(y + b2[None, :, None, None])
    y = y.reshape(y.shape[0], -1)
    y = act(jnp.dot(y, w3.T, precision=lax.Precision.HIGHEST) + b3)
    y = act(jnp.dot(y, w4.T, precision=lax.Precision.HIGHEST) + b4)
    return y


# ----------------------------------------------------------------------------
# Deterministic parameter init (PyTorch-default-style uniform bounds)
# ----------------------------------------------------------------------------
def init_params(key):
    def uinit(k, shape, fan_in):
        bound = 1.0 / np.sqrt(fan_in)
        return jax.random.uniform(k, shape, jnp.float32, -bound, bound)

    ks = jax.random.split(key, 8)
    w1 = uinit(ks[0], (10, 1, 5, 5), 25)
    b1 = uinit(ks[1], (10,), 25)
    w2 = uinit(ks[2], (20, 10, 3, 3), 90)
    b2 = uinit(ks[3], (20,), 90)
    w3 = uinit(ks[4], (500, 2000), 2000)
    b3 = uinit(ks[5], (500,), 2000)
    w4 = uinit(ks[6], (10, 500), 500)
    b4 = uinit(ks[7], (10,), 500)
    return (w1, b1, w2, b2, w3, b3, w4, b4)


# TODO(synk): Lenet.report()/test() (pickle dumps, file I/O, accuracy loops)
# are host-side utilities with no kernel equivalent; only forward() is implemented.

if __name__ == "__main__":
    cfg = {"ACTIVATION": "relu"}  # architecture forces 28x28x1 input (2000 = 20*10*10)
    key = jax.random.PRNGKey(0)
    pkey, xkey = jax.random.split(key)
    params = init_params(pkey)
    packed = prepare_params(params)
    x = jax.random.normal(xkey, (2, 1, 28, 28), jnp.float32)  # NCHW like PyTorch

    out = jax.block_until_ready(lenet_forward(x, packed, activation=cfg["ACTIVATION"]))
    ref = jax.block_until_ready(lenet_reference(x, params, cfg["ACTIVATION"]))

    # Tolerance covers bf16 weight storage + bf16 MXU operands (same envelope
    # as default MXU precision); accumulation is f32. Reference runs HIGHEST.
    np.testing.assert_allclose(np.asarray(out), np.asarray(ref), rtol=3e-2, atol=3e-2)
    assert out.shape == (2, 10)

    print("KERNEL_OK")
</pallas_src>

<mosaic_0001>
module attributes {stable_mosaic.version = 11 : i64} {
  func.func @kernel(%arg0: i32, %arg1: memref<2x14x128xf32, #tpu.memory_space<vmem>>, %arg2: memref<2x14x128xf32, #tpu.memory_space<vmem>>, %arg3: memref<640x256xbf16, #tpu.memory_space<vmem>>, %arg4: memref<1x256xf32, #tpu.memory_space<vmem>>, %arg5: memref<384x256xbf16, #tpu.memory_space<vmem>>, %arg6: memref<1x256xf32, #tpu.memory_space<vmem>>, %arg7: memref<2560x512xbf16, #tpu.memory_space<any>>, %arg8: memref<1x512xf32, #tpu.memory_space<vmem>>, %arg9: memref<512x128xbf16, #tpu.memory_space<vmem>>, %arg10: memref<1x128xf32, #tpu.memory_space<vmem>>, %arg11: memref<2x128xf32, #tpu.memory_space<vmem>>, %arg12: memref<2560x512xbf16, #tpu.memory_space<vmem>>, %arg13: memref<!tpu.dma_semaphore, #tpu.memory_space<semaphore_mem>>) attributes {dimension_semantics = [#tpu.dimension_semantics<parallel>], iteration_bounds = array<i64: 1>, scalar_prefetch = 0 : i64, scratch_operands = 2 : i64, tpu.core_type = #tpu.core_type<tc>, window_params = [{transform_indices = @transform_0, window_bounds = array<i64: 2, 14, 128>}, {transform_indices = @transform_1, window_bounds = array<i64: 2, 14, 128>}, {pipeline_mode = #tpu.pipeline_mode<synchronous>, transform_indices = @transform_2, window_bounds = array<i64: 640, 256>}, {pipeline_mode = #tpu.pipeline_mode<synchronous>, transform_indices = @transform_3, window_bounds = array<i64: 1, 256>}, {pipeline_mode = #tpu.pipeline_mode<synchronous>, transform_indices = @transform_4, window_bounds = array<i64: 384, 256>}, {pipeline_mode = #tpu.pipeline_mode<synchronous>, transform_indices = @transform_5, window_bounds = array<i64: 1, 256>}, {}, {pipeline_mode = #tpu.pipeline_mode<synchronous>, transform_indices = @transform_7, window_bounds = array<i64: 1, 512>}, {pipeline_mode = #tpu.pipeline_mode<synchronous>, transform_indices = @transform_8, window_bounds = array<i64: 512, 128>}, {pipeline_mode = #tpu.pipeline_mode<synchronous>, transform_indices = @transform_9, window_bounds = array<i64: 1, 128>}, {transform_indices = @transform_10, window_bounds = array<i64: 2, 128>}]} {
    tpu.enqueue_dma source(%arg7 : memref<2560x512xbf16, #tpu.memory_space<any>>) target(%arg12 : memref<2560x512xbf16, #tpu.memory_space<vmem>>) target_semaphore(%arg13 : memref<!tpu.dma_semaphore, #tpu.memory_space<semaphore_mem>>)
    %c0 = arith.constant 0 : index
    %c0_0 = arith.constant 0 : index
    %c0_1 = arith.constant 0 : index
    %0 = vector.load %arg1[%c0, %c0_0, %c0_1] : memref<2x14x128xf32, #tpu.memory_space<vmem>>, vector<2x14x128xf32>
    %c0_2 = arith.constant 0 : index
    %c0_3 = arith.constant 0 : index
    %c0_4 = arith.constant 0 : index
    %1 = vector.load %arg2[%c0_2, %c0_3, %c0_4] : memref<2x14x128xf32, #tpu.memory_space<vmem>>, vector<2x14x128xf32>
    %2 = vector.extract_strided_slice %0 {offsets = [0, 0, 0], sizes = [2, 12, 128], strides = [1, 1, 1]} : vector<2x14x128xf32> to vector<2x12x128xf32>
    %3 = vector.extract_strided_slice %1 {offsets = [0, 0, 0], sizes = [2, 12, 128], strides = [1, 1, 1]} : vector<2x14x128xf32> to vector<2x12x128xf32>
    %4 = vector.extract_strided_slice %0 {offsets = [0, 1, 0], sizes = [2, 12, 128], strides = [1, 1, 1]} : vector<2x14x128xf32> to vector<2x12x128xf32>
    %5 = vector.extract_strided_slice %1 {offsets = [0, 1, 0], sizes = [2, 12, 128], strides = [1, 1, 1]} : vector<2x14x128xf32> to vector<2x12x128xf32>
    %6 = vector.extract_strided_slice %0 {offsets = [0, 2, 0], sizes = [2, 12, 128], strides = [1, 1, 1]} : vector<2x14x128xf32> to vector<2x12x128xf32>
    %7 = tpu.concatenate %2, %3, %4, %5, %6 in 2 : vector<2x12x128xf32>, vector<2x12x128xf32>, vector<2x12x128xf32>, vector<2x12x128xf32>, vector<2x12x128xf32> -> vector<2x12x640xf32>
    %8 = vector.extract_strided_slice %1 {offsets = [0, 0, 0], sizes = [2, 12, 128], strides = [1, 1, 1]} : vector<2x14x128xf32> to vector<2x12x128xf32>
    %9 = vector.extract_strided_slice %0 {offsets = [0, 1, 0], sizes = [2, 12, 128], strides = [1, 1, 1]} : vector<2x14x128xf32> to vector<2x12x128xf32>
    %10 = vector.extract_strided_slice %1 {offsets = [0, 1, 0], sizes = [2, 12, 128], strides = [1, 1, 1]} : vector<2x14x128xf32> to vector<2x12x128xf32>
    %11 = vector.extract_strided_slice %0 {offsets = [0, 2, 0], sizes = [2, 12, 128], strides = [1, 1, 1]} : vector<2x14x128xf32> to vector<2x12x128xf32>
    %12 = vector.extract_strided_slice %1 {offsets = [0, 2, 0], sizes = [2, 12, 128], strides = [1, 1, 1]} : vector<2x14x128xf32> to vector<2x12x128xf32>
    %13 = tpu.concatenate %8, %9, %10, %11, %12 in 2 : vector<2x12x128xf32>, vector<2x12x128xf32>, vector<2x12x128xf32>, vector<2x12x128xf32>, vector<2x12x128xf32> -> vector<2x12x640xf32>
    %14 = tpu.concatenate %7, %13 in 1 : vector<2x12x640xf32>, vector<2x12x640xf32> -> vector<2x24x640xf32>
    %15 = vector.shape_cast %14 : vector<2x24x640xf32> to vector<48x640xf32>
    %c0_5 = arith.constant 0 : index
    %c0_6 = arith.constant 0 : index
    %16 = vector.load %arg3[%c0_5, %c0_6] : memref<640x256xbf16, #tpu.memory_space<vmem>>, vector<640x256xbf16>
    %17 = arith.truncf %15 : vector<48x640xf32> to vector<48x640xbf16>
    %cst = arith.constant dense<0.000000e+00> : vector<48x256xf32>
    %18 = tpu.matmul %17, %16, %cst {dimension_numbers = #tpu.dot_dimension_numbers<[1], [0], [0], [1], [0, 0, 1, 1], [], []>} : vector<48x640xbf16>, vector<640x256xbf16>, vector<48x256xf32> -> vector<48x256xf32>
    %c0_7 = arith.constant 0 : index
    %c0_8 = arith.constant 0 : index
    %19 = vector.load %arg4[%c0_7, %c0_8] : memref<1x256xf32, #tpu.memory_space<vmem>>, vector<1x256xf32>
    %20 = vector.broadcast %19 : vector<1x256xf32> to vector<48x256xf32>
    %21 = arith.addf %18, %20 : vector<48x256xf32>
    %cst_9 = arith.constant 0.000000e+00 : f32
    %22 = vector.broadcast %cst_9 : f32 to vector<48x256xf32>
    %23 = arith.maximumf %21, %22 : vector<48x256xf32>
    %24 = vector.shape_cast %23 : vector<48x256xf32> to vector<2x24x256xf32>
    %25 = vector.extract_strided_slice %24 {offsets = [0, 0, 0], sizes = [2, 12, 256], strides = [1, 1, 1]} : vector<2x24x256xf32> to vector<2x12x256xf32>
    %26 = vector.extract_strided_slice %24 {offsets = [0, 12, 0], sizes = [2, 12, 256], strides = [1, 1, 1]} : vector<2x24x256xf32> to vector<2x12x256xf32>
    %27 = arith.maximumf %25, %26 : vector<2x12x256xf32>
    %28 = vector.extract_strided_slice %27 {offsets = [0, 0, 0], sizes = [2, 12, 128], strides = [1, 1, 1]} : vector<2x12x256xf32> to vector<2x12x128xf32>
    %29 = vector.extract_strided_slice %27 {offsets = [0, 0, 128], sizes = [2, 12, 128], strides = [1, 1, 1]} : vector<2x12x256xf32> to vector<2x12x128xf32>
    %30 = arith.maximumf %28, %29 : vector<2x12x128xf32>
    %31 = vector.extract_strided_slice %30 {offsets = [0, 0, 0], sizes = [2, 10, 128], strides = [1, 1, 1]} : vector<2x12x128xf32> to vector<2x10x128xf32>
    %32 = vector.extract_strided_slice %30 {offsets = [0, 1, 0], sizes = [2, 10, 128], strides = [1, 1, 1]} : vector<2x12x128xf32> to vector<2x10x128xf32>
    %33 = vector.extract_strided_slice %30 {offsets = [0, 2, 0], sizes = [2, 10, 128], strides = [1, 1, 1]} : vector<2x12x128xf32> to vector<2x10x128xf32>
    %34 = tpu.concatenate %31, %32, %33 in 2 : vector<2x10x128xf32>, vector<2x10x128xf32>, vector<2x10x128xf32> -> vector<2x10x384xf32>
    %cst_10 = arith.constant 0.000000e+00 : f32
    %35 = vector.broadcast %cst_10 : f32 to vector<2x6x384xf32>
    %36 = tpu.concatenate %34, %35 in 1 : vector<2x10x384xf32>, vector<2x6x384xf32> -> vector<2x16x384xf32>
    %37 = vector.shape_cast %36 : vector<2x16x384xf32> to vector<32x384xf32>
    %c0_11 = arith.constant 0 : index
    %c0_12 = arith.constant 0 : index
    %38 = vector.load %arg5[%c0_11, %c0_12] : memref<384x256xbf16, #tpu.memory_space<vmem>>, vector<384x256xbf16>
    %39 = arith.truncf %37 : vector<32x384xf32> to vector<32x384xbf16>
    %cst_13 = arith.constant dense<0.000000e+00> : vector<32x256xf32>
    %40 = tpu.matmul %39, %38, %cst_13 {dimension_numbers = #tpu.dot_dimension_numbers<[1], [0], [0], [1], [0, 0, 1, 1], [], []>} : vector<32x384xbf16>, vector<384x256xbf16>, vector<32x256xf32> -> vector<32x256xf32>
    %c0_14 = arith.constant 0 : index
    %c0_15 = arith.constant 0 : index
    %41 = vector.load %arg6[%c0_14, %c0_15] : memref<1x256xf32, #tpu.memory_space<vmem>>, vector<1x256xf32>
    %42 = vector.broadcast %41 : vector<1x256xf32> to vector<32x256xf32>
    %43 = arith.addf %40, %42 : vector<32x256xf32>
    %cst_16 = arith.constant 0.000000e+00 : f32
    %44 = vector.broadcast %cst_16 : f32 to vector<32x256xf32>
    %45 = arith.maximumf %43, %44 : vector<32x256xf32>
    %46 = vector.shape_cast %45 : vector<32x256xf32> to vector<2x16x256xf32>
    %47 = vector.extract_strided_slice %46 {offsets = [0, 0, 0], sizes = [2, 1, 256], strides = [1, 1, 1]} : vector<2x16x256xf32> to vector<2x1x256xf32>
    %48 = vector.extract_strided_slice %46 {offsets = [0, 1, 0], sizes = [2, 1, 256], strides = [1, 1, 1]} : vector<2x16x256xf32> to vector<2x1x256xf32>
    %49 = vector.extract_strided_slice %46 {offsets = [0, 2, 0], sizes = [2, 1, 256], strides = [1, 1, 1]} : vector<2x16x256xf32> to vector<2x1x256xf32>
    %50 = vector.extract_strided_slice %46 {offsets = [0, 3, 0], sizes = [2, 1, 256], strides = [1, 1, 1]} : vector<2x16x256xf32> to vector<2x1x256xf32>
    %51 = vector.extract_strided_slice %46 {offsets = [0, 4, 0], sizes = [2, 1, 256], strides = [1, 1, 1]} : vector<2x16x256xf32> to vector<2x1x256xf32>
    %52 = vector.extract_strided_slice %46 {offsets = [0, 5, 0], sizes = [2, 1, 256], strides = [1, 1, 1]} : vector<2x16x256xf32> to vector<2x1x256xf32>
    %53 = vector.extract_strided_slice %46 {offsets = [0, 6, 0], sizes = [2, 1, 256], strides = [1, 1, 1]} : vector<2x16x256xf32> to vector<2x1x256xf32>
    %54 = vector.extract_strided_slice %46 {offsets = [0, 7, 0], sizes = [2, 1, 256], strides = [1, 1, 1]} : vector<2x16x256xf32> to vector<2x1x256xf32>
    %55 = vector.extract_strided_slice %46 {offsets = [0, 8, 0], sizes = [2, 1, 256], strides = [1, 1, 1]} : vector<2x16x256xf32> to vector<2x1x256xf32>
    %56 = vector.extract_strided_slice %46 {offsets = [0, 9, 0], sizes = [2, 1, 256], strides = [1, 1, 1]} : vector<2x16x256xf32> to vector<2x1x256xf32>
    %57 = tpu.concatenate %47, %48, %49, %50, %51, %52, %53, %54, %55, %56 in 2 : vector<2x1x256xf32>, vector<2x1x256xf32>, vector<2x1x256xf32>, vector<2x1x256xf32>, vector<2x1x256xf32>, vector<2x1x256xf32>, vector<2x1x256xf32>, vector<2x1x256xf32>, vector<2x1x256xf32>, vector<2x1x256xf32> -> vector<2x1x2560xf32>
    %58 = vector.shape_cast %57 : vector<2x1x2560xf32> to vector<2x2560xf32>
    tpu.wait_dma2 semaphore(%arg13 : memref<!tpu.dma_semaphore, #tpu.memory_space<semaphore_mem>>) src(%arg7 : memref<2560x512xbf16, #tpu.memory_space<any>>) dst(%arg12 : memref<2560x512xbf16, #tpu.memory_space<vmem>>)
    %c0_17 = arith.constant 0 : index
    %c0_18 = arith.constant 0 : index
    %59 = vector.load %arg12[%c0_17, %c0_18] : memref<2560x512xbf16, #tpu.memory_space<vmem>>, vector<2560x512xbf16>
    %60 = arith.truncf %58 : vector<2x2560xf32> to vector<2x2560xbf16>
    %cst_19 = arith.constant dense<0.000000e+00> : vector<2x512xf32>
    %61 = tpu.matmul %60, %59, %cst_19 {dimension_numbers = #tpu.dot_dimension_numbers<[1], [0], [0], [1], [0, 0, 1, 1], [], []>} : vector<2x2560xbf16>, vector<2560x512xbf16>, vector<2x512xf32> -> vector<2x512xf32>
    %c0_20 = arith.constant 0 : index
    %c0_21 = arith.constant 0 : index
    %62 = vector.load %arg8[%c0_20, %c0_21] : memref<1x512xf32, #tpu.memory_space<vmem>>, vector<1x512xf32>
    %63 = vector.broadcast %62 : vector<1x512xf32> to vector<2x512xf32>
    %64 = arith.addf %61, %63 : vector<2x512xf32>
    %cst_22 = arith.constant 0.000000e+00 : f32
    %65 = vector.broadcast %cst_22 : f32 to vector<2x512xf32>
    %66 = arith.maximumf %64, %65 : vector<2x512xf32>
    %c0_23 = arith.constant 0 : index
    %c0_24 = arith.constant 0 : index
    %67 = vector.load %arg9[%c0_23, %c0_24] : memref<512x128xbf16, #tpu.memory_space<vmem>>, vector<512x128xbf16>
    %68 = arith.truncf %66 : vector<2x512xf32> to vector<2x512xbf16>
    %cst_25 = arith.constant dense<0.000000e+00> : vector<2x128xf32>
    %69 = tpu.matmul %68, %67, %cst_25 {dimension_numbers = #tpu.dot_dimension_numbers<[1], [0], [0], [1], [0, 0, 1, 1], [], []>} : vector<2x512xbf16>, vector<512x128xbf16>, vector<2x128xf32> -> vector<2x128xf32>
    %c0_26 = arith.constant 0 : index
    %c0_27 = arith.constant 0 : index
    %70 = vector.load %arg10[%c0_26, %c0_27] : memref<1x128xf32, #tpu.memory_space<vmem>>, vector<1x128xf32>
    %71 = vector.broadcast %70 : vector<1x128xf32> to vector<2x128xf32>
    %72 = arith.addf %69, %71 : vector<2x128xf32>
    %cst_28 = arith.constant 0.000000e+00 : f32
    %73 = vector.broadcast %cst_28 : f32 to vector<2x128xf32>
    %74 = arith.maximumf %72, %73 : vector<2x128xf32>
    %c0_29 = arith.constant 0 : index
    %c0_30 = arith.constant 0 : index
    %75 = vector.load %arg11[%c0_29, %c0_30] : memref<2x128xf32, #tpu.memory_space<vmem>>, vector<2x128xf32>
    tpu.vector_store %arg11[%c0_29, %c0_30], %74 {strides = array<i32>} : memref<2x128xf32, #tpu.memory_space<vmem>>, vector<2x128xf32>,
    return
  }
  func.func @transform_0(%arg0: i32) -> (i32, i32, i32) {
    %c0_i32 = arith.constant 0 : i32
    %c0_i32_0 = arith.constant 0 : i32
    %c0_i32_1 = arith.constant 0 : i32
    return %arg0, %c0_i32, %c0_i32_0 : i32, i32, i32
  }
  func.func @transform_1(%arg0: i32) -> (i32, i32, i32) {
    %c0_i32 = arith.constant 0 : i32
    %c0_i32_0 = arith.constant 0 : i32
    %c0_i32_1 = arith.constant 0 : i32
    return %arg0, %c0_i32, %c0_i32_0 : i32, i32, i32
  }
  func.func @transform_2(%arg0: i32) -> (i32, i32) {
    %c0_i32 = arith.constant 0 : i32
    %c0_i32_0 = arith.constant 0 : i32
    %c0_i32_1 = arith.constant 0 : i32
    return %c0_i32, %c0_i32_0 : i32, i32
  }
  func.func @transform_3(%arg0: i32) -> (i32, i32) {
    %c0_i32 = arith.constant 0 : i32
    %c0_i32_0 = arith.constant 0 : i32
    %c0_i32_1 = arith.constant 0 : i32
    return %c0_i32, %c0_i32_0 : i32, i32
  }
  func.func @transform_4(%arg0: i32) -> (i32, i32) {
    %c0_i32 = arith.constant 0 : i32
    %c0_i32_0 = arith.constant 0 : i32
    %c0_i32_1 = arith.constant 0 : i32
    return %c0_i32, %c0_i32_0 : i32, i32
  }
  func.func @transform_5(%arg0: i32) -> (i32, i32) {
    %c0_i32 = arith.constant 0 : i32
    %c0_i32_0 = arith.constant 0 : i32
    %c0_i32_1 = arith.constant 0 : i32
    return %c0_i32, %c0_i32_0 : i32, i32
  }
  func.func @transform_7(%arg0: i32) -> (i32, i32) {
    %c0_i32 = arith.constant 0 : i32
    %c0_i32_0 = arith.constant 0 : i32
    %c0_i32_1 = arith.constant 0 : i32
    return %c0_i32, %c0_i32_0 : i32, i32
  }
  func.func @transform_8(%arg0: i32) -> (i32, i32) {
    %c0_i32 = arith.constant 0 : i32
    %c0_i32_0 = arith.constant 0 : i32
    %c0_i32_1 = arith.constant 0 : i32
    return %c0_i32, %c0_i32_0 : i32, i32
  }
  func.func @transform_9(%arg0: i32) -> (i32, i32) {
    %c0_i32 = arith.constant 0 : i32
    %c0_i32_0 = arith.constant 0 : i32
    %c0_i32_1 = arith.constant 0 : i32
    return %c0_i32, %c0_i32_0 : i32, i32
  }
  func.func @transform_10(%arg0: i32) -> (i32, i32) {
    %c0_i32 = arith.constant 0 : i32
    %c0_i32_0 = arith.constant 0 : i32
    return %arg0, %c0_i32 : i32, i32
  }
}

</mosaic_0001>

<bundles_post_ra>
// kernel: lenet_forward.1
= control target key start
LH: loop header
LB: loop body
LE: loop exit
PB: predicated region body
PF: predicated region fallthrough
CT: control target
= control target key end

     0   :  { %15 = vsyncpa [#allocation5], 0  ;;  %s9623_s0 = inlined_call_operand.vmem [shape: f32[2,14,128], index: 0, kind: input, shape index: {}]   ;;  %s9624_s1 = inlined_call_operand.vmem [shape: f32[2,14,128], index: 1, kind: input, shape index: {}]   ;;  %s9625_s2 = inlined_call_operand.hbm [shape: bf16[640,256], index: 2, kind: input, shape index: {}]   ;;  %s9626_s3 = inlined_call_operand.hbm [shape: f32[1,256], index: 3, kind: input, shape index: {}]   ;;  %s9627_s4 = inlined_call_operand.hbm [shape: bf16[384,256], index: 4, kind: input, shape index: {}]   ;;  %s9628_s5 = inlined_call_operand.hbm [shape: f32[1,256], index: 5, kind: input, shape index: {}]   ;;  %s9629_s6 = inlined_call_operand.hbm [shape: bf16[2560,512], index: 6, kind: input, shape index: {}]   ;;  %s9630_s7 = inlined_call_operand.hbm [shape: f32[1,512], index: 7, kind: input, shape index: {}]   ;;  %s9631_s8 = inlined_call_operand.hbm [shape: bf16[512,128], index: 8, kind: input, shape index: {}]   ;;  %s9632_s9 = inlined_call_operand.hbm [shape: f32[1,128], index: 9, kind: input, shape index: {}]   ;;  %s9633_s10 = inlined_call_operand.hbm [shape: f32[2,128], index: 10, kind: output, shape index: {}]  }
   0x1   :  { %16 = vsyncpa [#allocation8], 0 }
   0x2   :  { %17 = vsyncpa [#allocation11], 0 }
   0x3   :  { %18 = vsyncpa [#allocation14], 0 }
   0x4   :  { %19 = vsyncpa [#allocation6], 0  ;;  %s9039_s13 = smov [#allocation7]   ;;  %s9040_s15 = smov [#allocation10]  }
   0x5   :  { %s42_s14 = sshll.u32 %s9039_s13, 4  ;;  %s64_s16 = sshll.u32 %s9040_s15, 4  ;;  %s43_s14 = int_to_ptr.vmem [resolvable:$true] %s42_s14  ;;  %s65_s16 = int_to_ptr.vmem [resolvable:$true] %s64_s16 }
   0x6   :  { %s8855_s17 = scalar_lea.vmem %s43_s14, 32  ;;  %p8860_p1 = scmp.lt.s32.totalorder %s43_s14, %s43_s14 }
   0x7   :  { %p8856_p0 = scmp.ne.s32.totalorder %s43_s14, %s8855_s17  ;;  %p8861_p2 = scmp.lt.s32.totalorder %s8855_s17, %s8855_s17 }
   0x9   :  { %p8862_p3 = por %p8861_p2, %p8860_p1 }
   0xb   :  { %p8863_p4 = pnand %p8862_p3, %p8856_p0 }
   0xd   :  { %8866 = shalt.err (!%p8863_p4)
}
   0xe   :  { %45 = dma.hbm_to_vmem [thread:$0]  %s9626_s3, 32, %s43_s14, [#allocation8]  }
   0xf   :  { %s8875_s20 = scalar_lea.vmem %s65_s16, 32  ;;  %p8880_p6 = scmp.lt.s32.totalorder %s65_s16, %s65_s16 }
  0x10   :  { %p8876_p5 = scmp.ne.s32.totalorder %s65_s16, %s8875_s20  ;;  %p8881_p7 = scmp.lt.s32.totalorder %s8875_s20, %s8875_s20 }
  0x12   :  { %p8882_p8 = por %p8881_p7, %p8880_p6 }
  0x14   :  { %p8883_p9 = pnand %p8882_p8, %p8876_p5 }
  0x16   :  { %8886 = shalt.err (!%p8883_p9)
}
  0x17   :  { %67 = dma.hbm_to_vmem [thread:$0]  %s9628_s5, 32, %s65_s16, [#allocation11]  }
  0x18   :  { %s9041_s23 = smov [#allocation13]  }
  0x19   :  { %s83_s24 = sshll.u32 %s9041_s23, 4  ;;  %s84_s24 = int_to_ptr.vmem [resolvable:$true] %s83_s24 }
  0x1a   :  { %s8895_s25 = scalar_lea.vmem %s84_s24, 4096  ;;  %p8900_p11 = scmp.lt.s32.totalorder %s84_s24, %s84_s24 }
  0x1b   :  { %p8896_p10 = scmp.ne.s32.totalorder %s84_s24, %s8895_s25  ;;  %p8901_p12 = scmp.lt.s32.totalorder %s8895_s25, %s8895_s25 }
  0x1d   :  { %p8902_p13 = por %p8901_p12, %p8900_p11 }
  0x1f   :  { %p8903_p0 = pnand %p8902_p13, %p8896_p10 }
  0x21   :  { %8906 = shalt.err (!%p8903_p0)
}
  0x22   :  { %s9042_s3 = smov 64   ;;  %s9043_s26 = smov 4  }
  0x23   :  { %89 = dma.hbm_to_vmem [thread:$0]  %s9631_s8, 4096, %s84_s24, [#allocation14], %s9042_s3, %s9042_s3, %s9043_s26  }
  0x24   :  { %s9044_s29 = smov [#allocation4]  }
  0x25   :  { %s29_s30 = sshll.u32 %s9044_s29, 4  ;;  %s30_s30 = int_to_ptr.vmem [resolvable:$true] %s29_s30 }
  0x26   :  { %s8915_s5 = scalar_lea.vmem %s30_s30, 10240  ;;  %p8920_p2 = scmp.lt.s32.totalorder %s30_s30, %s30_s30 }
  0x27   :  { %p8916_p1 = scmp.ne.s32.totalorder %s30_s30, %s8915_s5  ;;  %p8921_p3 = scmp.lt.s32.totalorder %s8915_s5, %s8915_s5 }
  0x29   :  { %p8922_p4 = por %p8921_p3, %p8920_p2 }
  0x2b   :  { %p8923_p5 = pnand %p8922_p4, %p8916_p1 }
  0x2d   :  { %8926 = shalt.err (!%p8923_p5)
}
  0x2e   :  { %s9045_s11 = smov 128   ;;  %s9046_s12 = smov 8  }
  0x2f   :  { %35 = dma.hbm_to_vmem [thread:$0]  %s9625_s2, 10240, %s30_s30, [#allocation5], %s9045_s11, %s9045_s11, %s9046_s12  }
  0x30   :  { %s9047_s15 = smov [#allocation9]   ;;  %s9048_s17 = smov [#allocation12]  }
  0x31   :  { %s51_s16 = sshll.u32 %s9047_s15, 4  ;;  %s74_s8 = sshll.u32 %s9048_s17, 4  ;;  %s52_s16 = int_to_ptr.vmem [resolvable:$true] %s51_s16  ;;  %s75_s8 = int_to_ptr.vmem [resolvable:$true] %s74_s8 }
  0x32   :  { %s8935_s18 = scalar_lea.vmem %s52_s16, 6144  ;;  %p8940_p7 = scmp.lt.s32.totalorder %s52_s16, %s52_s16 }
  0x33   :  { %p8936_p6 = scmp.ne.s32.totalorder %s52_s16, %s8935_s18  ;;  %p8941_p8 = scmp.lt.s32.totalorder %s8935_s18, %s8935_s18 }
  0x35   :  { %p8942_p9 = por %p8941_p8, %p8940_p7 }
  0x37   :  { %p8943_p10 = pnand %p8942_p9, %p8936_p6 }
  0x39   :  { %8946 = shalt.err (!%p8943_p10)
}
  0x3a   :  { %57 = dma.hbm_to_vmem [thread:$0]  %s9627_s4, 6144, %s52_s16, [#allocation8], %s9045_s11, %s9045_s11, %s9046_s12  }
  0x3b   :  { %s8955_s21 = scalar_lea.vmem %s75_s8, 64  ;;  %p8960_p12 = scmp.lt.s32.totalorder %s75_s8, %s75_s8 }
  0x3c   :  { %p8956_p11 = scmp.ne.s32.totalorder %s75_s8, %s8955_s21  ;;  %p8961_p13 = scmp.lt.s32.totalorder %s8955_s21, %s8955_s21 }
  0x3e   :  { %p8962_p0 = por %p8961_p13, %p8960_p12 }
  0x40   :  { %p8963_p1 = pnand %p8962_p0, %p8956_p11 }
  0x42   :  { %8966 = shalt.err (!%p8963_p1)
}
  0x43   :  { %77 = dma.hbm_to_vmem [thread:$0]  %s9630_s7, 64, %s75_s8, [#allocation11]  }
  0x44   :  { %s9049_s23 = smov [#allocation15]  }
  0x45   :  { %s96_s24 = sshll.u32 %s9049_s23, 4  ;;  %s97_s24 = int_to_ptr.vmem [resolvable:$true] %s96_s24 }
  0x46   :  { %s8975_s25 = scalar_lea.vmem %s97_s24, 16  ;;  %s8979_s3 = scalar_lea.vmem %s97_s24, 32 }
  0x47   :  { %p8976_p2 = scmp.ne.s32.totalorder %s97_s24, %s8975_s25  ;;  %p8980_p3 = scmp.lt.s32.totalorder %s97_s24, %s97_s24 }
  0x48   :  { %p8981_p4 = scmp.lt.s32.totalorder %s8979_s3, %s8975_s25 }
  0x4a   :  { %p8982_p5 = por %p8981_p4, %p8980_p3 }
  0x4c   :  { %p8983_p6 = pnand %p8982_p5, %p8976_p2 }
  0x4e   :  { %8986 = shalt.err (!%p8983_p6)
}
  0x4f   :  { %99 = dma.hbm_to_vmem [thread:$0]  %s9632_s9, 16, %s97_s24, [#allocation14]  }
  0x50   :  { %9027 = dma.done.wait [#allocation5], 10240  }
  0x51   :  { %9028 = vsyncadd [#allocation5], 4294957056 }
  0x52   :  { %9029 = dma.done.wait [#allocation8], 6176  }
  0x53   :  { %9030 = vsyncadd [#allocation8], 4294961120 }
  0x54   :  { %9031 = dma.done.wait [#allocation11], 96  }
  0x55   :  { %9032 = vsyncadd [#allocation11], 4294967200 }
  0x56   :  { %9033 = dma.done.wait [#allocation14], 4112  }
  0x57   :  { %9034 = vsyncadd [#allocation14], 4294963184  ;;  %v7662_v0 = vld [vmem:[#allocation4 + $0x74] ss:$8 sps:$4 sm:$0xff]   ;;  %v7664_v1 = vld [vmem:[#allocation4 + $0x70] ss:$8 sps:$4 sm:$0xff]  }
  0x58   :  { %755 = vmatprep.subr.bf16.mxu0 %v7662_v0  ;;  %v7665_v2 = vld [vmem:[#allocation4 + $0x174] ss:$8 sps:$4 sm:$0xff]   ;;  %v7667_v3 = vld [vmem:[#allocation4 + $0x170] ss:$8 sps:$4 sm:$0xff]   ;;  %v7668_v4 = vld [vmem:[#allocation4 + $0x64] ss:$8 sps:$4 sm:$0xff]  }
  0x59   :  { %756 = vmatpush1.bf16.msra.mxu0 %v7664_v1  ;;  %v7670_v5 = vld [vmem:[#allocation4 + $0x60] ss:$8 sps:$4 sm:$0xff]   ;;  %818 = vmatprep.subr.bf16.mxu1 %v7665_v2  ;;  %v7671_v6 = vld [vmem:[#allocation4 + $0x164] ss:$8 sps:$4 sm:$0xff]   ;;  %v7674_v8 = vld [vmem:[#allocation4 + $0x54] ss:$8 sps:$4 sm:$0xff]  }
  0x5a   :  { %819 = vmatpush1.bf16.msra.mxu1 %v7667_v3  ;;  %757 = vmatprep.subr.bf16.mxu0 %v7668_v4  ;;  %v7673_v7 = vld [vmem:[#allocation4 + $0x160] ss:$8 sps:$4 sm:$0xff]   ;;  %v7676_v9 = vld [vmem:[#allocation4 + $0x50] ss:$8 sps:$4 sm:$0xff]   ;;  %v7677_v10 = vld [vmem:[#allocation4 + $0x154] ss:$8 sps:$4 sm:$0xff]  }
  0x5b   :  { %820 = vmatprep.subr.bf16.mxu1 %v7671_v6  ;;  %v7680_v11 = vld [vmem:[#allocation4 + $0x44] ss:$8 sps:$4 sm:$0xff]   ;;  %v7679_v12 = vld [vmem:[#allocation4 + $0x150] ss:$8 sps:$4 sm:$0xff]   ;;  %v7682_v14 = vld [vmem:[#allocation4 + $0x40] ss:$8 sps:$4 sm:$0xff]  }
  0x5c   :  { %v7683_v13 = vld [vmem:[#allocation4 + $0x144] ss:$8 sps:$4 sm:$0xff]   ;;  %v7686_v15 = vld [vmem:[#allocation4 + $0x34] ss:$8 sps:$4 sm:$0xff]   ;;  %v7685_v16 = vld [vmem:[#allocation4 + $0x140] ss:$8 sps:$4 sm:$0xff]  }
  0x5d   :  { %758 = vmatpush1.bf16.msra.mxu0 %v7670_v5  ;;  %v7689_v17 = vld [vmem:[#allocation4 + $0x134] ss:$8 sps:$4 sm:$0xff]   ;;  %v7688_v18 = vld [vmem:[#allocation4 + $0x30] ss:$8 sps:$4 sm:$0xff]   ;;  %v7692_v19 = vld [vmem:[#allocation4 + $0x24] ss:$8 sps:$4 sm:$0xff]  }
  0x5e   :  { %759 = vmatprep.subr.bf16.mxu0 %v7674_v8  ;;  %821 = vmatpush1.bf16.msra.mxu1 %v7673_v7  ;;  %v7691_v20 = vld [vmem:[#allocation4 + $0x130] ss:$8 sps:$4 sm:$0xff]   ;;  %v7695_v21 = vld [vmem:[#allocation4 + $0x124] ss:$8 sps:$4 sm:$0xff]   ;;  %v7694_v22 = vld [vmem:[#allocation4 + $0x20] ss:$8 sps:$4 sm:$0xff]  }
  0x5f   :  { %822 = vmatprep.subr.bf16.mxu1 %v7677_v10  ;;  %v7698_v23 = vld [vmem:[#allocation4 + $0x14] ss:$8 sps:$4 sm:$0xff]   ;;  %v7697_v24 = vld [vmem:[#allocation4 + $0x120] ss:$8 sps:$4 sm:$0xff]   ;;  %v7700_v26 = vld [vmem:[#allocation4 + $0x10] ss:$8 sps:$4 sm:$0xff]  }
  0x60   :  { %v7701_v25 = vld [vmem:[#allocation4 + $0x114] ss:$8 sps:$4 sm:$0xff]   ;;  %v7704_v27 = vld [vmem:[#allocation4 + $0x4] ss:$8 sps:$4 sm:$0xff]   ;;  %v7703_v28 = vld [vmem:[#allocation4 + $0x110] ss:$8 sps:$4 sm:$0xff]  }
  0x61   :  { %760 = vmatpush1.bf16.msra.mxu0 %v7676_v9  ;;  %v7707_v29 = vld [vmem:[#allocation4 + $0x104] ss:$8 sps:$4 sm:$0xff]   ;;  %v7706_v30 = vld [vmem:[#allocation4] ss:$8 sps:$4 sm:$0xff]   ;;  %v7710_v31 = vld [vmem:[#allocation4 + $0xf4] ss:$8 sps:$4 sm:$0xff]  }
  0x62   :  { %761 = vmatprep.subr.bf16.mxu0 %v7680_v11  ;;  %823 = vmatpush1.bf16.msra.mxu1 %v7679_v12  ;;  %v7709_v32 = vld [vmem:[#allocation4 + $0x100] ss:$8 sps:$4 sm:$0xff]   ;;  %v7713_v33 = vld [vmem:[#allocation4 + $0x1f4] ss:$8 sps:$4 sm:$0xff]   ;;  %v7712_v34 = vld [vmem:[#allocation4 + $0xf0] ss:$8 sps:$4 sm:$0xff]  }
  0x63   :  { %824 = vmatprep.subr.bf16.mxu1 %v7683_v13  ;;  %v7716_v35 = vld [vmem:[#allocation4 + $0xe4] ss:$8 sps:$4 sm:$0xff]   ;;  %v7715_v36 = vld [vmem:[#allocation4 + $0x1f0] ss:$8 sps:$4 sm:$0xff]   ;;  %v7718_v38 = vld [vmem:[#allocation4 + $0xe0] ss:$8 sps:$4 sm:$0xff]  }
  0x64   :  { %v7719_v37 = vld [vmem:[#allocation4 + $0x1e4] ss:$8 sps:$4 sm:$0xff]   ;;  %v7722_v39 = vld [vmem:[#allocation4 + $0xd4] ss:$8 sps:$4 sm:$0xff]   ;;  %v7721_v40 = vld [vmem:[#allocation4 + $0x1e0] ss:$8 sps:$4 sm:$0xff]  }
  0x65   :  { %762 = vmatpush1.bf16.msra.mxu0 %v7682_v14  ;;  %v7725_v41 = vld [vmem:[#allocation4 + $0x1d4] ss:$8 sps:$4 sm:$0xff]   ;;  %v7724_v42 = vld [vmem:[#allocation4 + $0xd0] ss:$8 sps:$4 sm:$0xff]   ;;  %v7728_v43 = vld [vmem:[#allocation4 + $0xc4] ss:$8 sps:$4 sm:$0xff]  }
  0x66   :  { %763 = vmatprep.subr.bf16.mxu0 %v7686_v15  ;;  %825 = vmatpush1.bf16.msra.mxu1 %v7685_v16  ;;  %v7727_v44 = vld [vmem:[#allocation4 + $0x1d0] ss:$8 sps:$4 sm:$0xff]   ;;  %v7731_v45 = vld [vmem:[#allocation4 + $0x1c4] ss:$8 sps:$4 sm:$0xff]   ;;  %vm145_vm0 = vcmask 1046528   ;;  %vm187_vm1 = vcmask 1043456  }
  0x67   :  { %826 = vmatprep.subr.bf16.mxu1 %v7689_v17  ;;  %v9133_v46 = vld [vmem:[%s9623_s0] sm:$0xff]  ;;  %v9138_v47 = vld [vmem:[%s9623_s0 + $0x8] sm:$0x3f]  ;;  %v7734_v52 = vld [vmem:[#allocation4 + $0xb4] ss:$8 sps:$4 sm:$0xff]   ;;  %vm170_vm2 = vcmask 1045504  }
  0x68   :  { %v7730_v48 = vld [vmem:[#allocation4 + $0xc0] ss:$8 sps:$4 sm:$0xff]   ;;  %v146_v49 = vrot.slane %v9133_v46, 1  ;;  %v9142_v50 = vrot.slane %v9138_v47, 1  ;;  %v7737_v56 = vld [vmem:[#allocation4 + $0x1b4] ss:$8 sps:$4 sm:$0xff]  }
  0x69   :  { %764 = vmatpush1.bf16.msra.mxu0 %v7688_v18  ;;  %v7733_v51 = vld [vmem:[#allocation4 + $0x1c0] ss:$8 sps:$4 sm:$0xff]   ;;  %v7736_v58 = vld [vmem:[#allocation4 + $0xb0] ss:$8 sps:$4 sm:$0xff]   ;;  %v171_v59 = vrot.slane %v9133_v46, 2  ;;  %v9161_v60 = vrot.slane %v9138_v47, 2 }
  0x6a   :  { %765 = vmatprep.subr.bf16.mxu0 %v7692_v19  ;;  %827 = vmatpush1.bf16.msra.mxu1 %v7691_v20  ;;  %v9147_v53 = vld [vmem:[%s9624_s1] sm:$0xff]  ;;  %v9152_v54 = vld [vmem:[%s9624_s1 + $0x8] sm:$0x3f]  ;;  %v9156_v55 = vsel %vm145_vm0, %v146_v49, %v9142_v50  ;;  %v7739_v1 = vld [vmem:[#allocation4 + $0x1b0] ss:$8 sps:$4 sm:$0xff]   ;;  %v195_v19 = vrot.slane %v9142_v50, 4 }
  0x6b   :  { %828 = vmatprep.subr.bf16.mxu1 %v7695_v21  ;;  %v189_v57 = vrot.slane %v9156_v55, 4  ;;  %v7740_v61 = vld [vmem:[#allocation4 + $0xa4] ss:$8 sps:$4 sm:$0xff]   ;;  %v160_v63 = vrot.slane %v9147_v53, 1  ;;  %v9167_v0 = vrot.slane %v9152_v54, 1  ;;  %v9172_v3 = vsel %vm170_vm2, %v171_v59, %v9161_v60  ;;  %v9186_v16 = vld [vmem:[%s9624_s1 + $0x10] sm:$0xff] }
  0x6c   :  { %v7743_v4 = vld [vmem:[#allocation4 + $0x1a4] ss:$8 sps:$4 sm:$0xff]   ;;  %v191_v5 = vrot.slane %v9172_v3, 4  ;;  %v7742_v6 = vld [vmem:[#allocation4 + $0xa0] ss:$8 sps:$4 sm:$0xff]   ;;  %v188_v14 = vrot.slane %v9147_v53, 4 }
  0x6d   :  { %766 = vmatpush1.bf16.msra.mxu0 %v7694_v22  ;;  %v239_v62 = vsel %vm187_vm1, %v9152_v54, %v189_v57  ;;  %v7746_v7 = vld [vmem:[#allocation4 + $0x94] ss:$8 sps:$4 sm:$0xff]   ;;  %v9177_v8 = vsel %vm145_vm0, %v160_v63, %v9167_v0  ;;  %v7745_v10 = vld [vmem:[#allocation4 + $0x1a0] ss:$8 sps:$4 sm:$0xff]   ;;  %v7748_v11 = vld [vmem:[#allocation4 + $0x90] ss:$8 sps:$4 sm:$0xff]  }
  0x6e   :  { %767 = vmatprep.subr.bf16.mxu0 %v7698_v23  ;;  %829 = vmatpush1.bf16.msra.mxu1 %v7697_v24  ;;  %v329_v2 = vpack.c.bf16 %v239_v62, %v9147_v53  ;;  %v241_v9 = vsel %vm187_vm1, %v9167_v0, %v191_v5  ;;  %v7749_v13 = vld [vmem:[#allocation4 + $0x194] ss:$8 sps:$4 sm:$0xff]   ;;  %v7751_v15 = vld [vmem:[#allocation4 + $0x190] ss:$8 sps:$4 sm:$0xff]   ;;  %v7752_v18 = vld [vmem:[#allocation4 + $0x84] ss:$8 sps:$4 sm:$0xff]  }
  0x6f   :  { %830 = vmatprep.subr.bf16.mxu1 %v7701_v25  ;;  %v331_v12 = vpack.c.bf16 %v241_v9, %v9177_v8  ;;  %v9191_v17 = vld [vmem:[%s9624_s1 + $0x18] sm:$0x3f]  ;;  %v9197_v20 = vld [vmem:[%s9623_s0 + $0x10] sm:$0xff]  ;;  %v7754_v22 = vld [vmem:[#allocation4 + $0x80] ss:$8 sps:$4 sm:$0xff]   ;;  %v190_v24 = vrot.slane %v9177_v8, 4  ;;  %v238_v25 = vsel %vm187_vm1, %v9138_v47, %v188_v14 }
  0x70   :  { %787 = vmatprep.mubr.bf16.mxu0 %v329_v2  ;;  %v9202_v21 = vld [vmem:[%s9623_s0 + $0x18] sm:$0x3f]  ;;  %v7755_v23 = vld [vmem:[#allocation4 + $0x184] ss:$8 sps:$4 sm:$0xff]   ;;  %v208_v8 = vrot.slane %v9191_v17, 4  ;;  %vm1020_vm3 = vcmask 1041408  }
  0x71   :  { %768 = vmatpush1.bf16.msra.mxu0 %v7700_v26  ;;  %850 = vmatprep.mubr.bf16.mxu1 %v331_v12  ;;  %v163_v26 = vrot.slane %v9186_v16, 1  ;;  %v7764_v63 = vld [vmem:[#allocation4 + $0x250] ss:$8 sps:$4 sm:$0xff]   ;;  %v7769_v2 = vld [vmem:[#allocation4 + $0x244] ss:$8 sps:$4 sm:$0xff]   ;;  %vm9051_vm4 = vmmov 1  }
  0x72   :  { %769 = vmatprep.subr.bf16.mxu0 %v7704_v27  ;;  %831 = vmatpush1.bf16.msra.mxu1 %v7703_v28  ;;  %v9209_v27 = vrot.slane %v9191_v17, 1  ;;  %v199_v28 = vrot.slane %v9161_v60, 4  ;;  %vm9300_vm5 = vmpackc.low %vm1020_vm3, %vm9051_vm4  ;;  %s9052_s0 = smov [#allocation2]  }
  0x73   :  { %832 = vmatprep.subr.bf16.mxu1 %v7707_v29  ;;  %v7757_v29 = vld [vmem:[#allocation4 + $0x180] ss:$8 sps:$4 sm:$0xff]   ;;  %s129_s1 = sshll.u32 %s9052_s0, 4  ;;  %s130_s1 = int_to_ptr.vmem [resolvable:$true] %s129_s1 }
  0x74   :  { %v212_v12 = vrot.slane %v9209_v27, 4  ;;  %s8995_s19 = scalar_lea.vmem %s130_s1, 81920  ;;  %p9000_p8 = scmp.lt.s32.totalorder %s130_s1, %s130_s1 }
  0x75   :  { %770 = vmatpush1.bf16.msra.mxu0 %v7706_v30  ;;  %v7760_v30 = vld [vmem:[#allocation4 + $0x274] ss:$8 sps:$4 sm:$0xff]   ;;  %p8996_p7 = scmp.ne.s32.totalorder %s130_s1, %s8995_s19  ;;  %p9001_p9 = scmp.lt.s32.totalorder %s8995_s19, %s8995_s19 }
  0x76   :  { %771 = vmatprep.subr.bf16.mxu0 %v7710_v31  ;;  %833 = vmatpush1.bf16.msra.mxu1 %v7709_v32  ;;  %v149_v31 = vrot.slane %v9197_v20, 1  ;;  %v174_v32 = vrot.slane %v9197_v20, 2 }
  0x77   :  { %834 = vmatprep.subr.bf16.mxu1 %v7713_v33  ;;  %v9215_v33 = vrot.slane %v9202_v21, 1  ;;  %p9002_p10 = por %p9001_p9, %p9000_p8 }
  0x79   :  { %772 = vmatpush2.bf16.msra.mxu0 %v7712_v34  ;;  %v9218_v34 = vrot.slane %v9202_v21, 2  ;;  %p9003_p11 = pnand %p9002_p10, %p8996_p7 }
  0x7a   :  { %773 = vmatprep.subr.bf16.mxu0 %v7716_v35  ;;  %835 = vmatpush2.bf16.msra.mxu1 %v7715_v36  ;;  %v196_v35 = vsel %vm187_vm1, %v189_v57, %v195_v19  ;;  %v7784_v36 = vld [vmem:[#allocation9 + $0x74] ss:$8 sps:$4 sm:$0xff]  }
  0x7b   :  { %836 = vmatprep.subr.bf16.mxu1 %v7719_v37  ;;  %v7758_v37 = vld [vmem:[#allocation4 + $0x270] ss:$8 sps:$4 sm:$0xff]   ;;  %v9233_v47 = vsel %vm170_vm2, %v174_v32, %v9218_v34  ;;  %v7766_v57 = vld [vmem:[#allocation4 + $0x254] ss:$8 sps:$4 sm:$0xff]   ;;  %v214_v59 = vrot.slane %v9218_v34, 4 }
  0x7c   :  { %v7776_v32 = vld [vmem:[#allocation4 + $0x210] ss:$8 sps:$4 sm:$0xff]  }
  0x7d   :  { %774 = vmatpush2.bf16.msra.mxu0 %v7718_v38  ;;  %v240_v38 = vsel %vm187_vm1, %v9142_v50, %v190_v24  ;;  %v210_v50 = vrot.slane %v9215_v33, 4 }
  0x7e   :  { %775 = vmatprep.subr.bf16.mxu0 %v7722_v39  ;;  %837 = vmatpush2.bf16.msra.mxu1 %v7721_v40  ;;  %v328_v39 = vpack.c.bf16 %v238_v25, %v9133_v46  ;;  %v7763_v40 = vld [vmem:[#allocation4 + $0x264] ss:$8 sps:$4 sm:$0xff]   ;;  %v330_v46 = vpack.c.bf16 %v240_v38, %v9156_v55  ;;  %v182_v25 = vrot.slane %v9152_v54, 2  ;;  %v185_v38 = vrot.slane %v9191_v17, 2 }
  0x7f   :  { %838 = vmatprep.subr.bf16.mxu1 %v7725_v41  ;;  %v165_v41 = vsel %vm145_vm0, %v163_v26, %v9209_v27 }
  0x81   :  { %776 = vmatpush2.bf16.msra.mxu0 %v7724_v42  ;;  %v200_v42 = vsel %vm187_vm1, %v191_v5, %v199_v28  ;;  %v9050_v28 = vmov 0  }
  0x82   :  { %777 = vmatprep.subr.bf16.mxu0 %v7728_v43  ;;  %839 = vmatpush2.bf16.msra.mxu1 %v7727_v44  ;;  %v193_v43 = vrot.slane %v9152_v54, 4  ;;  %v334_v44 = vpack.c.bf16 %v9186_v16, %v196_v35 }
  0x83   :  { %840 = vmatprep.subr.bf16.mxu1 %v7731_v45  ;;  %v151_v45 = vsel %vm145_vm0, %v149_v31, %v9215_v33 }
  0x84   :  { %v204_v49 = vrot.slane %v151_v45, 4 }
  0x85   :  { %778 = vmatpush2.bf16.msra.mxu0 %v7730_v48  ;;  %v7782_v48 = vld [vmem:[#allocation9 + $0x70] ss:$8 sps:$4 sm:$0xff]  }
  0x86   :  { %779 = vmatprep.subr.bf16.mxu0 %v7734_v52  ;;  %841 = vmatpush2.bf16.msra.mxu1 %v7733_v51  ;;  %v7761_v51 = vld [vmem:[#allocation4 + $0x260] ss:$8 sps:$4 sm:$0xff]   ;;  %v336_v52 = vpack.c.bf16 %v165_v41, %v200_v42  ;;  %v211_v55 = vsel %vm187_vm1, %v204_v49, %v210_v50  ;;  %v244_v62 = vsel %vm187_vm1, %v9191_v17, %v204_v49  ;;  %v216_v42 = vrot.slane %v185_v38, 4  ;;  %v7794_v50 = vld [vmem:[#allocation9 + $0x30] ss:$8 sps:$4 sm:$0xff]  }
  0x87   :  { %842 = vmatprep.subr.bf16.mxu1 %v7737_v56  ;;  %v197_v56 = vrot.slane %v9167_v0, 4  ;;  %v7796_v49 = vld [vmem:[#allocation9 + $0x34] ss:$8 sps:$4 sm:$0xff]  }
  0x89   :  { %780 = vmatpush2.bf16.msra.mxu0 %v7736_v58  ;;  %v206_v58 = vrot.slane %v9233_v47, 4  ;;  %v198_v0 = vsel %vm187_vm1, %v190_v24, %v197_v56  ;;  %v181_v24 = vrot.slane %v9147_v53, 2  ;;  %v7781_v53 = vld [vmem:[#allocation4 + $0x204] ss:$8 sps:$4 sm:$0xff]   ;;  %v7800_v56 = vld [vmem:[#allocation9 + $0x10] ss:$8 sps:$4 sm:$0xff]  }
  0x8a   :  { %781 = vmatprep.subr.bf16.mxu0 %v7740_v61  ;;  %843 = vmatpush2.bf16.msra.mxu1 %v7739_v1  ;;  %v194_v61 = vsel %vm187_vm1, %v188_v14, %v193_v43  ;;  %v335_v9 = vpack.c.bf16 %v151_v45, %v198_v0  ;;  %v7787_v43 = vld [vmem:[#allocation9 + $0x64] ss:$8 sps:$4 sm:$0xff]   ;;  %v7790_v45 = vld [vmem:[#allocation9 + $0x54] ss:$8 sps:$4 sm:$0xff]   ;;  %v7812_v0 = vld [vmem:[#allocation9 + $0x160] ss:$8 sps:$4 sm:$0xff]  }
  0x8b   :  { %844 = vmatprep.subr.bf16.mxu1 %v7743_v4  ;;  %v333_v1 = vpack.c.bf16 %v9197_v20, %v194_v61  ;;  %v215_v4 = vsel %vm187_vm1, %v206_v58, %v214_v59  ;;  %v246_v5 = vsel %vm187_vm1, %v9209_v27, %v206_v58  ;;  %v7775_v27 = vld [vmem:[#allocation4 + $0x224] ss:$8 sps:$4 sm:$0xff]   ;;  %v7806_v59 = vld [vmem:[#allocation9 + $0x170] ss:$8 sps:$4 sm:$0xff]   ;;  %v7808_v61 = vld [vmem:[#allocation9 + $0x174] ss:$8 sps:$4 sm:$0xff]  }
  0x8c   :  { %v7803_v58 = vld [vmem:[#allocation9] ss:$8 sps:$4 sm:$0xff]  }
  0x8d   :  { %782 = vmatpush2.bf16.msra.mxu0 %v7742_v6  ;;  %v339_v6 = vpack.c.bf16 %v211_v55, %v244_v62  ;;  %v7809_v55 = vld [vmem:[#allocation9 + $0xf0] ss:$8 sps:$4 sm:$0xff]   ;;  %v7811_v62 = vld [vmem:[#allocation9 + $0xf4] ss:$8 sps:$4 sm:$0xff]  }
  0x8e   :  { %783 = vmatprep.subr.bf16.mxu0 %v7746_v7  ;;  %845 = vmatpush2.bf16.msra.mxu1 %v7745_v10  ;;  %v203_v7 = vrot.slane %v9186_v16, 4  ;;  %v205_v10 = vrot.slane %v165_v41, 4 }
  0x8f   :  { %846 = vmatprep.subr.bf16.mxu1 %v7749_v13  ;;  %v7767_v13 = vld [vmem:[#allocation4 + $0x240] ss:$8 sps:$4 sm:$0xff]  }
  0x90   :  { %v209_v14 = vsel %vm187_vm1, %v203_v7, %v208_v8  ;;  %v213_v19 = vsel %vm187_vm1, %v205_v10, %v212_v12  ;;  %v245_v20 = vsel %vm187_vm1, %v9215_v33, %v205_v10  ;;  %v7779_v33 = vld [vmem:[#allocation4 + $0x200] ss:$8 sps:$4 sm:$0xff]  }
  0x91   :  { %784 = vmatpush2.bf16.msra.mxu0 %v7748_v11  ;;  %v341_v11 = vpack.c.bf16 %v215_v4, %v246_v5  ;;  %v340_v26 = vpack.c.bf16 %v213_v19, %v245_v20  ;;  %v7820_v4 = vld [vmem:[#allocation9 + $0x154] ss:$8 sps:$4 sm:$0xff]   ;;  %v7818_v5 = vld [vmem:[#allocation9 + $0x150] ss:$8 sps:$4 sm:$0xff]   ;;  %v7826_v8 = vld [vmem:[#allocation9 + $0x144] ss:$8 sps:$4 sm:$0xff]  }
  0x92   :  { %785 = vmatprep.subr.bf16.mxu0 %v7752_v18  ;;  %847 = vmatpush2.bf16.msra.mxu1 %v7751_v15  ;;  %v243_v15 = vsel %vm187_vm1, %v9202_v21, %v203_v7  ;;  %v7772_v18 = vld [vmem:[#allocation4 + $0x234] ss:$8 sps:$4 sm:$0xff]   ;;  %v7773_v21 = vld [vmem:[#allocation4 + $0x220] ss:$8 sps:$4 sm:$0xff]  }
  0x93   :  { %848 = vmatprep.subr.bf16.mxu1 %v7755_v23  ;;  %v7770_v23 = vld [vmem:[#allocation4 + $0x230] ss:$8 sps:$4 sm:$0xff]   ;;  %v7836_v19 = vld [vmem:[#allocation9 + $0x120] ss:$8 sps:$4 sm:$0xff]  }
  0x94   :  { %v7821_v7 = vld [vmem:[#allocation9 + $0xd0] ss:$8 sps:$4 sm:$0xff]   ;;  %v7829_v10 = vld [vmem:[#allocation9 + $0xc4] ss:$8 sps:$4 sm:$0xff]   ;;  %v7832_v12 = vld [vmem:[#allocation9 + $0x134] ss:$8 sps:$4 sm:$0xff]  }
  0x95   :  { %786 = vmatpush2.bf16.msra.mxu0 %v7754_v22  ;;  %v338_v22 = vpack.c.bf16 %v209_v14, %v243_v15  ;;  %v7835_v14 = vld [vmem:[#allocation9 + $0xb4] ss:$8 sps:$4 sm:$0xff]   ;;  %v7833_v15 = vld [vmem:[#allocation9 + $0xb0] ss:$8 sps:$4 sm:$0xff]   ;;  %v7841_v20 = vld [vmem:[#allocation9 + $0xa4] ss:$8 sps:$4 sm:$0xff]  }
  0x96   :  { %881 = vmatprep.subr.bf16.mxu0 %v7760_v30  ;;  %849 = vmatpush2.bf16.msra.mxu1 %v7757_v29  ;;  %v183_v29 = vsel %vm170_vm2, %v181_v24, %v182_v25  ;;  %v7778_v30 = vld [vmem:[#allocation4 + $0x214] ss:$8 sps:$4 sm:$0xff]  }
  0x97   :  { %1333 = vmatprep.subr.bf16.mxu1 %v7784_v36  ;;  %v192_v31 = vrot.slane %v183_v29, 4  ;;  %v201_v36 = vrot.slane %v182_v25, 4  ;;  %v7842_v24 = vld [vmem:[#allocation9 + $0x110] ss:$8 sps:$4 sm:$0xff]   ;;  %v7847_v25 = vld [vmem:[#allocation9 + $0x94] ss:$8 sps:$4 sm:$0xff]  }
  0x98   :  { %788 = vmatmul.mubr.bf16.vlgmr.msra.gmra.mxu0 %v328_v39  ;;  %v7853_v29 = vld [vmem:[#allocation9 + $0x84] ss:$8 sps:$4 sm:$0xff]  }
  0x99   :  { %882 = vmatpush1.bf16.msra.mxu0 %v7758_v37  ;;  %797 = vmatprep.mubr.bf16.mxu0 %v334_v44  ;;  %v242_v54 = vsel %vm187_vm1, %v9161_v60, %v192_v31  ;;  %v184_v37 = vrot.slane %v9186_v16, 2  ;;  %v202_v39 = vsel %vm187_vm1, %v192_v31, %v201_v36  ;;  %v7785_v44 = vld [vmem:[#allocation9 + $0x60] ss:$8 sps:$4 sm:$0xff]  }
  0x9a   :  { %851 = vmatmul.mubr.bf16.vlgmr.msra.gmra.mxu1 %v330_v46  ;;  %883 = vmatprep.subr.bf16.mxu0 %v7763_v40  ;;  %v332_v35 = vpack.c.bf16 %v242_v54, %v9172_v3  ;;  %v337_v60 = vpack.c.bf16 %v9233_v47, %v202_v39  ;;  %v7788_v47 = vld [vmem:[#allocation9 + $0x50] ss:$8 sps:$4 sm:$0xff]   ;;  %v7791_v46 = vld [vmem:[#allocation9 + $0x40] ss:$8 sps:$4 sm:$0xff]  }
  0x9b   :  { %860 = vmatprep.mubr.bf16.mxu1 %v336_v52  ;;  %1334 = vmatpush1.bf16.msra.mxu1 %v7782_v48  ;;  %v186_v40 = vsel %vm170_vm2, %v184_v37, %v185_v38  ;;  %v7793_v48 = vld [vmem:[#allocation9 + $0x44] ss:$8 sps:$4 sm:$0xff]   ;;  %v7802_v52 = vld [vmem:[#allocation9 + $0x14] ss:$8 sps:$4 sm:$0xff]  }
  0x9c   :  { %v207_v41 = vrot.slane %v186_v40, 4  ;;  %1335 = vmatprep.subr.bf16.mxu1 %v7787_v43 }
  0x9d   :  { %884 = vmatpush1.bf16.msra.mxu0 %v7761_v51  ;;  %v7797_v51 = vld [vmem:[#allocation9 + $0x20] ss:$8 sps:$4 sm:$0xff]  }
  0x9e   :  { %885 = vmatprep.subr.bf16.mxu0 %v7766_v57  ;;  %v217_v3 = vsel %vm187_vm1, %v207_v41, %v216_v42  ;;  %v247_v16 = vsel %vm187_vm1, %v9218_v34, %v207_v41  ;;  %v7799_v34 = vld [vmem:[#allocation9 + $0x24] ss:$8 sps:$4 sm:$0xff]  }
  0x9f   :  { %v342_v17 = vpack.c.bf16 %v217_v3, %v247_v16  ;;  %1336 = vmatpush1.bf16.msra.mxu1 %v7785_v44  ;;  %v7805_v57 = vld [vmem:[#allocation9 + $0x4] ss:$8 sps:$4 sm:$0xff]   ;;  %v343_v44 = vld [vmem:[#allocation7] sm:$0x3] }
  0xa0   :  { %798 = vmatmul.mubr.bf16.gmra.mxu0 %v333_v1  ;;  %1337 = vmatprep.subr.bf16.mxu1 %v7790_v45  ;;  %v7817_v1 = vld [vmem:[#allocation9 + $0xe4] ss:$8 sps:$4 sm:$0xff]  }
  0xa1   :  { %886 = vmatpush1.bf16.msra.mxu0 %v7764_v63  ;;  %807 = vmatprep.mubr.bf16.mxu0 %v339_v6  ;;  %v7814_v63 = vld [vmem:[#allocation9 + $0x164] ss:$8 sps:$4 sm:$0xff]   ;;  %v7823_v6 = vld [vmem:[#allocation9 + $0xd4] ss:$8 sps:$4 sm:$0xff]  }
  0xa2   :  { %861 = vmatmul.mubr.bf16.gmra.mxu1 %v335_v9  ;;  %887 = vmatprep.subr.bf16.mxu0 %v7769_v2  ;;  %v7815_v2 = vld [vmem:[#allocation9 + $0xe0] ss:$8 sps:$4 sm:$0xff]  }
  0xa3   :  { %870 = vmatprep.mubr.bf16.mxu1 %v341_v11  ;;  %1338 = vmatpush1.bf16.msra.mxu1 %v7788_v47  ;;  %v7824_v9 = vld [vmem:[#allocation9 + $0x140] ss:$8 sps:$4 sm:$0xff]  }
  0xa4   :  { %1339 = vmatprep.subr.bf16.mxu1 %v7793_v48  ;;  %v7827_v11 = vld [vmem:[#allocation9 + $0xc0] ss:$8 sps:$4 sm:$0xff]  }
  0xa5   :  { %888 = vmatpush1.bf16.msra.mxu0 %v7767_v13  ;;  %v7830_v13 = vld [vmem:[#allocation9 + $0x130] ss:$8 sps:$4 sm:$0xff]  }
  0xa6   :  { %889 = vmatprep.subr.bf16.mxu0 %v7772_v18  ;;  %v7838_v18 = vld [vmem:[#allocation9 + $0x124] ss:$8 sps:$4 sm:$0xff]  }
  0xa7   :  { %1340 = vmatpush1.bf16.msra.mxu1 %v7791_v46 }
  0xa8   :  { %808 = vmatmul.mubr.bf16.gmra.mxu0 %v338_v22  ;;  %1341 = vmatprep.subr.bf16.mxu1 %v7796_v49  ;;  %v7839_v22 = vld [vmem:[#allocation9 + $0xa0] ss:$8 sps:$4 sm:$0xff]  }
  0xa9   :  { %890 = vmatpush1.bf16.msra.mxu0 %v7770_v23  ;;  %913 = vmatprep.mubr.bf16.mxu0 %v9050_v28  ;;  %v7844_v23 = vld [vmem:[#allocation9 + $0x114] ss:$8 sps:$4 sm:$0xff]  }
  0xaa   :  { %871 = vmatmul.mubr.bf16.gmra.mxu1 %v340_v26  ;;  %891 = vmatprep.subr.bf16.mxu0 %v7775_v27  ;;  %v7845_v26 = vld [vmem:[#allocation9 + $0x90] ss:$8 sps:$4 sm:$0xff]   ;;  %v7850_v27 = vld [vmem:[#allocation9 + $0x104] ss:$8 sps:$4 sm:$0xff]  }
  0xab   :  { %1342 = vmatpush1.bf16.msra.mxu1 %v7794_v50 }
  0xac   :  { %1343 = vmatprep.subr.bf16.mxu1 %v7799_v34 }
  0xad   :  { %892 = vmatpush1.bf16.msra.mxu0 %v7773_v21  ;;  %v7848_v21 = vld [vmem:[#allocation9 + $0x100] ss:$8 sps:$4 sm:$0xff]  }
  0xae   :  { %893 = vmatprep.subr.bf16.mxu0 %v7778_v30  ;;  %v7851_v30 = vld [vmem:[#allocation9 + $0x80] ss:$8 sps:$4 sm:$0xff]  }
  0xaf   :  { %1344 = vmatpush1.bf16.msra.mxu1 %v7797_v51 }
  0xb0   :  { %1345 = vmatprep.subr.bf16.mxu1 %v7802_v52 }
  0xb1   :  { %894 = vmatpush1.bf16.msra.mxu0 %v7776_v32 }
  0xb2   :  { %895 = vmatprep.subr.bf16.mxu0 %v7781_v53 }
  0xb3   :  { %1346 = vmatpush1.bf16.msra.mxu1 %v7800_v56 }
  0xb4   :  { %1347 = vmatprep.subr.bf16.mxu1 %v7805_v57 }
  0xb5   :  { %896 = vmatpush1.bf16.msra.mxu0 %v7779_v33 }
  0xb6   :  { %1386 = vmatprep.subr.bf16.mxu0 %v7808_v61 }
  0xb7   :  { %1348 = vmatpush1.bf16.msra.mxu1 %v7803_v58 }
  0xb8   :  { %914 = vmatmul.mubr.bf16.vlgmr.msra.gmra.mxu0 %v332_v35  ;;  %1349 = vmatprep.subr.bf16.mxu1 %v7811_v62 }
  0xb9   :  { %923 = vmatprep.mubr.bf16.mxu0 %v9050_v28  ;;  %1387 = vmatpush1.bf16.msra.mxu0 %v7806_v59 }
  0xba   :  { %1388 = vmatprep.subr.bf16.mxu0 %v7814_v63 }
  0xbb   :  { %1350 = vmatpush2.bf16.msra.mxu1 %v7809_v55 }
  0xbc   :  { %1351 = vmatprep.subr.bf16.mxu1 %v7817_v1 }
  0xbd   :  { %1389 = vmatpush1.bf16.msra.mxu0 %v7812_v0 }
  0xbe   :  { %1390 = vmatprep.subr.bf16.mxu0 %v7820_v4 }
  0xbf   :  { %1352 = vmatpush2.bf16.msra.mxu1 %v7815_v2 }
  0xc0   :  { %924 = vmatmul.mubr.bf16.gmra.mxu0 %v337_v60  ;;  %1353 = vmatprep.subr.bf16.mxu1 %v7823_v6  ;;  %v345_v60 = vlaneseq }
  0xc1   :  { %933 = vmatprep.mubr.bf16.mxu0 %v9050_v28  ;;  %1391 = vmatpush1.bf16.msra.mxu0 %v7818_v5 }
  0xc2   :  { %1392 = vmatprep.subr.bf16.mxu0 %v7826_v8  ;;  %v9278_v3 = vshrl.u32 %v345_v60, 7 }
  0xc3   :  { %1354 = vmatpush2.bf16.msra.mxu1 %v7821_v7 }
  0xc4   :  { %1355 = vmatprep.subr.bf16.mxu1 %v7829_v10  ;;  %v9281_v43 = vsub.s32 0, %v9278_v3  ;;  %v9284_v48 = vsub.s32 1, %v9278_v3 }
  0xc5   :  { %1393 = vmatpush1.bf16.msra.mxu0 %v7824_v9 }
  0xc6   :  { %1394 = vmatprep.subr.bf16.mxu0 %v7832_v12  ;;  %v348_v46 = vrot.slane %v343_v44, %v9281_v43  ;;  %v352_v34 = vrot.slane %v343_v44, %v9284_v48 }
  0xc7   :  { %1356 = vmatpush2.bf16.msra.mxu1 %v7827_v11 }
  0xc8   :  { %934 = vmatmul.mubr.bf16.gmra.mxu0 %v342_v17  ;;  %1357 = vmatprep.subr.bf16.mxu1 %v7835_v14 }
  0xc9   :  { %1418 = vmatprep.mubr.bf16.mxu0 %v9050_v28  ;;  %1395 = vmatpush1.bf16.msra.mxu0 %v7830_v13 }
  0xca   :  { %1396 = vmatprep.subr.bf16.mxu0 %v7838_v18 }
  0xcb   :  { %1358 = vmatpush2.bf16.msra.mxu1 %v7833_v15 }
  0xcc   :  { %1359 = vmatprep.subr.bf16.mxu1 %v7841_v20 }
  0xcd   :  { %1397 = vmatpush1.bf16.msra.mxu0 %v7836_v19 }
  0xce   :  { %1398 = vmatprep.subr.bf16.mxu0 %v7844_v23 }
  0xcf   :  { %1360 = vmatpush2.bf16.msra.mxu1 %v7839_v22 }
  0xd0   :  { %1361 = vmatprep.subr.bf16.mxu1 %v7847_v25 }
  0xd1   :  { %1399 = vmatpush1.bf16.msra.mxu0 %v7842_v24 }
  0xd2   :  { %1400 = vmatprep.subr.bf16.mxu0 %v7850_v27 }
  0xd3   :  { %1362 = vmatpush2.bf16.msra.mxu1 %v7845_v26 }
  0xd4   :  { %1363 = vmatprep.subr.bf16.mxu1 %v7853_v29 }
  0xd5   :  { %1401 = vmatpush1.bf16.msra.mxu0 %v7848_v21 }
  0xd7   :  { %1364 = vmatpush2.bf16.msra.mxu1 %v7851_v30 }
 0x158   :  { %v789_v31 = vpop.f32.mrf.mxu0 }
 0x159   :  { %v790_v1 = vadd.f32 %v789_v31, %v348_v46 }
 0x15a   :  { %v791_v32 = vpop.f32.mrf.mxu0  ;;  %v852_v33 = vpop.f32.mrf.mxu1 }
 0x15b   :  { %v792_v2 = vadd.f32 %v791_v32, %v352_v34  ;;  %v853_v12 = vadd.f32 %v852_v33, %v790_v1 }
 0x15c   :  { %v793_v53 = vpop.f32.mrf.mxu0  ;;  %v854_v37 = vpop.f32.mrf.mxu1 }
 0x15d   :  { %v794_v51 = vadd.f32 %v793_v53, %v348_v46  ;;  %v855_v13 = vadd.f32 %v854_v37, %v792_v2 }
 0x15e   :  { %v795_v54 = vpop.f32.mrf.mxu0  ;;  %v856_v40 = vpop.f32.mrf.mxu1 }
 0x15f   :  { %v796_v56 = vadd.f32 %v795_v54, %v352_v34  ;;  %v857_v59 = vadd.f32 %v856_v40, %v794_v51 }
 0x160   :  { %v799_v35 = vpop.f32.mrf.mxu0  ;;  %v858_v42 = vpop.f32.mrf.mxu1 }
 0x161   :  { %v800_v61 = vadd.f32 %v799_v35, %v348_v46  ;;  %v859_v62 = vadd.f32 %v858_v42, %v796_v56 }
 0x162   :  { %v801_v36 = vpop.f32.mrf.mxu0  ;;  %v862_v16 = vpop.f32.mrf.mxu1 }
 0x163   :  { %v802_v63 = vadd.f32 %v801_v36, %v352_v34  ;;  %v863_v6 = vadd.f32 %v862_v16, %v800_v61 }
 0x164   :  { %v803_v38 = vpop.f32.mrf.mxu0  ;;  %v864_v45 = vpop.f32.mrf.mxu1 }
 0x165   :  { %v865_v9 = vadd.f32 %v864_v45, %v802_v63  ;;  %v804_v30 = vadd.f32 %v803_v38, %v348_v46 }
 0x166   :  { %v9276_v39 = vpop.f32.mrf.mxu0  ;;  %v9287_v49 = vpop.f32.mrf.mxu1 }
 0x167   :  { %v806_v38 = vadd.f32 %v9276_v39, %v352_v34 }
 0x168   :  { %v809_v41 = vpop.f32.mrf.mxu0  ;;  %v9290_v57 = vpop.f32.mrf.mxu1 }
 0x169   :  { %v810_v14 = vadd.f32 %v809_v41, %v348_v46  ;;  %v869_v2 = vadd.f32 %v9290_v57, %v806_v38 }
 0x16a   :  { %v811_v17 = vpop.f32.mrf.mxu0  ;;  %v872_v4 = vpop.f32.mrf.mxu1 }
 0x16b   :  { %v812_v23 = vadd.f32 %v811_v17, %v352_v34  ;;  %v873_v31 = vadd.f32 %v872_v4, %v810_v14 }
 0x16c   :  { %v813_v47 = vpop.f32.mrf.mxu0  ;;  %v874_v15 = vpop.f32.mrf.mxu1 }
 0x16d   :  { %v814_v54 = vadd.f32 %v813_v47, %v348_v46  ;;  %v875_v37 = vadd.f32 %v874_v15, %v812_v23 }
 0x16e   :  { %v815_v50 = vpop.f32.mrf.mxu0  ;;  %v876_v32 = vpop.f32.mrf.mxu1 }
 0x16f   :  { %v816_v40 = vadd.f32 %v815_v50, %v352_v34  ;;  %v877_v46 = vadd.f32 %v876_v32, %v814_v54 }
 0x170   :  { %v878_v51 = vpop.f32.mrf.mxu1 }
 0x171   :  { %v879_v63 = vadd.f32 %v878_v51, %v816_v40 }
 0x178   :  { %v915_v52 = vpop.f32.mrf.mxu0 }
 0x179   :  { %v916_v24 = vadd.f32 %v915_v52, %v853_v12 }
 0x17a   :  { %v917_v58 = vpop.f32.mrf.mxu0 }
 0x17b   :  { %v918_v25 = vadd.f32 %v917_v58, %v855_v13  ;;  %v944_v60 = vmax.f32 %v916_v24, 0.0 }
 0x17c   :  { %v919_v55 = vpop.f32.mrf.mxu0 }
 0x17d   :  { %v920_v0 = vadd.f32 %v919_v55, %v857_v59  ;;  %v945_v41 = vmax.f32 %v918_v25, 0.0 }
 0x17e   :  { %v921_v5 = vpop.f32.mrf.mxu0 }
 0x17f   :  { %v922_v7 = vadd.f32 %v921_v5, %v859_v62  ;;  %v946_v10 = vmax.f32 %v920_v0, 0.0  ;;  %v867_v62 = vadd.f32 %v9287_v49, %v804_v30 }
 0x180   :  { %v925_v8 = vpop.f32.mrf.mxu0 }
 0x181   :  { %v926_v11 = vadd.f32 %v925_v8, %v863_v6  ;;  %v947_v19 = vmax.f32 %v922_v7, 0.0  ;;  %v964_v27 = vrot.slane %v946_v10, 4 }
 0x182   :  { %v927_v18 = vpop.f32.mrf.mxu0 }
 0x183   :  { %v948_v20 = vmax.f32 %v926_v11, 0.0  ;;  %v928_v22 = vadd.f32 %v927_v18, %v865_v9  ;;  %v967_v33 = vrot.slane %v947_v19, 4 }
 0x184   :  { %v929_v26 = vpop.f32.mrf.mxu0 }
 0x185   :  { %v965_v21 = vrot.slane %v948_v20, 4  ;;  %v949_v29 = vmax.f32 %v928_v22, 0.0  ;;  %v930_v6 = vadd.f32 %v929_v26, %v867_v62 }
 0x186   :  { %v931_v53 = vpop.f32.mrf.mxu0 }
 0x187   :  { %v966_v35 = vsel %vm187_vm1, %v964_v27, %v965_v21  ;;  %v968_v36 = vrot.slane %v949_v29, 4  ;;  %v986_v16 = vmax.f32 %v946_v10, %v965_v21  ;;  %v932_v11 = vadd.f32 %v931_v53, %v869_v2 }
 0x188   :  { %v935_v42 = vpop.f32.mrf.mxu0  ;;  %v984_v52 = vmax.f32 %v944_v60, %v966_v35  ;;  %v950_v24 = vmax.f32 %v930_v6, 0.0 }
 0x189   :  { %v969_v17 = vsel %vm187_vm1, %v967_v33, %v968_v36  ;;  %v987_v44 = vmax.f32 %v947_v19, %v968_v36  ;;  %v936_v45 = vadd.f32 %v935_v42, %v873_v31  ;;  %v951_v25 = vmax.f32 %v932_v11, 0.0 }
 0x18a   :  { %v985_v56 = vmax.f32 %v945_v41, %v969_v17  ;;  %v937_v47 = vpop.f32.mrf.mxu0 }
 0x18b   :  { %v993_v58 = vmax.f32 %v986_v16, %v987_v44  ;;  %v938_v59 = vadd.f32 %v937_v47, %v875_v37  ;;  %v952_v55 = vmax.f32 %v936_v45, 0.0 }
 0x18c   :  { %v992_v61 = vmax.f32 %v984_v52, %v985_v56  ;;  %v939_v50 = vpop.f32.mrf.mxu0 }
 0x18d   :  { %v1011_v0 = vrot.slane %v993_v58, 2  ;;  %v940_v1 = vadd.f32 %v939_v50, %v877_v46  ;;  %v1001_v5 = vrot.slane %v993_v58, 1  ;;  %v953_v7 = vmax.f32 %v938_v59, 0.0 }
 0x18e   :  { %v1010_v4 = vrot.slane %v992_v61, 2  ;;  %v941_v39 = vpop.f32.mrf.mxu0  ;;  %v1000_v34 = vrot.slane %v992_v61, 1  ;;  %v970_v12 = vrot.slane %v952_v55, 4  ;;  %v6915_v19 = vpack.c.bf16 %v993_v58, %v992_v61 }
 0x18f   :  { %v954_v8 = vmax.f32 %v940_v1, 0.0  ;;  %v942_v9 = vadd.f32 %v941_v39, %v879_v63  ;;  %v973_v20 = vrot.slane %v953_v7, 4 }
 0x190   :  { %v1012_v10 = vsel %vm170_vm2, %v1010_v4, %v1011_v0  ;;  %v1002_v13 = vsel %vm145_vm0, %v1000_v34, %v1001_v5 }
 0x191   :  { %v6924_v57 = vpack.c.bf16 %v1011_v0, %v1012_v10  ;;  %v971_v14 = vrot.slane %v954_v8, 4  ;;  %v955_v15 = vmax.f32 %v942_v9, 0.0  ;;  %v6912_v18 = vpack.c.bf16 %v1001_v5, %v1002_v13 }
 0x193   :  { %v972_v22 = vsel %vm187_vm1, %v970_v12, %v971_v14  ;;  %v974_v23 = vrot.slane %v955_v15, 4  ;;  %6913 = vmatprep.mubr.msk.bf16.mxu1 %vm9300_vm5, %v6912_v18  ;;  %6925 = vmatmul.mubr.msk.bf16.vlgmr.msra.gmra.mxu0 %vm9300_vm5, %v6924_v57  ;;  %v990_v26 = vmax.f32 %v952_v55, %v971_v14 }
 0x194   :  { %6916 = vmatmul.mubr.msk.bf16.vlgmr.msra.gmra.mxu1 %vm9300_vm5, %v6915_v19  ;;  %1428 = vmatprep.mubr.bf16.mxu0 %v9050_v28  ;;  %v988_v29 = vmax.f32 %v950_v24, %v972_v22 }
 0x195   :  { %v975_v27 = vsel %vm187_vm1, %v973_v20, %v974_v23  ;;  %v991_v21 = vmax.f32 %v953_v7, %v974_v23 }
 0x196   :  { %v989_v30 = vmax.f32 %v951_v25, %v975_v27 }
 0x197   :  { %v995_v31 = vmax.f32 %v990_v26, %v991_v21 }
 0x198   :  { %v994_v32 = vmax.f32 %v988_v29, %v989_v30 }
 0x199   :  { %v1004_v53 = vrot.slane %v995_v31, 1  ;;  %v1014_v54 = vrot.slane %v995_v31, 2 }
 0x19a   :  { %v1003_v33 = vrot.slane %v994_v32, 1  ;;  %v1013_v35 = vrot.slane %v994_v32, 2  ;;  %v6921_v41 = vpack.c.bf16 %v995_v31, %v994_v32 }
 0x19c   :  { %v1005_v36 = vsel %vm145_vm0, %v1003_v33, %v1004_v53  ;;  %v1015_v37 = vsel %vm170_vm2, %v1013_v35, %v1014_v54 }
 0x19d   :  { %v6918_v40 = vpack.c.bf16 %v1004_v53, %v1005_v36  ;;  %v6927_v60 = vpack.c.bf16 %v1014_v54, %v1015_v37 }
 0x19f   :  { %6919 = vmatprep.mubr.msk.bf16.mxu1 %vm9300_vm5, %v6918_v40  ;;  %6928 = vmatmul.mubr.msk.bf16.gmra.mxu0 %vm9300_vm5, %v6927_v60 }
 0x1a0   :  { %6922 = vmatmul.mubr.msk.bf16.gmra.mxu1 %vm9300_vm5, %v6921_v41 }
 0x1a1   :  { %9006 = shalt.err (!%p9003_p11)  }
 0x1a2   :  { %132 = dma.hbm_to_vmem [thread:$0]  %s9629_s6, 81920, %s130_s1, [#allocation3]  ;;  %v1081_v28 = vld [vmem:[#allocation10] sm:$0x3] }
 0x1a3   :  { %v1086_v42 = vrot.slane %v1081_v28, %v9281_v43  ;;  %v1090_v17 = vrot.slane %v1081_v28, %v9284_v48 }
 0x253   :  { %v1420_v16 = vpop.f32.mrf.mxu0 }
 0x254   :  { %v1367_v44 = vpop.f32.mrf.mxu1 }
 0x255   :  { %v1368_v45 = vadd.f32 %v1367_v44, %v1086_v42  ;;  %v1422_v38 = vpop.f32.mrf.mxu0 }
 0x256   :  { %v1369_v51 = vpop.f32.mrf.mxu1 }
 0x257   :  { %v1421_v52 = vadd.f32 %v1420_v16, %v1368_v45  ;;  %v1370_v56 = vadd.f32 %v1369_v51, %v1090_v17  ;;  %v1424_v59 = vpop.f32.mrf.mxu0 }
 0x258   :  { %v1371_v47 = vpop.f32.mrf.mxu1 }
 0x259   :  { %v9326_v46 = vmax.f32 %v1421_v52, 0.0  ;;  %v1423_v58 = vadd.f32 %v1422_v38, %v1370_v56  ;;  %v1372_v61 = vadd.f32 %v1371_v47, %v1086_v42  ;;  %v1426_v5 = vpop.f32.mrf.mxu0 }
 0x25a   :  { %v1373_v55 = vpop.f32.mrf.mxu1 }
 0x25b   :  { %v1451_v50 = vrot.slane %v9326_v46, 1  ;;  %v1459_v62 = vrot.slane %v9326_v46, 2  ;;  %v1467_v63 = vrot.slane %v9326_v46, 3  ;;  %v1475_v0 = vrot.slane %v9326_v46, 4 }
 0x25c   :  { %v1483_v1 = vrot.slane %v9326_v46, 5  ;;  %v1491_v2 = vrot.slane %v9326_v46, 6  ;;  %v1499_v4 = vrot.slane %v9326_v46, 7  ;;  %v9335_v39 = vmax.f32 %v1423_v58, 0.0 }
 0x25d   :  { %v1425_v34 = vadd.f32 %v1424_v59, %v1372_v61  ;;  %v1374_v6 = vadd.f32 %v1373_v55, %v1090_v17 }
 0x25e   :  { %v1452_v7 = vrot.slane %v9335_v39, 1  ;;  %v1460_v8 = vrot.slane %v9335_v39, 2  ;;  %v1468_v9 = vrot.slane %v9335_v39, 3  ;;  %v1476_v10 = vrot.slane %v9335_v39, 4 }
 0x25f   :  { %v1484_v11 = vrot.slane %v9335_v39, 5  ;;  %v1492_v12 = vrot.slane %v9335_v39, 6  ;;  %v1500_v13 = vrot.slane %v9335_v39, 7  ;;  %v9344_v49 = vmax.f32 %v1425_v34, 0.0  ;;  %v1430_v57 = vpop.f32.mrf.mxu0 }
 0x260   :  { %v1427_v14 = vadd.f32 %v1426_v5, %v1374_v6  ;;  %v1377_v15 = vpop.f32.mrf.mxu1 }
 0x261   :  { %v1378_v19 = vadd.f32 %v1377_v15, %v1086_v42  ;;  %v1432_v24 = vpop.f32.mrf.mxu0 }
 0x262   :  { %v9347_v20 = vmax.f32 %v1427_v14, 0.0  ;;  %v1379_v22 = vpop.f32.mrf.mxu1 }
 0x263   :  { %v1431_v23 = vadd.f32 %v1430_v57, %v1378_v19  ;;  %v1380_v25 = vadd.f32 %v1379_v22, %v1090_v17  ;;  %v1434_v35 = vpop.f32.mrf.mxu0 }
 0x264   :  { %v1512_v26 = vrot.slane %v9347_v20, 1  ;;  %v1381_v27 = vpop.f32.mrf.mxu1 }
 0x265   :  { %v9350_v21 = vmax.f32 %v1431_v23, 0.0  ;;  %v1433_v29 = vadd.f32 %v1432_v24, %v1380_v25  ;;  %v1382_v30 = vadd.f32 %v1381_v27, %v1086_v42  ;;  %v1436_v47 = vpop.f32.mrf.mxu0 }
 0x266   :  { %v1383_v31 = vpop.f32.mrf.mxu1 }
 0x267   :  { %v1453_v32 = vrot.slane %v9350_v21, 1  ;;  %v1461_v53 = vrot.slane %v9350_v21, 2  ;;  %v1469_v54 = vrot.slane %v9350_v21, 3  ;;  %v1477_v33 = vrot.slane %v9350_v21, 4 }
 0x268   :  { %v1485_v36 = vrot.slane %v9350_v21, 5  ;;  %v1493_v37 = vrot.slane %v9350_v21, 6  ;;  %v1501_v40 = vrot.slane %v9350_v21, 7  ;;  %v9359_v60 = vmax.f32 %v1433_v29, 0.0 }
 0x269   :  { %v1435_v41 = vadd.f32 %v1434_v35, %v1382_v30  ;;  %v1384_v28 = vadd.f32 %v1383_v31, %v1090_v17 }
 0x26a   :  { %v1454_v42 = vrot.slane %v9359_v60, 1  ;;  %v1462_v16 = vrot.slane %v9359_v60, 2  ;;  %v1470_v44 = vrot.slane %v9359_v60, 3  ;;  %v1478_v45 = vrot.slane %v9359_v60, 4 }
 0x26b   :  { %v1486_v38 = vrot.slane %v9359_v60, 5  ;;  %v1494_v51 = vrot.slane %v9359_v60, 6  ;;  %v1502_v52 = vrot.slane %v9359_v60, 7  ;;  %v9368_v56 = vmax.f32 %v1435_v41, 0.0 }
 0x26c   :  { %v1437_v58 = vadd.f32 %v1436_v47, %v1384_v28 }
 0x26d   :  { %v1513_v17 = vrot.slane %v9368_v56, 1 }
 0x26e   :  { %v9371_v59 = vmax.f32 %v1437_v58, 0.0 }
 0x270   :  { %v1514_v61 = vrot.slane %v9371_v59, 1 }
 0x271   :  { %9035 = dma.done.wait [#allocation3], 81920 }
 0x272   :  { %9036 = vsyncadd [#allocation3], 4294885376  ;;  %v2164_v55 = vpack.c.bf16 %v9335_v39, %v9335_v39  ;;  %v2184_v34 = vpack.c.bf16 %v9359_v60, %v9359_v60  ;;  %v2166_v5 = vpack.c.bf16 %v1452_v7, %v1452_v7  ;;  %v2186_v6 = vpack.c.bf16 %v1454_v42, %v1454_v42  ;;  %v7854_v25 = vld [vmem:[#allocation2 + $0xe4] ss:$16 sps:$4 sm:$0xff]   ;;  %v7858_v7 = vld [vmem:[#allocation2 + $0xe0] ss:$16 sps:$4 sm:$0xff]  }
 0x273   :  { %vm2306_vm6 = vcmask 1041409   ;;  %v7856_v30 = vld [vmem:[#allocation2 + $0x2e4] ss:$16 sps:$4 sm:$0xff]   ;;  %5586 = vmatprep.subr.bf16.mxu0 %v7854_v25  ;;  %v7859_v35 = vld [vmem:[#allocation2 + $0x2e0] ss:$16 sps:$4 sm:$0xff]   ;;  %s9053_s6 = smov [#allocation16]  }
 0x274   :  { %v2266_v57 = vunpack.c.l.b16 %v2164_v55  ;;  %v2286_v14 = vunpack.c.l.b16 %v2184_v34  ;;  %v2268_v15 = vunpack.c.l.b16 %v2166_v5  ;;  %v2288_v19 = vunpack.c.l.b16 %v2186_v6  ;;  %5627 = vmatprep.subr.bf16.mxu1 %v7856_v30  ;;  %v7860_v41 = vld [vmem:[#allocation2 + $0xc4] ss:$16 sps:$4 sm:$0xff]   ;;  %5587 = vmatpush1.bf16.msra.mxu0 %v7858_v7  ;;  %v7864_v42 = vld [vmem:[#allocation2 + $0xc0] ss:$16 sps:$4 sm:$0xff]   ;;  %s6765_s2 = sshll.u32 %s9053_s6, 4  ;;  %s6766_s2 = int_to_ptr.vmem [resolvable:$true] %s6765_s2 }
 0x275   :  { %5628 = vmatpush1.bf16.msra.mxu1 %v7859_v35  ;;  %v7862_v28 = vld [vmem:[#allocation2 + $0x2c4] ss:$16 sps:$4 sm:$0xff]   ;;  %5588 = vmatprep.subr.bf16.mxu0 %v7860_v41  ;;  %v7865_v47 = vld [vmem:[#allocation2 + $0x2c0] ss:$16 sps:$4 sm:$0xff]   ;;  %s9007_s22 = scalar_lea.vmem %s6766_s2, 32  ;;  %p9012_p13 = scmp.lt.s32.totalorder %s6766_s2, %s6766_s2 }
 0x276   :  { %v2308_v22 = vrot.slane %v2286_v14, 7  ;;  %v2312_v23 = vrot.slane %v2288_v19, 7  ;;  %5629 = vmatprep.subr.bf16.mxu1 %v7862_v28  ;;  %v7866_v58 = vld [vmem:[#allocation2 + $0xa4] ss:$16 sps:$4 sm:$0xff]   ;;  %v7870_v34 = vld [vmem:[#allocation2 + $0xa0] ss:$16 sps:$4 sm:$0xff]   ;;  %p9008_p12 = scmp.ne.s32.totalorder %s6766_s2, %s9007_s22  ;;  %p9013_p0 = scmp.lt.s32.totalorder %s9007_s22, %s9007_s22 }
 0x277   :  { %v7868_v55 = vld [vmem:[#allocation2 + $0x2a4] ss:$16 sps:$4 sm:$0xff]   ;;  %v7871_v5 = vld [vmem:[#allocation2 + $0x2a0] ss:$16 sps:$4 sm:$0xff]  }
 0x278   :  { %v2309_v24 = vsel %vm2306_vm6, %v2308_v22, %v2266_v57  ;;  %v2313_v29 = vsel %vm2306_vm6, %v2312_v23, %v2268_v15  ;;  %5589 = vmatpush1.bf16.msra.mxu0 %v7864_v42  ;;  %v7872_v6 = vld [vmem:[#allocation2 + $0x84] ss:$16 sps:$4 sm:$0xff]   ;;  %v7876_v14 = vld [vmem:[#allocation2 + $0x80] ss:$16 sps:$4 sm:$0xff]   ;;  %p9014_p1 = por %p9013_p0, %p9012_p13 }
 0x279   :  { %v9379_v27 = vpack.c.b16 %v2309_v24, %v2309_v24  ;;  %v9382_v31 = vpack.c.b16 %v2313_v29, %v2313_v29  ;;  %5630 = vmatpush1.bf16.msra.mxu1 %v7865_v47  ;;  %5590 = vmatprep.subr.bf16.mxu0 %v7866_v58  ;;  %v7874_v57 = vld [vmem:[#allocation2 + $0x284] ss:$16 sps:$4 sm:$0xff]   ;;  %v7877_v15 = vld [vmem:[#allocation2 + $0x280] ss:$16 sps:$4 sm:$0xff]  }
 0x27a   :  { %5631 = vmatprep.subr.bf16.mxu1 %v7868_v55  ;;  %v7878_v19 = vld [vmem:[#allocation2 + $0x64] ss:$16 sps:$4 sm:$0xff]   ;;  %v7882_v23 = vld [vmem:[#allocation2 + $0x60] ss:$16 sps:$4 sm:$0xff]   ;;  %p9015_p2 = pnand %p9014_p1, %p9008_p12 }
 0x27b   :  { %5618 = vmatprep.mubr.bf16.mxu0 %v9379_v27  ;;  %5659 = vmatprep.mubr.bf16.mxu1 %v9382_v31  ;;  %v7880_v22 = vld [vmem:[#allocation2 + $0x264] ss:$16 sps:$4 sm:$0xff]   ;;  %v7883_v24 = vld [vmem:[#allocation2 + $0x260] ss:$16 sps:$4 sm:$0xff]  }
 0x27c   :  { %5591 = vmatpush1.bf16.msra.mxu0 %v7870_v34  ;;  %v7884_v25 = vld [vmem:[#allocation2 + $0x44] ss:$16 sps:$4 sm:$0xff]   ;;  %v7888_v30 = vld [vmem:[#allocation2 + $0x40] ss:$16 sps:$4 sm:$0xff]  }
 0x27d   :  { %5632 = vmatpush1.bf16.msra.mxu1 %v7871_v5  ;;  %5592 = vmatprep.subr.bf16.mxu0 %v7872_v6  ;;  %v7886_v29 = vld [vmem:[#allocation2 + $0x244] ss:$16 sps:$4 sm:$0xff]   ;;  %v7889_v7 = vld [vmem:[#allocation2 + $0x240] ss:$16 sps:$4 sm:$0xff]  }
 0x27e   :  { %5633 = vmatprep.subr.bf16.mxu1 %v7874_v57  ;;  %v7890_v35 = vld [vmem:[#allocation2 + $0x24] ss:$16 sps:$4 sm:$0xff]   ;;  %v7894_v28 = vld [vmem:[#allocation2 + $0x20] ss:$16 sps:$4 sm:$0xff]  }
 0x27f   :  { %v7892_v41 = vld [vmem:[#allocation2 + $0x224] ss:$16 sps:$4 sm:$0xff]   ;;  %v7895_v42 = vld [vmem:[#allocation2 + $0x220] ss:$16 sps:$4 sm:$0xff]  }
 0x280   :  { %5593 = vmatpush1.bf16.msra.mxu0 %v7876_v14  ;;  %v7896_v47 = vld [vmem:[#allocation2 + $0x4] ss:$16 sps:$4 sm:$0xff]   ;;  %v7900_v55 = vld [vmem:[#allocation2] ss:$16 sps:$4 sm:$0xff]  }
 0x281   :  { %5634 = vmatpush1.bf16.msra.mxu1 %v7877_v15  ;;  %5594 = vmatprep.subr.bf16.mxu0 %v7878_v19  ;;  %v7898_v58 = vld [vmem:[#allocation2 + $0x204] ss:$16 sps:$4 sm:$0xff]   ;;  %v7901_v34 = vld [vmem:[#allocation2 + $0x200] ss:$16 sps:$4 sm:$0xff]  }
 0x282   :  { %5635 = vmatprep.subr.bf16.mxu1 %v7880_v22  ;;  %v7902_v5 = vld [vmem:[#allocation2 + $0x1e4] ss:$16 sps:$4 sm:$0xff]   ;;  %v7906_v57 = vld [vmem:[#allocation2 + $0x1e0] ss:$16 sps:$4 sm:$0xff]  }
 0x283   :  { %v7904_v6 = vld [vmem:[#allocation2 + $0x3e4] ss:$16 sps:$4 sm:$0xff]   ;;  %v7907_v14 = vld [vmem:[#allocation2 + $0x3e0] ss:$16 sps:$4 sm:$0xff]  }
 0x284   :  { %5595 = vmatpush1.bf16.msra.mxu0 %v7882_v23  ;;  %v7908_v15 = vld [vmem:[#allocation2 + $0x1c4] ss:$16 sps:$4 sm:$0xff]   ;;  %v7912_v22 = vld [vmem:[#allocation2 + $0x1c0] ss:$16 sps:$4 sm:$0xff]  }
 0x285   :  { %5636 = vmatpush1.bf16.msra.mxu1 %v7883_v24  ;;  %5596 = vmatprep.subr.bf16.mxu0 %v7884_v25  ;;  %v7910_v19 = vld [vmem:[#allocation2 + $0x3c4] ss:$16 sps:$4 sm:$0xff]   ;;  %v7913_v23 = vld [vmem:[#allocation2 + $0x3c0] ss:$16 sps:$4 sm:$0xff]  }
 0x286   :  { %5637 = vmatprep.subr.bf16.mxu1 %v7886_v29  ;;  %v7914_v24 = vld [vmem:[#allocation2 + $0x1a4] ss:$16 sps:$4 sm:$0xff]   ;;  %v7918_v29 = vld [vmem:[#allocation2 + $0x1a0] ss:$16 sps:$4 sm:$0xff]  }
 0x287   :  { %v7916_v25 = vld [vmem:[#allocation2 + $0x3a4] ss:$16 sps:$4 sm:$0xff]   ;;  %v8130_v60 = vld [vmem:[#allocation2 + $0x920] ss:$16 sps:$4 sm:$0xff]  }
 0x288   :  { %5597 = vmatpush1.bf16.msra.mxu0 %v7888_v30  ;;  %v7919_v30 = vld [vmem:[#allocation2 + $0x3a0] ss:$16 sps:$4 sm:$0xff]  }
 0x289   :  { %5638 = vmatpush1.bf16.msra.mxu1 %v7889_v7  ;;  %5598 = vmatprep.subr.bf16.mxu0 %v7890_v35  ;;  %v7920_v7 = vld [vmem:[#allocation2 + $0x184] ss:$16 sps:$4 sm:$0xff]   ;;  %v8139_v39 = vld [vmem:[#allocation2 + $0xb00] ss:$16 sps:$4 sm:$0xff]  }
 0x28a   :  { %5639 = vmatprep.subr.bf16.mxu1 %v7892_v41  ;;  %v7922_v35 = vld [vmem:[#allocation2 + $0x384] ss:$16 sps:$4 sm:$0xff]   ;;  %v7924_v41 = vld [vmem:[#allocation2 + $0x180] ss:$16 sps:$4 sm:$0xff]  }
 0x28c   :  { %5599 = vmatpush1.bf16.msra.mxu0 %v7894_v28  ;;  %v7925_v28 = vld [vmem:[#allocation2 + $0x380] ss:$16 sps:$4 sm:$0xff]  }
 0x28d   :  { %5640 = vmatpush1.bf16.msra.mxu1 %v7895_v42  ;;  %5600 = vmatprep.subr.bf16.mxu0 %v7896_v47  ;;  %v7926_v42 = vld [vmem:[#allocation2 + $0x164] ss:$16 sps:$4 sm:$0xff]  }
 0x28e   :  { %5641 = vmatprep.subr.bf16.mxu1 %v7898_v58  ;;  %v7928_v47 = vld [vmem:[#allocation2 + $0x364] ss:$16 sps:$4 sm:$0xff]   ;;  %v7930_v58 = vld [vmem:[#allocation2 + $0x160] ss:$16 sps:$4 sm:$0xff]  }
 0x290   :  { %5601 = vmatpush1.bf16.msra.mxu0 %v7900_v55  ;;  %v7931_v55 = vld [vmem:[#allocation2 + $0x360] ss:$16 sps:$4 sm:$0xff]  }
 0x291   :  { %5642 = vmatpush1.bf16.msra.mxu1 %v7901_v34  ;;  %5602 = vmatprep.subr.bf16.mxu0 %v7902_v5  ;;  %v7932_v34 = vld [vmem:[#allocation2 + $0x144] ss:$16 sps:$4 sm:$0xff]   ;;  %v2183_v5 = vpack.c.bf16 %v9350_v21, %v9350_v21  ;;  %v2175_v21 = vpack.c.bf16 %v1491_v2, %v1491_v2 }
 0x292   :  { %5643 = vmatprep.subr.bf16.mxu1 %v7904_v6  ;;  %v2185_v6 = vpack.c.bf16 %v1453_v32, %v1453_v32 }
 0x293   :  { %v2285_v32 = vunpack.c.l.b16 %v2183_v5 }
 0x294   :  { %5603 = vmatpush2.bf16.msra.mxu0 %v7906_v57  ;;  %v7934_v57 = vld [vmem:[#allocation2 + $0x344] ss:$16 sps:$4 sm:$0xff]  }
 0x295   :  { %5644 = vmatpush2.bf16.msra.mxu1 %v7907_v14  ;;  %5604 = vmatprep.subr.bf16.mxu0 %v7908_v15  ;;  %v2188_v14 = vpack.c.bf16 %v1462_v16, %v1462_v16  ;;  %v7936_v15 = vld [vmem:[#allocation2 + $0x140] ss:$16 sps:$4 sm:$0xff]   ;;  %v7940_v16 = vld [vmem:[#allocation2 + $0x324] ss:$16 sps:$4 sm:$0xff]  }
 0x296   :  { %5645 = vmatprep.subr.bf16.mxu1 %v7910_v19  ;;  %v7937_v19 = vld [vmem:[#allocation2 + $0x340] ss:$16 sps:$4 sm:$0xff]  }
 0x298   :  { %5605 = vmatpush2.bf16.msra.mxu0 %v7912_v22  ;;  %v2190_v22 = vpack.c.bf16 %v1470_v44, %v1470_v44  ;;  %v2168_v44 = vpack.c.bf16 %v1460_v8, %v1460_v8 }
 0x299   :  { %5646 = vmatpush2.bf16.msra.mxu1 %v7913_v23  ;;  %5606 = vmatprep.subr.bf16.mxu0 %v7914_v24  ;;  %v7938_v23 = vld [vmem:[#allocation2 + $0x124] ss:$16 sps:$4 sm:$0xff]   ;;  %v2163_v24 = vpack.c.bf16 %v9326_v46, %v9326_v46  ;;  %v8229_v46 = vld [vmem:[#allocation2 + $0xf20] ss:$16 sps:$4 sm:$0xff]  }
 0x29a   :  { %5647 = vmatprep.subr.bf16.mxu1 %v7916_v25  ;;  %v2165_v25 = vpack.c.bf16 %v1451_v50, %v1451_v50 }
 0x29b   :  { %v2265_v50 = vunpack.c.l.b16 %v2163_v24 }
 0x29c   :  { %5607 = vmatpush2.bf16.msra.mxu0 %v7918_v29  ;;  %v2287_v29 = vunpack.c.l.b16 %v2185_v6  ;;  %v7948_v6 = vld [vmem:[#allocation2 + $0x100] ss:$16 sps:$4 sm:$0xff]  }
 0x29d   :  { %5648 = vmatpush2.bf16.msra.mxu1 %v7919_v30  ;;  %5608 = vmatprep.subr.bf16.mxu0 %v7920_v7  ;;  %v2290_v30 = vunpack.c.l.b16 %v2188_v14  ;;  %v7942_v7 = vld [vmem:[#allocation2 + $0x120] ss:$16 sps:$4 sm:$0xff]   ;;  %v2270_v14 = vunpack.c.l.b16 %v2168_v44 }
 0x29e   :  { %5649 = vmatprep.subr.bf16.mxu1 %v7922_v35  ;;  %v7943_v35 = vld [vmem:[#allocation2 + $0x320] ss:$16 sps:$4 sm:$0xff]  }
 0x29f   :  { %v2316_v5 = vrot.slane %v2290_v30, 7  ;;  %v7958_v30 = vld [vmem:[#allocation2 + $0x4c4] ss:$16 sps:$4 sm:$0xff]  }
 0x2a0   :  { %5609 = vmatpush2.bf16.msra.mxu0 %v7924_v41  ;;  %v2170_v41 = vpack.c.bf16 %v1468_v9, %v1468_v9 }
 0x2a1   :  { %5650 = vmatpush2.bf16.msra.mxu1 %v7925_v28  ;;  %5610 = vmatprep.subr.bf16.mxu0 %v7926_v42  ;;  %v2292_v28 = vunpack.c.l.b16 %v2190_v22  ;;  %v7944_v42 = vld [vmem:[#allocation2 + $0x104] ss:$16 sps:$4 sm:$0xff]  }
 0x2a2   :  { %5651 = vmatprep.subr.bf16.mxu1 %v7928_v47  ;;  %v2305_v47 = vrot.slane %v2285_v32, 7  ;;  %v2272_v8 = vunpack.c.l.b16 %v2170_v41  ;;  %v7955_v22 = vld [vmem:[#allocation2 + $0x6e4] ss:$16 sps:$4 sm:$0xff]   ;;  %v7950_v32 = vld [vmem:[#allocation2 + $0x4e0] ss:$16 sps:$4 sm:$0xff]  }
 0x2a3   :  { %v2320_v18 = vrot.slane %v2292_v28, 7  ;;  %v7956_v41 = vld [vmem:[#allocation2 + $0x4c0] ss:$16 sps:$4 sm:$0xff]  }
 0x2a4   :  { %5611 = vmatpush2.bf16.msra.mxu0 %v7930_v58  ;;  %v2267_v58 = vunpack.c.l.b16 %v2165_v25  ;;  %v2307_v9 = vsel %vm2306_vm6, %v2305_v47, %v2265_v50  ;;  %v7953_v25 = vld [vmem:[#allocation2 + $0x6e0] ss:$16 sps:$4 sm:$0xff]  }
 0x2a5   :  { %5652 = vmatpush2.bf16.msra.mxu1 %v7931_v55  ;;  %5612 = vmatprep.subr.bf16.mxu0 %v7932_v34  ;;  %v2310_v55 = vrot.slane %v2287_v29, 7  ;;  %v7946_v34 = vld [vmem:[#allocation2 + $0x304] ss:$16 sps:$4 sm:$0xff]   ;;  %v9410_v24 = vpack.c.b16 %v2307_v9, %v2307_v9  ;;  %v2317_v29 = vsel %vm2306_vm6, %v2316_v5, %v2270_v14  ;;  %v7959_v28 = vld [vmem:[#allocation2 + $0x6c0] ss:$16 sps:$4 sm:$0xff]  }
 0x2a6   :  { %5653 = vmatprep.subr.bf16.mxu1 %v7934_v57  ;;  %v7949_v57 = vld [vmem:[#allocation2 + $0x300] ss:$16 sps:$4 sm:$0xff]   ;;  %v7982_v9 = vld [vmem:[#allocation2 + $0x444] ss:$16 sps:$4 sm:$0xff]  }
 0x2a7   :  { %v7962_v50 = vld [vmem:[#allocation2 + $0x4a0] ss:$16 sps:$4 sm:$0xff]  }
 0x2a8   :  { %5613 = vmatpush2.bf16.msra.mxu0 %v7936_v15  ;;  %v2311_v15 = vsel %vm2306_vm6, %v2310_v55, %v2267_v58  ;;  %v7965_v47 = vld [vmem:[#allocation2 + $0x6a0] ss:$16 sps:$4 sm:$0xff]   ;;  %v7970_v58 = vld [vmem:[#allocation2 + $0x484] ss:$16 sps:$4 sm:$0xff]  }
 0x2a9   :  { %5654 = vmatpush2.bf16.msra.mxu1 %v7937_v19  ;;  %5614 = vmatprep.subr.bf16.mxu0 %v7938_v23  ;;  %v7952_v19 = vld [vmem:[#allocation2 + $0x4e4] ss:$16 sps:$4 sm:$0xff]   ;;  %v9412_v23 = vpack.c.b16 %v2311_v15, %v2311_v15  ;;  %v7971_v5 = vld [vmem:[#allocation2 + $0x680] ss:$16 sps:$4 sm:$0xff]  }
 0x2aa   :  { %5655 = vmatprep.subr.bf16.mxu1 %v7940_v16  ;;  %v2321_v16 = vsel %vm2306_vm6, %v2320_v18, %v2272_v8  ;;  %v7967_v18 = vld [vmem:[#allocation2 + $0x6a4] ss:$16 sps:$4 sm:$0xff]   ;;  %v7974_v14 = vld [vmem:[#allocation2 + $0x460] ss:$16 sps:$4 sm:$0xff]  }
 0x2ab   :  { %v9418_v44 = vpack.c.b16 %v2321_v16, %v2321_v16  ;;  %v7973_v55 = vld [vmem:[#allocation2 + $0x684] ss:$16 sps:$4 sm:$0xff]   ;;  %v7977_v8 = vld [vmem:[#allocation2 + $0x660] ss:$16 sps:$4 sm:$0xff]  }
 0x2ac   :  { %5615 = vmatpush2.bf16.msra.mxu0 %v7942_v7  ;;  %v7961_v7 = vld [vmem:[#allocation2 + $0x6c4] ss:$16 sps:$4 sm:$0xff]   ;;  %v7989_v16 = vld [vmem:[#allocation2 + $0x620] ss:$16 sps:$4 sm:$0xff]  }
 0x2ad   :  { %5656 = vmatpush2.bf16.msra.mxu1 %v7943_v35  ;;  %5616 = vmatprep.subr.bf16.mxu0 %v7944_v42  ;;  %v9416_v35 = vpack.c.b16 %v2317_v29, %v2317_v29  ;;  %v7964_v42 = vld [vmem:[#allocation2 + $0x4a4] ss:$16 sps:$4 sm:$0xff]   ;;  %v7986_v29 = vld [vmem:[#allocation2 + $0x420] ss:$16 sps:$4 sm:$0xff]  }
 0x2ae   :  { %5657 = vmatprep.subr.bf16.mxu1 %v7946_v34  ;;  %v7968_v34 = vld [vmem:[#allocation2 + $0x480] ss:$16 sps:$4 sm:$0xff]   ;;  %v7985_v15 = vld [vmem:[#allocation2 + $0x644] ss:$16 sps:$4 sm:$0xff]  }
 0x2b0   :  { %5617 = vmatpush2.bf16.msra.mxu0 %v7948_v6  ;;  %v7976_v6 = vld [vmem:[#allocation2 + $0x464] ss:$16 sps:$4 sm:$0xff]  }
 0x2b1   :  { %5658 = vmatpush2.bf16.msra.mxu1 %v7949_v57  ;;  %5668 = vmatprep.subr.bf16.mxu0 %v7952_v19  ;;  %v7979_v57 = vld [vmem:[#allocation2 + $0x664] ss:$16 sps:$4 sm:$0xff]   ;;  %v7980_v19 = vld [vmem:[#allocation2 + $0x440] ss:$16 sps:$4 sm:$0xff]  }
 0x2b2   :  { %5709 = vmatprep.subr.bf16.mxu1 %v7955_v22  ;;  %v7983_v22 = vld [vmem:[#allocation2 + $0x640] ss:$16 sps:$4 sm:$0xff]  }
 0x2b3   :  { %5619 = vmatmul.mubr.bf16.vlgmr.msra.gmra.mxu0 %v9410_v24 }
 0x2b4   :  { %5660 = vmatmul.mubr.bf16.vlgmr.msra.gmra.mxu1 %v9412_v23  ;;  %5669 = vmatpush1.bf16.msra.mxu0 %v7950_v32  ;;  %v7988_v32 = vld [vmem:[#allocation2 + $0x424] ss:$16 sps:$4 sm:$0xff]  }
 0x2b5   :  { %5710 = vmatpush1.bf16.msra.mxu1 %v7953_v25  ;;  %5670 = vmatprep.subr.bf16.mxu0 %v7958_v30  ;;  %v7991_v25 = vld [vmem:[#allocation2 + $0x624] ss:$16 sps:$4 sm:$0xff]  }
 0x2b6   :  { %5711 = vmatprep.subr.bf16.mxu1 %v7961_v7  ;;  %5700 = vmatprep.mubr.bf16.mxu0 %v9416_v35  ;;  %v7994_v30 = vld [vmem:[#allocation2 + $0x404] ss:$16 sps:$4 sm:$0xff]  }
 0x2b7   :  { %5741 = vmatprep.mubr.bf16.mxu1 %v9418_v44  ;;  %v7997_v7 = vld [vmem:[#allocation2 + $0x604] ss:$16 sps:$4 sm:$0xff]  }
 0x2b8   :  { %5671 = vmatpush1.bf16.msra.mxu0 %v7956_v41  ;;  %v7992_v41 = vld [vmem:[#allocation2 + $0x400] ss:$16 sps:$4 sm:$0xff]  }
 0x2b9   :  { %5712 = vmatpush1.bf16.msra.mxu1 %v7959_v28  ;;  %5672 = vmatprep.subr.bf16.mxu0 %v7964_v42  ;;  %v7995_v28 = vld [vmem:[#allocation2 + $0x600] ss:$16 sps:$4 sm:$0xff]   ;;  %v8000_v42 = vld [vmem:[#allocation2 + $0x5e4] ss:$16 sps:$4 sm:$0xff]  }
 0x2ba   :  { %5713 = vmatprep.subr.bf16.mxu1 %v7967_v18  ;;  %v8003_v18 = vld [vmem:[#allocation2 + $0x7e4] ss:$16 sps:$4 sm:$0xff]  }
 0x2bc   :  { %5673 = vmatpush1.bf16.msra.mxu0 %v7962_v50  ;;  %v7998_v50 = vld [vmem:[#allocation2 + $0x5e0] ss:$16 sps:$4 sm:$0xff]  }
 0x2bd   :  { %5714 = vmatpush1.bf16.msra.mxu1 %v7965_v47  ;;  %5674 = vmatprep.subr.bf16.mxu0 %v7970_v58  ;;  %v8001_v47 = vld [vmem:[#allocation2 + $0x7e0] ss:$16 sps:$4 sm:$0xff]   ;;  %v8006_v58 = vld [vmem:[#allocation2 + $0x5c4] ss:$16 sps:$4 sm:$0xff]  }
 0x2be   :  { %5715 = vmatprep.subr.bf16.mxu1 %v7973_v55  ;;  %v8009_v55 = vld [vmem:[#allocation2 + $0x7c4] ss:$16 sps:$4 sm:$0xff]  }
 0x2c0   :  { %5675 = vmatpush1.bf16.msra.mxu0 %v7968_v34  ;;  %v8004_v34 = vld [vmem:[#allocation2 + $0x5c0] ss:$16 sps:$4 sm:$0xff]  }
 0x2c1   :  { %5716 = vmatpush1.bf16.msra.mxu1 %v7971_v5  ;;  %5676 = vmatprep.subr.bf16.mxu0 %v7976_v6  ;;  %v8007_v5 = vld [vmem:[#allocation2 + $0x7c0] ss:$16 sps:$4 sm:$0xff]   ;;  %v8012_v6 = vld [vmem:[#allocation2 + $0x5a4] ss:$16 sps:$4 sm:$0xff]  }
 0x2c2   :  { %5717 = vmatprep.subr.bf16.mxu1 %v7979_v57  ;;  %v8015_v57 = vld [vmem:[#allocation2 + $0x7a4] ss:$16 sps:$4 sm:$0xff]  }
 0x2c4   :  { %5677 = vmatpush1.bf16.msra.mxu0 %v7974_v14  ;;  %v8010_v14 = vld [vmem:[#allocation2 + $0x5a0] ss:$16 sps:$4 sm:$0xff]  }
 0x2c5   :  { %5718 = vmatpush1.bf16.msra.mxu1 %v7977_v8  ;;  %5678 = vmatprep.subr.bf16.mxu0 %v7982_v9  ;;  %v8013_v8 = vld [vmem:[#allocation2 + $0x7a0] ss:$16 sps:$4 sm:$0xff]   ;;  %v8018_v9 = vld [vmem:[#allocation2 + $0x584] ss:$16 sps:$4 sm:$0xff]  }
 0x2c6   :  { %5719 = vmatprep.subr.bf16.mxu1 %v7985_v15  ;;  %v8021_v15 = vld [vmem:[#allocation2 + $0x784] ss:$16 sps:$4 sm:$0xff]  }
 0x2c8   :  { %5679 = vmatpush1.bf16.msra.mxu0 %v7980_v19  ;;  %v8016_v19 = vld [vmem:[#allocation2 + $0x580] ss:$16 sps:$4 sm:$0xff]  }
 0x2c9   :  { %5720 = vmatpush1.bf16.msra.mxu1 %v7983_v22  ;;  %5680 = vmatprep.subr.bf16.mxu0 %v7988_v32  ;;  %v8019_v22 = vld [vmem:[#allocation2 + $0x780] ss:$16 sps:$4 sm:$0xff]   ;;  %v8024_v32 = vld [vmem:[#allocation2 + $0x564] ss:$16 sps:$4 sm:$0xff]  }
 0x2ca   :  { %5721 = vmatprep.subr.bf16.mxu1 %v7991_v25  ;;  %v8027_v25 = vld [vmem:[#allocation2 + $0x764] ss:$16 sps:$4 sm:$0xff]  }
 0x2cc   :  { %5681 = vmatpush1.bf16.msra.mxu0 %v7986_v29  ;;  %v8022_v29 = vld [vmem:[#allocation2 + $0x560] ss:$16 sps:$4 sm:$0xff]  }
 0x2cd   :  { %5722 = vmatpush1.bf16.msra.mxu1 %v7989_v16  ;;  %5682 = vmatprep.subr.bf16.mxu0 %v7994_v30  ;;  %v8025_v16 = vld [vmem:[#allocation2 + $0x760] ss:$16 sps:$4 sm:$0xff]   ;;  %v8030_v30 = vld [vmem:[#allocation2 + $0x544] ss:$16 sps:$4 sm:$0xff]  }
 0x2ce   :  { %5723 = vmatprep.subr.bf16.mxu1 %v7997_v7  ;;  %v2187_v7 = vpack.c.bf16 %v1461_v53, %v1461_v53  ;;  %v8036_v53 = vld [vmem:[#allocation2 + $0x524] ss:$16 sps:$4 sm:$0xff]  }
 0x2d0   :  { %5683 = vmatpush1.bf16.msra.mxu0 %v7992_v41  ;;  %v2189_v41 = vpack.c.bf16 %v1469_v54, %v1469_v54  ;;  %v2167_v54 = vpack.c.bf16 %v1459_v62, %v1459_v62  ;;  %v2174_v62 = vpack.c.bf16 %v1484_v11, %v1484_v11 }
 0x2d1   :  { %5724 = vmatpush1.bf16.msra.mxu1 %v7995_v28  ;;  %5684 = vmatprep.subr.bf16.mxu0 %v8000_v42  ;;  %v8033_v28 = vld [vmem:[#allocation2 + $0x744] ss:$16 sps:$4 sm:$0xff]   ;;  %v2192_v42 = vpack.c.bf16 %v1478_v45, %v1478_v45 }
 0x2d2   :  { %5725 = vmatprep.subr.bf16.mxu1 %v8003_v18  ;;  %v8028_v18 = vld [vmem:[#allocation2 + $0x540] ss:$16 sps:$4 sm:$0xff]   ;;  %v8039_v45 = vld [vmem:[#allocation2 + $0x724] ss:$16 sps:$4 sm:$0xff]  }
 0x2d4   :  { %5685 = vmatpush2.bf16.msra.mxu0 %v7998_v50  ;;  %v8031_v50 = vld [vmem:[#allocation2 + $0x740] ss:$16 sps:$4 sm:$0xff]  }
 0x2d5   :  { %5726 = vmatpush2.bf16.msra.mxu1 %v8001_v47  ;;  %5686 = vmatprep.subr.bf16.mxu0 %v8006_v58  ;;  %v2194_v47 = vpack.c.bf16 %v1486_v38, %v1486_v38  ;;  %v2289_v58 = vunpack.c.l.b16 %v2187_v7  ;;  %v2172_v38 = vpack.c.bf16 %v1476_v10, %v1476_v10  ;;  %v2276_v10 = vunpack.c.l.b16 %v2174_v62  ;;  %v8058_v62 = vld [vmem:[#allocation2 + $0x8a0] ss:$16 sps:$4 sm:$0xff]  }
 0x2d6   :  { %5727 = vmatprep.subr.bf16.mxu1 %v8009_v55  ;;  %v2169_v55 = vpack.c.bf16 %v1467_v63, %v1467_v63  ;;  %v2269_v63 = vunpack.c.l.b16 %v2167_v54 }
 0x2d8   :  { %5687 = vmatpush2.bf16.msra.mxu0 %v8004_v34  ;;  %v2291_v34 = vunpack.c.l.b16 %v2189_v41  ;;  %v8048_v41 = vld [vmem:[#allocation2 + $0x8e4] ss:$16 sps:$4 sm:$0xff]  }
 0x2d9   :  { %5728 = vmatpush2.bf16.msra.mxu1 %v8007_v5  ;;  %5688 = vmatprep.subr.bf16.mxu0 %v8012_v6  ;;  %v2294_v5 = vunpack.c.l.b16 %v2192_v42  ;;  %v8034_v6 = vld [vmem:[#allocation2 + $0x520] ss:$16 sps:$4 sm:$0xff]  }
 0x2da   :  { %5729 = vmatprep.subr.bf16.mxu1 %v8015_v57  ;;  %v8037_v57 = vld [vmem:[#allocation2 + $0x720] ss:$16 sps:$4 sm:$0xff]  }
 0x2dc   :  { %5689 = vmatpush2.bf16.msra.mxu0 %v8010_v14  ;;  %v2296_v14 = vunpack.c.l.b16 %v2194_v47  ;;  %v8049_v47 = vld [vmem:[#allocation2 + $0xae0] ss:$16 sps:$4 sm:$0xff]  }
 0x2dd   :  { %5730 = vmatpush2.bf16.msra.mxu1 %v8013_v8  ;;  %5690 = vmatprep.subr.bf16.mxu0 %v8018_v9  ;;  %v8042_v8 = vld [vmem:[#allocation2 + $0x504] ss:$16 sps:$4 sm:$0xff]   ;;  %v2314_v9 = vrot.slane %v2289_v58, 7 }
 0x2de   :  { %5731 = vmatprep.subr.bf16.mxu1 %v8021_v15  ;;  %v2271_v15 = vunpack.c.l.b16 %v2169_v55  ;;  %v8054_v58 = vld [vmem:[#allocation2 + $0x8c4] ss:$16 sps:$4 sm:$0xff]  }
 0x2df   :  { %v2315_v11 = vsel %vm2306_vm6, %v2314_v9, %v2269_v63  ;;  %v8057_v55 = vld [vmem:[#allocation2 + $0xac4] ss:$16 sps:$4 sm:$0xff]   ;;  %v8064_v9 = vld [vmem:[#allocation2 + $0x880] ss:$16 sps:$4 sm:$0xff]  }
 0x2e0   :  { %5691 = vmatpush2.bf16.msra.mxu0 %v8016_v19  ;;  %v2318_v19 = vrot.slane %v2291_v34, 7  ;;  %v9450_v42 = vpack.c.b16 %v2315_v11, %v2315_v11  ;;  %v8069_v63 = vld [vmem:[#allocation2 + $0xa84] ss:$16 sps:$4 sm:$0xff]  }
 0x2e1   :  { %5732 = vmatpush2.bf16.msra.mxu1 %v8019_v22  ;;  %5692 = vmatprep.subr.bf16.mxu0 %v8024_v32  ;;  %v8045_v22 = vld [vmem:[#allocation2 + $0x704] ss:$16 sps:$4 sm:$0xff]   ;;  %v2324_v32 = vrot.slane %v2294_v5, 7  ;;  %v8052_v5 = vld [vmem:[#allocation2 + $0x8c0] ss:$16 sps:$4 sm:$0xff]  }
 0x2e2   :  { %5733 = vmatprep.subr.bf16.mxu1 %v8027_v25  ;;  %v8040_v25 = vld [vmem:[#allocation2 + $0x500] ss:$16 sps:$4 sm:$0xff]   ;;  %v2319_v7 = vsel %vm2306_vm6, %v2318_v19, %v2271_v15  ;;  %v8072_v19 = vld [vmem:[#allocation2 + $0x864] ss:$16 sps:$4 sm:$0xff]  }
 0x2e3   :  { %v8067_v15 = vld [vmem:[#allocation2 + $0xa80] ss:$16 sps:$4 sm:$0xff]   ;;  %v8084_v11 = vld [vmem:[#allocation2 + $0x824] ss:$16 sps:$4 sm:$0xff]  }
 0x2e4   :  { %5693 = vmatpush2.bf16.msra.mxu0 %v8022_v29  ;;  %v8043_v29 = vld [vmem:[#allocation2 + $0x700] ss:$16 sps:$4 sm:$0xff]  }
 0x2e5   :  { %5734 = vmatpush2.bf16.msra.mxu1 %v8025_v16  ;;  %5694 = vmatprep.subr.bf16.mxu0 %v8030_v30  ;;  %v2274_v16 = vunpack.c.l.b16 %v2172_v38  ;;  %v2328_v30 = vrot.slane %v2296_v14, 7  ;;  %v8063_v38 = vld [vmem:[#allocation2 + $0xaa4] ss:$16 sps:$4 sm:$0xff]   ;;  %v8061_v14 = vld [vmem:[#allocation2 + $0xaa0] ss:$16 sps:$4 sm:$0xff]  }
 0x2e6   :  { %5735 = vmatprep.subr.bf16.mxu1 %v8033_v28  ;;  %v8051_v28 = vld [vmem:[#allocation2 + $0xae4] ss:$16 sps:$4 sm:$0xff]  }
 0x2e7   :  { %v2329_v54 = vsel %vm2306_vm6, %v2328_v30, %v2276_v10  ;;  %v8076_v10 = vld [vmem:[#allocation2 + $0x840] ss:$16 sps:$4 sm:$0xff]  }
 0x2e8   :  { %5695 = vmatpush2.bf16.msra.mxu0 %v8028_v18  ;;  %v9452_v18 = vpack.c.b16 %v2319_v7, %v2319_v7  ;;  %v8079_v30 = vld [vmem:[#allocation2 + $0xa40] ss:$16 sps:$4 sm:$0xff]   ;;  %v8087_v7 = vld [vmem:[#allocation2 + $0xa24] ss:$16 sps:$4 sm:$0xff]  }
 0x2e9   :  { %5736 = vmatpush2.bf16.msra.mxu1 %v8031_v50  ;;  %5696 = vmatprep.subr.bf16.mxu0 %v8036_v53  ;;  %v8046_v50 = vld [vmem:[#allocation2 + $0x8e0] ss:$16 sps:$4 sm:$0xff]   ;;  %v2325_v53 = vsel %vm2306_vm6, %v2324_v32, %v2274_v16  ;;  %v8081_v16 = vld [vmem:[#allocation2 + $0xa44] ss:$16 sps:$4 sm:$0xff]  }
 0x2ea   :  { %5737 = vmatprep.subr.bf16.mxu1 %v8039_v45  ;;  %v9456_v34 = vpack.c.b16 %v2325_v53, %v2325_v53  ;;  %v9458_v45 = vpack.c.b16 %v2329_v54, %v2329_v54  ;;  %v8070_v32 = vld [vmem:[#allocation2 + $0x860] ss:$16 sps:$4 sm:$0xff]  }
 0x2eb   :  { %v8088_v53 = vld [vmem:[#allocation2 + $0x800] ss:$16 sps:$4 sm:$0xff]  }
 0x2ec   :  { %5697 = vmatpush2.bf16.msra.mxu0 %v8034_v6  ;;  %v8055_v6 = vld [vmem:[#allocation2 + $0xac0] ss:$16 sps:$4 sm:$0xff]  }
 0x2ed   :  { %5738 = vmatpush2.bf16.msra.mxu1 %v8037_v57  ;;  %5698 = vmatprep.subr.bf16.mxu0 %v8042_v8  ;;  %v8060_v57 = vld [vmem:[#allocation2 + $0x8a4] ss:$16 sps:$4 sm:$0xff]   ;;  %v8091_v54 = vld [vmem:[#allocation2 + $0xa00] ss:$16 sps:$4 sm:$0xff]  }
 0x2ee   :  { %5739 = vmatprep.subr.bf16.mxu1 %v8045_v22  ;;  %v8066_v8 = vld [vmem:[#allocation2 + $0x884] ss:$16 sps:$4 sm:$0xff]  }
 0x2ef   :  { %v8075_v22 = vld [vmem:[#allocation2 + $0xa64] ss:$16 sps:$4 sm:$0xff]  }
 0x2f0   :  { %5699 = vmatpush2.bf16.msra.mxu0 %v8040_v25  ;;  %v8073_v25 = vld [vmem:[#allocation2 + $0xa60] ss:$16 sps:$4 sm:$0xff]  }
 0x2f1   :  { %5740 = vmatpush2.bf16.msra.mxu1 %v8043_v29  ;;  %5750 = vmatprep.subr.bf16.mxu0 %v8048_v41  ;;  %v8078_v29 = vld [vmem:[#allocation2 + $0x844] ss:$16 sps:$4 sm:$0xff]   ;;  %v8082_v41 = vld [vmem:[#allocation2 + $0x820] ss:$16 sps:$4 sm:$0xff]  }
 0x2f2   :  { %5791 = vmatprep.subr.bf16.mxu1 %v8051_v28  ;;  %v8085_v28 = vld [vmem:[#allocation2 + $0xa20] ss:$16 sps:$4 sm:$0xff]  }
 0x2f3   :  { %5701 = vmatmul.mubr.bf16.vlgmr.msra.gmra.mxu0 %v9450_v42 }
 0x2f4   :  { %5742 = vmatmul.mubr.bf16.vlgmr.msra.gmra.mxu1 %v9452_v18  ;;  %5751 = vmatpush1.bf16.msra.mxu0 %v8046_v50  ;;  %v8090_v50 = vld [vmem:[#allocation2 + $0x804] ss:$16 sps:$4 sm:$0xff]  }
 0x2f5   :  { %5792 = vmatpush1.bf16.msra.mxu1 %v8049_v47  ;;  %5752 = vmatprep.subr.bf16.mxu0 %v8054_v58  ;;  %v8093_v47 = vld [vmem:[#allocation2 + $0xa04] ss:$16 sps:$4 sm:$0xff]  }
 0x2f6   :  { %5793 = vmatprep.subr.bf16.mxu1 %v8057_v55  ;;  %5782 = vmatprep.mubr.bf16.mxu0 %v9456_v34  ;;  %v8096_v58 = vld [vmem:[#allocation2 + $0x9e4] ss:$16 sps:$4 sm:$0xff]  }
 0x2f7   :  { %5823 = vmatprep.mubr.bf16.mxu1 %v9458_v45  ;;  %v8099_v55 = vld [vmem:[#allocation2 + $0xbe4] ss:$16 sps:$4 sm:$0xff]  }
 0x2f8   :  { %5753 = vmatpush1.bf16.msra.mxu0 %v8052_v5  ;;  %v8094_v5 = vld [vmem:[#allocation2 + $0x9e0] ss:$16 sps:$4 sm:$0xff]  }
 0x2f9   :  { %5794 = vmatpush1.bf16.msra.mxu1 %v8055_v6  ;;  %5754 = vmatprep.subr.bf16.mxu0 %v8060_v57  ;;  %v8097_v6 = vld [vmem:[#allocation2 + $0xbe0] ss:$16 sps:$4 sm:$0xff]   ;;  %v8102_v57 = vld [vmem:[#allocation2 + $0x9c4] ss:$16 sps:$4 sm:$0xff]  }
 0x2fa   :  { %5795 = vmatprep.subr.bf16.mxu1 %v8063_v38  ;;  %v8105_v38 = vld [vmem:[#allocation2 + $0xbc4] ss:$16 sps:$4 sm:$0xff]  }
 0x2fc   :  { %5755 = vmatpush1.bf16.msra.mxu0 %v8058_v62  ;;  %v8100_v62 = vld [vmem:[#allocation2 + $0x9c0] ss:$16 sps:$4 sm:$0xff]  }
 0x2fd   :  { %5796 = vmatpush1.bf16.msra.mxu1 %v8061_v14  ;;  %5756 = vmatprep.subr.bf16.mxu0 %v8066_v8  ;;  %v8103_v14 = vld [vmem:[#allocation2 + $0xbc0] ss:$16 sps:$4 sm:$0xff]   ;;  %v8108_v8 = vld [vmem:[#allocation2 + $0x9a4] ss:$16 sps:$4 sm:$0xff]  }
 0x2fe   :  { %5797 = vmatprep.subr.bf16.mxu1 %v8069_v63  ;;  %v8111_v63 = vld [vmem:[#allocation2 + $0xba4] ss:$16 sps:$4 sm:$0xff]  }
 0x300   :  { %5757 = vmatpush1.bf16.msra.mxu0 %v8064_v9  ;;  %v8106_v9 = vld [vmem:[#allocation2 + $0x9a0] ss:$16 sps:$4 sm:$0xff]  }
 0x301   :  { %5798 = vmatpush1.bf16.msra.mxu1 %v8067_v15  ;;  %5758 = vmatprep.subr.bf16.mxu0 %v8072_v19  ;;  %v8109_v15 = vld [vmem:[#allocation2 + $0xba0] ss:$16 sps:$4 sm:$0xff]   ;;  %v8114_v19 = vld [vmem:[#allocation2 + $0x984] ss:$16 sps:$4 sm:$0xff]  }
 0x302   :  { %5799 = vmatprep.subr.bf16.mxu1 %v8075_v22  ;;  %v8117_v22 = vld [vmem:[#allocation2 + $0xb84] ss:$16 sps:$4 sm:$0xff]  }
 0x304   :  { %5759 = vmatpush1.bf16.msra.mxu0 %v8070_v32  ;;  %v8112_v32 = vld [vmem:[#allocation2 + $0x980] ss:$16 sps:$4 sm:$0xff]  }
 0x305   :  { %5800 = vmatpush1.bf16.msra.mxu1 %v8073_v25  ;;  %5760 = vmatprep.subr.bf16.mxu0 %v8078_v29  ;;  %v8115_v25 = vld [vmem:[#allocation2 + $0xb80] ss:$16 sps:$4 sm:$0xff]   ;;  %v8120_v29 = vld [vmem:[#allocation2 + $0x964] ss:$16 sps:$4 sm:$0xff]  }
 0x306   :  { %5801 = vmatprep.subr.bf16.mxu1 %v8081_v16  ;;  %v8123_v16 = vld [vmem:[#allocation2 + $0xb64] ss:$16 sps:$4 sm:$0xff]  }
 0x308   :  { %5761 = vmatpush1.bf16.msra.mxu0 %v8076_v10  ;;  %v8118_v10 = vld [vmem:[#allocation2 + $0x960] ss:$16 sps:$4 sm:$0xff]  }
 0x309   :  { %5802 = vmatpush1.bf16.msra.mxu1 %v8079_v30  ;;  %5762 = vmatprep.subr.bf16.mxu0 %v8084_v11  ;;  %v8121_v30 = vld [vmem:[#allocation2 + $0xb60] ss:$16 sps:$4 sm:$0xff]   ;;  %v2191_v11 = vpack.c.bf16 %v1477_v33, %v1477_v33 }
 0x30a   :  { %5803 = vmatprep.subr.bf16.mxu1 %v8087_v7  ;;  %v2193_v7 = vpack.c.bf16 %v1485_v36, %v1485_v36  ;;  %v8127_v33 = vld [vmem:[#allocation2 + $0xb40] ss:$16 sps:$4 sm:$0xff]   ;;  %v2171_v36 = vpack.c.bf16 %v1475_v0, %v1475_v0  ;;  %v2178_v0 = vpack.c.bf16 %v1500_v13, %v1500_v13 }
 0x30c   :  { %5763 = vmatpush1.bf16.msra.mxu0 %v8082_v41  ;;  %v8126_v41 = vld [vmem:[#allocation2 + $0x944] ss:$16 sps:$4 sm:$0xff]  }
 0x30d   :  { %5804 = vmatpush1.bf16.msra.mxu1 %v8085_v28  ;;  %5764 = vmatprep.subr.bf16.mxu0 %v8090_v50  ;;  %v8129_v28 = vld [vmem:[#allocation2 + $0xb44] ss:$16 sps:$4 sm:$0xff]   ;;  %v8124_v50 = vld [vmem:[#allocation2 + $0x940] ss:$16 sps:$4 sm:$0xff]  }
 0x30e   :  { %5805 = vmatprep.subr.bf16.mxu1 %v8093_v47  ;;  %v2196_v47 = vpack.c.bf16 %v1494_v51, %v1494_v51  ;;  %v8132_v51 = vld [vmem:[#allocation2 + $0x924] ss:$16 sps:$4 sm:$0xff]  }
 0x310   :  { %5765 = vmatpush1.bf16.msra.mxu0 %v8088_v53  ;;  %v2198_v53 = vpack.c.bf16 %v1502_v52, %v1502_v52  ;;  %v2176_v52 = vpack.c.bf16 %v1492_v12, %v1492_v12 }
 0x311   :  { %5806 = vmatpush1.bf16.msra.mxu1 %v8091_v54  ;;  %5766 = vmatprep.subr.bf16.mxu0 %v8096_v58  ;;  %v2293_v54 = vunpack.c.l.b16 %v2191_v11  ;;  %v2173_v58 = vpack.c.bf16 %v1483_v1, %v1483_v1  ;;  %v2273_v1 = vunpack.c.l.b16 %v2171_v36  ;;  %v8142_v11 = vld [vmem:[#allocation2 + $0xce0] ss:$16 sps:$4 sm:$0xff]  }
 0x312   :  { %5807 = vmatprep.subr.bf16.mxu1 %v8099_v55  ;;  %v2295_v55 = vunpack.c.l.b16 %v2193_v7  ;;  %v8148_v36 = vld [vmem:[#allocation2 + $0xcc0] ss:$16 sps:$4 sm:$0xff]  }
 0x314   :  { %5767 = vmatpush2.bf16.msra.mxu0 %v8094_v5  ;;  %v8135_v5 = vld [vmem:[#allocation2 + $0xb24] ss:$16 sps:$4 sm:$0xff]  }
 0x315   :  { %5808 = vmatpush2.bf16.msra.mxu1 %v8097_v6  ;;  %5768 = vmatprep.subr.bf16.mxu0 %v8102_v57  ;;  %v2298_v6 = vunpack.c.l.b16 %v2196_v47  ;;  %v2300_v57 = vunpack.c.l.b16 %v2198_v53  ;;  %v8153_v47 = vld [vmem:[#allocation2 + $0xec4] ss:$16 sps:$4 sm:$0xff]  }
 0x316   :  { %5809 = vmatprep.subr.bf16.mxu1 %v8105_v38  ;;  %v8133_v38 = vld [vmem:[#allocation2 + $0xb20] ss:$16 sps:$4 sm:$0xff]  }
 0x317   :  { %v2332_v12 = vrot.slane %v2298_v6, 7  ;;  %v8160_v6 = vld [vmem:[#allocation2 + $0xc80] ss:$16 sps:$4 sm:$0xff]  }
 0x318   :  { %5769 = vmatpush2.bf16.msra.mxu0 %v8100_v62  ;;  %v2322_v62 = vrot.slane %v2293_v54, 7  ;;  %v8151_v54 = vld [vmem:[#allocation2 + $0xec0] ss:$16 sps:$4 sm:$0xff]  }
 0x319   :  { %5810 = vmatpush2.bf16.msra.mxu1 %v8103_v14  ;;  %5770 = vmatprep.subr.bf16.mxu0 %v8108_v8  ;;  %v2275_v14 = vunpack.c.l.b16 %v2173_v58  ;;  %v2326_v8 = vrot.slane %v2295_v55, 7  ;;  %v8156_v58 = vld [vmem:[#allocation2 + $0xca4] ss:$16 sps:$4 sm:$0xff]  }
 0x31a   :  { %5811 = vmatprep.subr.bf16.mxu1 %v8111_v63  ;;  %v8138_v63 = vld [vmem:[#allocation2 + $0x904] ss:$16 sps:$4 sm:$0xff]   ;;  %v2323_v13 = vsel %vm2306_vm6, %v2322_v62, %v2273_v1  ;;  %v8166_v1 = vld [vmem:[#allocation2 + $0xc60] ss:$16 sps:$4 sm:$0xff]  }
 0x31b   :  { %v8159_v55 = vld [vmem:[#allocation2 + $0xea4] ss:$16 sps:$4 sm:$0xff]   ;;  %v8169_v62 = vld [vmem:[#allocation2 + $0xe60] ss:$16 sps:$4 sm:$0xff]  }
 0x31c   :  { %5771 = vmatpush2.bf16.msra.mxu0 %v8106_v9  ;;  %v8141_v9 = vld [vmem:[#allocation2 + $0xb04] ss:$16 sps:$4 sm:$0xff]  }
 0x31d   :  { %5812 = vmatpush2.bf16.msra.mxu1 %v8109_v15  ;;  %5772 = vmatprep.subr.bf16.mxu0 %v8114_v19  ;;  %v8136_v15 = vld [vmem:[#allocation2 + $0x900] ss:$16 sps:$4 sm:$0xff]   ;;  %v2278_v19 = vunpack.c.l.b16 %v2176_v52  ;;  %v8165_v52 = vld [vmem:[#allocation2 + $0xe84] ss:$16 sps:$4 sm:$0xff]  }
 0x31e   :  { %5813 = vmatprep.subr.bf16.mxu1 %v8117_v22  ;;  %v2280_v22 = vunpack.c.l.b16 %v2178_v0  ;;  %v8163_v0 = vld [vmem:[#allocation2 + $0xe80] ss:$16 sps:$4 sm:$0xff]  }
 0x31f   :  { %v2333_v7 = vsel %vm2306_vm6, %v2332_v12, %v2278_v19  ;;  %v8183_v19 = vld [vmem:[#allocation2 + $0xe24] ss:$16 sps:$4 sm:$0xff]   ;;  %v8178_v12 = vld [vmem:[#allocation2 + $0xc20] ss:$16 sps:$4 sm:$0xff]  }
 0x320   :  { %5773 = vmatpush2.bf16.msra.mxu0 %v8112_v32  ;;  %v2336_v32 = vrot.slane %v2300_v57, 7  ;;  %v9496_v53 = vpack.c.b16 %v2333_v7, %v2333_v7  ;;  %v8168_v57 = vld [vmem:[#allocation2 + $0xc64] ss:$16 sps:$4 sm:$0xff]   ;;  %v8193_v7 = vld [vmem:[#allocation2 + $0xfe0] ss:$16 sps:$4 sm:$0xff]  }
 0x321   :  { %5814 = vmatpush2.bf16.msra.mxu1 %v8115_v25  ;;  %5774 = vmatprep.subr.bf16.mxu0 %v8120_v29  ;;  %v2327_v25 = vsel %vm2306_vm6, %v2326_v8, %v2275_v14  ;;  %v8144_v29 = vld [vmem:[#allocation2 + $0xce4] ss:$16 sps:$4 sm:$0xff]  }
 0x322   :  { %5815 = vmatprep.subr.bf16.mxu1 %v8123_v16  ;;  %v8147_v16 = vld [vmem:[#allocation2 + $0xee4] ss:$16 sps:$4 sm:$0xff]  }
 0x323   :  { %v8174_v14 = vld [vmem:[#allocation2 + $0xc44] ss:$16 sps:$4 sm:$0xff]  }
 0x324   :  { %5775 = vmatpush2.bf16.msra.mxu0 %v8118_v10  ;;  %v9490_v10 = vpack.c.b16 %v2323_v13, %v2323_v13  ;;  %v8177_v8 = vld [vmem:[#allocation2 + $0xe44] ss:$16 sps:$4 sm:$0xff]   ;;  %v8184_v13 = vld [vmem:[#allocation2 + $0xc00] ss:$16 sps:$4 sm:$0xff]  }
 0x325   :  { %5816 = vmatpush2.bf16.msra.mxu1 %v8121_v30  ;;  %5776 = vmatprep.subr.bf16.mxu0 %v8126_v41  ;;  %v9492_v30 = vpack.c.b16 %v2327_v25, %v2327_v25  ;;  %v2337_v41 = vsel %vm2306_vm6, %v2336_v32, %v2280_v22  ;;  %v8181_v22 = vld [vmem:[#allocation2 + $0xe20] ss:$16 sps:$4 sm:$0xff]   ;;  %v8186_v32 = vld [vmem:[#allocation2 + $0xc04] ss:$16 sps:$4 sm:$0xff]  }
 0x326   :  { %5817 = vmatprep.subr.bf16.mxu1 %v8129_v28  ;;  %v8145_v28 = vld [vmem:[#allocation2 + $0xee0] ss:$16 sps:$4 sm:$0xff]  }
 0x327   :  { %v8187_v25 = vld [vmem:[#allocation2 + $0xe00] ss:$16 sps:$4 sm:$0xff]  }
 0x328   :  { %5777 = vmatpush2.bf16.msra.mxu0 %v8124_v50  ;;  %v8150_v50 = vld [vmem:[#allocation2 + $0xcc4] ss:$16 sps:$4 sm:$0xff]  }
 0x329   :  { %5818 = vmatpush2.bf16.msra.mxu1 %v8127_v33  ;;  %5778 = vmatprep.subr.bf16.mxu0 %v8132_v51  ;;  %v9498_v33 = vpack.c.b16 %v2337_v41, %v2337_v41  ;;  %v8154_v51 = vld [vmem:[#allocation2 + $0xca0] ss:$16 sps:$4 sm:$0xff]   ;;  %v8198_v41 = vld [vmem:[#allocation2 + $0xdc4] ss:$16 sps:$4 sm:$0xff]  }
 0x32a   :  { %5819 = vmatprep.subr.bf16.mxu1 %v8135_v5  ;;  %v8157_v5 = vld [vmem:[#allocation2 + $0xea0] ss:$16 sps:$4 sm:$0xff]  }
 0x32c   :  { %5779 = vmatpush2.bf16.msra.mxu0 %v8130_v60  ;;  %v8162_v60 = vld [vmem:[#allocation2 + $0xc84] ss:$16 sps:$4 sm:$0xff]  }
 0x32d   :  { %5820 = vmatpush2.bf16.msra.mxu1 %v8133_v38  ;;  %5780 = vmatprep.subr.bf16.mxu0 %v8138_v63  ;;  %v8171_v38 = vld [vmem:[#allocation2 + $0xe64] ss:$16 sps:$4 sm:$0xff]   ;;  %v8172_v63 = vld [vmem:[#allocation2 + $0xc40] ss:$16 sps:$4 sm:$0xff]  }
 0x32e   :  { %5821 = vmatprep.subr.bf16.mxu1 %v8141_v9  ;;  %v8175_v9 = vld [vmem:[#allocation2 + $0xe40] ss:$16 sps:$4 sm:$0xff]  }
 0x330   :  { %5781 = vmatpush2.bf16.msra.mxu0 %v8136_v15  ;;  %v8180_v15 = vld [vmem:[#allocation2 + $0xc24] ss:$16 sps:$4 sm:$0xff]  }
 0x331   :  { %5822 = vmatpush2.bf16.msra.mxu1 %v8139_v39  ;;  %5832 = vmatprep.subr.bf16.mxu0 %v8144_v29  ;;  %v8189_v39 = vld [vmem:[#allocation2 + $0xe04] ss:$16 sps:$4 sm:$0xff]  }
 0x332   :  { %5873 = vmatprep.subr.bf16.mxu1 %v8147_v16  ;;  %v8192_v29 = vld [vmem:[#allocation2 + $0xde4] ss:$16 sps:$4 sm:$0xff]  }
 0x333   :  { %5783 = vmatmul.mubr.bf16.vlgmr.msra.gmra.mxu0 %v9490_v10  ;;  %v8195_v16 = vld [vmem:[#allocation2 + $0xfe4] ss:$16 sps:$4 sm:$0xff]  }
 0x334   :  { %5824 = vmatmul.mubr.bf16.vlgmr.msra.gmra.mxu1 %v9492_v30  ;;  %5833 = vmatpush1.bf16.msra.mxu0 %v8142_v11  ;;  %v8190_v11 = vld [vmem:[#allocation2 + $0xde0] ss:$16 sps:$4 sm:$0xff]  }
 0x335   :  { %5874 = vmatpush1.bf16.msra.mxu1 %v8145_v28  ;;  %5834 = vmatprep.subr.bf16.mxu0 %v8150_v50  ;;  %v8201_v28 = vld [vmem:[#allocation2 + $0xfc4] ss:$16 sps:$4 sm:$0xff]   ;;  %v8196_v50 = vld [vmem:[#allocation2 + $0xdc0] ss:$16 sps:$4 sm:$0xff]  }
 0x336   :  { %5875 = vmatprep.subr.bf16.mxu1 %v8153_v47  ;;  %5864 = vmatprep.mubr.bf16.mxu0 %v9496_v53  ;;  %v8199_v47 = vld [vmem:[#allocation2 + $0xfc0] ss:$16 sps:$4 sm:$0xff]  }
 0x337   :  { %5905 = vmatprep.mubr.bf16.mxu1 %v9498_v33 }
 0x338   :  { %5835 = vmatpush1.bf16.msra.mxu0 %v8148_v36  ;;  %v8204_v36 = vld [vmem:[#allocation2 + $0xda4] ss:$16 sps:$4 sm:$0xff]  }
 0x339   :  { %5876 = vmatpush1.bf16.msra.mxu1 %v8151_v54  ;;  %5836 = vmatprep.subr.bf16.mxu0 %v8156_v58  ;;  %v8207_v54 = vld [vmem:[#allocation2 + $0xfa4] ss:$16 sps:$4 sm:$0xff]   ;;  %v8202_v58 = vld [vmem:[#allocation2 + $0xda0] ss:$16 sps:$4 sm:$0xff]  }
 0x33a   :  { %5877 = vmatprep.subr.bf16.mxu1 %v8159_v55  ;;  %v8205_v55 = vld [vmem:[#allocation2 + $0xfa0] ss:$16 sps:$4 sm:$0xff]  }
 0x33c   :  { %5837 = vmatpush1.bf16.msra.mxu0 %v8154_v51  ;;  %v8210_v51 = vld [vmem:[#allocation2 + $0xd84] ss:$16 sps:$4 sm:$0xff]  }
 0x33d   :  { %5878 = vmatpush1.bf16.msra.mxu1 %v8157_v5  ;;  %5838 = vmatprep.subr.bf16.mxu0 %v8162_v60  ;;  %v8213_v5 = vld [vmem:[#allocation2 + $0xf84] ss:$16 sps:$4 sm:$0xff]   ;;  %v8208_v60 = vld [vmem:[#allocation2 + $0xd80] ss:$16 sps:$4 sm:$0xff]  }
 0x33e   :  { %5879 = vmatprep.subr.bf16.mxu1 %v8165_v52  ;;  %v8211_v52 = vld [vmem:[#allocation2 + $0xf80] ss:$16 sps:$4 sm:$0xff]  }
 0x340   :  { %5839 = vmatpush1.bf16.msra.mxu0 %v8160_v6  ;;  %v8216_v6 = vld [vmem:[#allocation2 + $0xd64] ss:$16 sps:$4 sm:$0xff]  }
 0x341   :  { %5880 = vmatpush1.bf16.msra.mxu1 %v8163_v0  ;;  %5840 = vmatprep.subr.bf16.mxu0 %v8168_v57  ;;  %v8219_v0 = vld [vmem:[#allocation2 + $0xf64] ss:$16 sps:$4 sm:$0xff]   ;;  %v8214_v57 = vld [vmem:[#allocation2 + $0xd60] ss:$16 sps:$4 sm:$0xff]  }
 0x342   :  { %5881 = vmatprep.subr.bf16.mxu1 %v8171_v38  ;;  %v8217_v38 = vld [vmem:[#allocation2 + $0xf60] ss:$16 sps:$4 sm:$0xff]  }
 0x344   :  { %5841 = vmatpush1.bf16.msra.mxu0 %v8166_v1  ;;  %v2195_v1 = vpack.c.bf16 %v1493_v37, %v1493_v37 }
 0x345   :  { %5882 = vmatpush1.bf16.msra.mxu1 %v8169_v62  ;;  %5842 = vmatprep.subr.bf16.mxu0 %v8174_v14  ;;  %v2197_v62 = vpack.c.bf16 %v1501_v40, %v1501_v40  ;;  %v8222_v14 = vld [vmem:[#allocation2 + $0xd44] ss:$16 sps:$4 sm:$0xff]   ;;  %v2177_v40 = vpack.c.bf16 %v1499_v4, %v1499_v4 }
 0x346   :  { %5883 = vmatprep.subr.bf16.mxu1 %v8177_v8  ;;  %v8225_v8 = vld [vmem:[#allocation2 + $0xf44] ss:$16 sps:$4 sm:$0xff]   ;;  %v2297_v37 = vunpack.c.l.b16 %v2195_v1 }
 0x347   :  { %v8246_v1 = vld [vmem:[#allocation2 + $0x10c4] ss:$16 sps:$4 sm:$0xff]  }
 0x348   :  { %5843 = vmatpush1.bf16.msra.mxu0 %v8172_v63  ;;  %v8220_v63 = vld [vmem:[#allocation2 + $0xd40] ss:$16 sps:$4 sm:$0xff]   ;;  %v2330_v4 = vrot.slane %v2297_v37, 7 }
 0x349   :  { %5884 = vmatpush1.bf16.msra.mxu1 %v8175_v9  ;;  %5844 = vmatprep.subr.bf16.mxu0 %v8180_v15  ;;  %v2200_v9 = vpack.c.bf16 %v9371_v59, %v9371_v59  ;;  %v2202_v15 = vpack.c.bf16 %v1514_v61, %v1514_v61  ;;  %v8226_v59 = vld [vmem:[#allocation2 + $0xd20] ss:$16 sps:$4 sm:$0xff]   ;;  %v2180_v61 = vpack.c.bf16 %v9347_v20, %v9347_v20 }
 0x34a   :  { %5885 = vmatprep.subr.bf16.mxu1 %v8183_v19  ;;  %v8223_v19 = vld [vmem:[#allocation2 + $0xf40] ss:$16 sps:$4 sm:$0xff]  }
 0x34b   :  { %v2304_v2 = vunpack.c.l.b16 %v2202_v15 }
 0x34c   :  { %5845 = vmatpush1.bf16.msra.mxu0 %v8178_v12  ;;  %v2299_v12 = vunpack.c.l.b16 %v2197_v62  ;;  %v8249_v62 = vld [vmem:[#allocation2 + $0x12c4] ss:$16 sps:$4 sm:$0xff]  }
 0x34d   :  { %5886 = vmatpush1.bf16.msra.mxu1 %v8181_v22  ;;  %5846 = vmatprep.subr.bf16.mxu0 %v8186_v32  ;;  %v8228_v22 = vld [vmem:[#allocation2 + $0xd24] ss:$16 sps:$4 sm:$0xff]   ;;  %v2344_v20 = vrot.slane %v2304_v2, 7 }
 0x34e   :  { %5887 = vmatprep.subr.bf16.mxu1 %v8189_v39  ;;  %v8231_v32 = vld [vmem:[#allocation2 + $0xf24] ss:$16 sps:$4 sm:$0xff]   ;;  %v2302_v39 = vunpack.c.l.b16 %v2200_v9 }
 0x350   :  { %5847 = vmatpush1.bf16.msra.mxu0 %v8184_v13  ;;  %v2182_v13 = vpack.c.bf16 %v1512_v26, %v1512_v26  ;;  %v2203_v26 = vld [vmem:[#allocation12] sm:$0xf] }
 0x351   :  { %5888 = vmatpush1.bf16.msra.mxu1 %v8187_v25  ;;  %5848 = vmatprep.subr.bf16.mxu0 %v8192_v29  ;;  %v2277_v25 = vunpack.c.l.b16 %v2175_v21  ;;  %v2279_v29 = vunpack.c.l.b16 %v2177_v40 }
 0x352   :  { %5889 = vmatprep.subr.bf16.mxu1 %v8195_v16  ;;  %v2334_v16 = vrot.slane %v2299_v12, 7  ;;  %v8255_v12 = vld [vmem:[#allocation2 + $0x12a4] ss:$16 sps:$4 sm:$0xff]  }
 0x354   :  { %5849 = vmatpush2.bf16.msra.mxu0 %v8190_v11  ;;  %v8234_v11 = vld [vmem:[#allocation2 + $0xd04] ss:$16 sps:$4 sm:$0xff]  }
 0x355   :  { %5890 = vmatpush2.bf16.msra.mxu1 %v8193_v7  ;;  %5850 = vmatprep.subr.bf16.mxu0 %v8198_v41  ;;  %v8237_v7 = vld [vmem:[#allocation2 + $0xf04] ss:$16 sps:$4 sm:$0xff]   ;;  %v8232_v41 = vld [vmem:[#allocation2 + $0xd00] ss:$16 sps:$4 sm:$0xff]  }
 0x356   :  { %5891 = vmatprep.subr.bf16.mxu1 %v8201_v28  ;;  %v8235_v28 = vld [vmem:[#allocation2 + $0xf00] ss:$16 sps:$4 sm:$0xff]  }
 0x358   :  { %5851 = vmatpush2.bf16.msra.mxu0 %v8196_v50  ;;  %v2282_v50 = vunpack.c.l.b16 %v2180_v61  ;;  %v8253_v61 = vld [vmem:[#allocation2 + $0x12a0] ss:$16 sps:$4 sm:$0xff]  }
 0x359   :  { %5892 = vmatpush2.bf16.msra.mxu1 %v8199_v47  ;;  %5852 = vmatprep.subr.bf16.mxu0 %v8204_v36  ;;  %v2340_v47 = vrot.slane %v2302_v39, 7  ;;  %v2284_v36 = vunpack.c.l.b16 %v2182_v13 }
 0x35a   :  { %5893 = vmatprep.subr.bf16.mxu1 %v8207_v54  ;;  %v2331_v54 = vsel %vm2306_vm6, %v2330_v4, %v2277_v25  ;;  %v8258_v4 = vld [vmem:[#allocation2 + $0x1084] ss:$16 sps:$4 sm:$0xff]  }
 0x35c   :  { %5853 = vmatpush2.bf16.msra.mxu0 %v8202_v58  ;;  %v2335_v58 = vsel %vm2306_vm6, %v2334_v16, %v2279_v29  ;;  %v8261_v29 = vld [vmem:[#allocation2 + $0x1284] ss:$16 sps:$4 sm:$0xff]   ;;  %v8256_v16 = vld [vmem:[#allocation2 + $0x1080] ss:$16 sps:$4 sm:$0xff]  }
 0x35d   :  { %5894 = vmatpush2.bf16.msra.mxu1 %v8205_v55  ;;  %5854 = vmatprep.subr.bf16.mxu0 %v8210_v51  ;;  %v8240_v55 = vld [vmem:[#allocation2 + $0x10e4] ss:$16 sps:$4 sm:$0xff]  }
 0x35e   :  { %5895 = vmatprep.subr.bf16.mxu1 %v8213_v5  ;;  %v8243_v51 = vld [vmem:[#allocation2 + $0x12e4] ss:$16 sps:$4 sm:$0xff]   ;;  %v8238_v5 = vld [vmem:[#allocation2 + $0x10e0] ss:$16 sps:$4 sm:$0xff]  }
 0x360   :  { %5855 = vmatpush2.bf16.msra.mxu0 %v8208_v60  ;;  %v9528_v60 = vpack.c.b16 %v2331_v54, %v2331_v54  ;;  %v8276_v54 = vld [vmem:[#allocation2 + $0x1024] ss:$16 sps:$4 sm:$0xff]  }
 0x361   :  { %5896 = vmatpush2.bf16.msra.mxu1 %v8211_v52  ;;  %5856 = vmatprep.subr.bf16.mxu0 %v8216_v6  ;;  %v9530_v52 = vpack.c.b16 %v2335_v58, %v2335_v58  ;;  %v8241_v6 = vld [vmem:[#allocation2 + $0x12e0] ss:$16 sps:$4 sm:$0xff]   ;;  %v8279_v58 = vld [vmem:[#allocation2 + $0x1224] ss:$16 sps:$4 sm:$0xff]  }
 0x362   :  { %5897 = vmatprep.subr.bf16.mxu1 %v8219_v0  ;;  %v2341_v0 = vsel %vm2306_vm6, %v2340_v47, %v2282_v50  ;;  %v8265_v50 = vld [vmem:[#allocation2 + $0x1260] ss:$16 sps:$4 sm:$0xff]   ;;  %v8270_v47 = vld [vmem:[#allocation2 + $0x1044] ss:$16 sps:$4 sm:$0xff]  }
 0x363   :  { %v9536_v9 = vpack.c.b16 %v2341_v0, %v2341_v0  ;;  %v8280_v0 = vld [vmem:[#allocation2 + $0x1000] ss:$16 sps:$4 sm:$0xff]  }
 0x364   :  { %5857 = vmatpush2.bf16.msra.mxu0 %v8214_v57  ;;  %v2345_v57 = vsel %vm2306_vm6, %v2344_v20, %v2284_v36  ;;  %v8273_v36 = vld [vmem:[#allocation2 + $0x1244] ss:$16 sps:$4 sm:$0xff]   ;;  %v8268_v20 = vld [vmem:[#allocation2 + $0x1040] ss:$16 sps:$4 sm:$0xff]  }
 0x365   :  { %5898 = vmatpush2.bf16.msra.mxu1 %v8217_v38  ;;  %5858 = vmatprep.subr.bf16.mxu0 %v8222_v14  ;;  %v2208_v38 = vrot.slane %v2203_v26, %v9281_v43  ;;  %v2212_v14 = vrot.slane %v2203_v26, %v9284_v48  ;;  %v9538_v15 = vpack.c.b16 %v2345_v57, %v2345_v57  ;;  %v8252_v48 = vld [vmem:[#allocation2 + $0x10a4] ss:$16 sps:$4 sm:$0xff]   ;;  %v8271_v26 = vld [vmem:[#allocation2 + $0x1240] ss:$16 sps:$4 sm:$0xff]  }
 0x366   :  { %5899 = vmatprep.subr.bf16.mxu1 %v8225_v8  ;;  %v8244_v8 = vld [vmem:[#allocation2 + $0x10c0] ss:$16 sps:$4 sm:$0xff]  }
 0x367   :  { %v8283_v57 = vld [vmem:[#allocation2 + $0x1200] ss:$16 sps:$4 sm:$0xff]  }
 0x368   :  { %5859 = vmatpush2.bf16.msra.mxu0 %v8220_v63  ;;  %v8247_v63 = vld [vmem:[#allocation2 + $0x12c0] ss:$16 sps:$4 sm:$0xff]  }
 0x369   :  { %5900 = vmatpush2.bf16.msra.mxu1 %v8223_v19  ;;  %5860 = vmatprep.subr.bf16.mxu0 %v8228_v22 }
 0x36a   :  { %5901 = vmatprep.subr.bf16.mxu1 %v8231_v32 }
 0x36c   :  { %5861 = vmatpush2.bf16.msra.mxu0 %v8226_v59  ;;  %v8250_v59 = vld [vmem:[#allocation2 + $0x10a0] ss:$16 sps:$4 sm:$0xff]  }
 0x36d   :  { %5902 = vmatpush2.bf16.msra.mxu1 %v8229_v46  ;;  %5862 = vmatprep.subr.bf16.mxu0 %v8234_v11  ;;  %v8259_v11 = vld [vmem:[#allocation2 + $0x1280] ss:$16 sps:$4 sm:$0xff]  }
 0x36e   :  { %5903 = vmatprep.subr.bf16.mxu1 %v8237_v7  ;;  %v8264_v7 = vld [vmem:[#allocation2 + $0x1064] ss:$16 sps:$4 sm:$0xff]  }
 0x370   :  { %5863 = vmatpush2.bf16.msra.mxu0 %v8232_v41  ;;  %v8267_v41 = vld [vmem:[#allocation2 + $0x1264] ss:$16 sps:$4 sm:$0xff]  }
 0x371   :  { %5904 = vmatpush2.bf16.msra.mxu1 %v8235_v28  ;;  %5914 = vmatprep.subr.bf16.mxu0 %v8240_v55  ;;  %v8262_v28 = vld [vmem:[#allocation2 + $0x1060] ss:$16 sps:$4 sm:$0xff]  }
 0x372   :  { %5955 = vmatprep.subr.bf16.mxu1 %v8243_v51  ;;  %v8274_v55 = vld [vmem:[#allocation2 + $0x1020] ss:$16 sps:$4 sm:$0xff]  }
 0x373   :  { %v5620_v19 = vpop.f32.mrf.mxu0  ;;  %5865 = vmatmul.mubr.bf16.vlgmr.msra.gmra.mxu0 %v9528_v60  ;;  %v8277_v51 = vld [vmem:[#allocation2 + $0x1220] ss:$16 sps:$4 sm:$0xff]  }
 0x374   :  { %v5661_v21 = vpop.f32.mrf.mxu1  ;;  %5906 = vmatmul.mubr.bf16.vlgmr.msra.gmra.mxu1 %v9530_v52  ;;  %v5621_v37 = vadd.f32 %v5620_v19, %v2208_v38  ;;  %5915 = vmatpush1.bf16.msra.mxu0 %v8238_v5  ;;  %v8282_v5 = vld [vmem:[#allocation2 + $0x1004] ss:$16 sps:$4 sm:$0xff]   ;;  %v8292_v19 = vld [vmem:[#allocation2 + $0x11c0] ss:$16 sps:$4 sm:$0xff]  }
 0x375   :  { %5956 = vmatpush1.bf16.msra.mxu1 %v8241_v6  ;;  %v5622_v43 = vpop.f32.mrf.mxu0  ;;  %5916 = vmatprep.subr.bf16.mxu0 %v8246_v1  ;;  %v8285_v6 = vld [vmem:[#allocation2 + $0x1204] ss:$16 sps:$4 sm:$0xff]  }
 0x376   :  { %v5663_v40 = vpop.f32.mrf.mxu1  ;;  %5957 = vmatprep.subr.bf16.mxu1 %v8249_v62  ;;  %v9542_v22 = vadd.f32 %v5661_v21, %v5621_v37  ;;  %v5623_v32 = vadd.f32 %v5622_v43, %v2212_v14  ;;  %5946 = vmatprep.mubr.bf16.mxu0 %v9536_v9  ;;  %v8288_v38 = vld [vmem:[#allocation2 + $0x11e4] ss:$16 sps:$4 sm:$0xff]   ;;  %v8286_v62 = vld [vmem:[#allocation2 + $0x11e0] ss:$16 sps:$4 sm:$0xff]  }
 0x377   :  { %5987 = vmatprep.mubr.bf16.mxu1 %v9538_v15  ;;  %v5624_v39 = vpop.f32.mrf.mxu0  ;;  %v8291_v1 = vld [vmem:[#allocation2 + $0x13e4] ss:$16 sps:$4 sm:$0xff]   ;;  %v8289_v14 = vld [vmem:[#allocation2 + $0x13e0] ss:$16 sps:$4 sm:$0xff]  }
 0x378   :  { %v5665_v13 = vpop.f32.mrf.mxu1  ;;  %v9546_v2 = vadd.f32 %v5663_v40, %v5623_v32  ;;  %5917 = vmatpush1.bf16.msra.mxu0 %v8244_v8  ;;  %v8294_v8 = vld [vmem:[#allocation2 + $0x11c4] ss:$16 sps:$4 sm:$0xff]   ;;  %v8295_v21 = vld [vmem:[#allocation2 + $0x13c0] ss:$16 sps:$4 sm:$0xff]  }
 0x379   :  { %5958 = vmatpush1.bf16.msra.mxu1 %v8247_v63  ;;  %v5625_v46 = vpop.f32.mrf.mxu0  ;;  %5918 = vmatprep.subr.bf16.mxu0 %v8252_v48  ;;  %v8297_v63 = vld [vmem:[#allocation2 + $0x13c4] ss:$16 sps:$4 sm:$0xff]   ;;  %v8298_v40 = vld [vmem:[#allocation2 + $0x11a0] ss:$16 sps:$4 sm:$0xff]  }
 0x37a   :  { %v5666_v25 = vpop.f32.mrf.mxu1  ;;  %5959 = vmatprep.subr.bf16.mxu1 %v8255_v12  ;;  %v8300_v37 = vld [vmem:[#allocation2 + $0x11a4] ss:$16 sps:$4 sm:$0xff]   ;;  %v8301_v48 = vld [vmem:[#allocation2 + $0x13a0] ss:$16 sps:$4 sm:$0xff]   ;;  %v2199_v46 = vpack.c.bf16 %v9368_v56, %v9368_v56 }
 0x37b   :  { %v8303_v43 = vld [vmem:[#allocation2 + $0x13a4] ss:$16 sps:$4 sm:$0xff]   ;;  %v8310_v25 = vld [vmem:[#allocation2 + $0x1160] ss:$16 sps:$4 sm:$0xff]  }
 0x37c   :  { %5919 = vmatpush1.bf16.msra.mxu0 %v8250_v59  ;;  %v8306_v12 = vld [vmem:[#allocation2 + $0x1184] ss:$16 sps:$4 sm:$0xff]   ;;  %v8304_v59 = vld [vmem:[#allocation2 + $0x1180] ss:$16 sps:$4 sm:$0xff]  }
 0x37d   :  { %5960 = vmatpush1.bf16.msra.mxu1 %v8253_v61  ;;  %5920 = vmatprep.subr.bf16.mxu0 %v8258_v4  ;;  %v8309_v32 = vld [vmem:[#allocation2 + $0x1384] ss:$16 sps:$4 sm:$0xff]   ;;  %v8307_v61 = vld [vmem:[#allocation2 + $0x1380] ss:$16 sps:$4 sm:$0xff]  }
 0x37e   :  { %5961 = vmatprep.subr.bf16.mxu1 %v8261_v29  ;;  %v8312_v39 = vld [vmem:[#allocation2 + $0x1164] ss:$16 sps:$4 sm:$0xff]   ;;  %v8313_v4 = vld [vmem:[#allocation2 + $0x1360] ss:$16 sps:$4 sm:$0xff]   ;;  %v2201_v29 = vpack.c.bf16 %v1513_v17, %v1513_v17 }
 0x37f   :  { %v8315_v13 = vld [vmem:[#allocation2 + $0x1364] ss:$16 sps:$4 sm:$0xff]  }
 0x380   :  { %5921 = vmatpush1.bf16.msra.mxu0 %v8256_v16  ;;  %v8318_v16 = vld [vmem:[#allocation2 + $0x1144] ss:$16 sps:$4 sm:$0xff]  }
 0x381   :  { %5962 = vmatpush1.bf16.msra.mxu1 %v8259_v11  ;;  %5922 = vmatprep.subr.bf16.mxu0 %v8264_v7  ;;  %v8321_v11 = vld [vmem:[#allocation2 + $0x1344] ss:$16 sps:$4 sm:$0xff]   ;;  %v2301_v7 = vunpack.c.l.b16 %v2199_v46  ;;  %v8351_v46 = vld [vmem:[#allocation2 + $0x2ac] ss:$16 sps:$4 sm:$0xff]  }
 0x382   :  { %5963 = vmatprep.subr.bf16.mxu1 %v8267_v41  ;;  %v8316_v41 = vld [vmem:[#allocation2 + $0x1140] ss:$16 sps:$4 sm:$0xff]   ;;  %v8324_v56 = vld [vmem:[#allocation2 + $0x1124] ss:$16 sps:$4 sm:$0xff]  }
 0x383   :  { %v8327_v17 = vld [vmem:[#allocation2 + $0x1324] ss:$16 sps:$4 sm:$0xff]  }
 0x384   :  { %5923 = vmatpush1.bf16.msra.mxu0 %v8262_v28  ;;  %v8319_v28 = vld [vmem:[#allocation2 + $0x1340] ss:$16 sps:$4 sm:$0xff]  }
 0x385   :  { %5964 = vmatpush1.bf16.msra.mxu1 %v8265_v50  ;;  %5924 = vmatprep.subr.bf16.mxu0 %v8270_v47  ;;  %v2179_v50 = vpack.c.bf16 %v9344_v49, %v9344_v49  ;;  %v9636_v47 = vrot.slane %v9344_v49, 1  ;;  %v8328_v49 = vld [vmem:[#allocation2 + $0x1100] ss:$16 sps:$4 sm:$0xff]  }
 0x386   :  { %5965 = vmatprep.subr.bf16.mxu1 %v8273_v36 }
 0x387   :  { %v2181_v36 = vpack.c.bf16 %v9636_v47, %v9636_v47  ;;  %v8357_v47 = vld [vmem:[#allocation2 + $0x28c] ss:$16 sps:$4 sm:$0xff]  }
 0x388   :  { %5925 = vmatpush1.bf16.msra.mxu0 %v8268_v20  ;;  %v2303_v20 = vunpack.c.l.b16 %v2201_v29  ;;  %v8346_v29 = vld [vmem:[#allocation2 + $0xa8] ss:$16 sps:$4 sm:$0xff]  }
 0x389   :  { %5966 = vmatpush1.bf16.msra.mxu1 %v8271_v26  ;;  %5926 = vmatprep.subr.bf16.mxu0 %v8276_v54  ;;  %v2338_v26 = vrot.slane %v2301_v7, 7  ;;  %v8322_v54 = vld [vmem:[#allocation2 + $0x1120] ss:$16 sps:$4 sm:$0xff]  }
 0x38a   :  { %5967 = vmatprep.subr.bf16.mxu1 %v8279_v58  ;;  %v8325_v58 = vld [vmem:[#allocation2 + $0x1320] ss:$16 sps:$4 sm:$0xff]  }
 0x38c   :  { %5927 = vmatpush1.bf16.msra.mxu0 %v8274_v55  ;;  %v2281_v55 = vunpack.c.l.b16 %v2179_v50  ;;  %v8354_v50 = vld [vmem:[#allocation2 + $0x8c] ss:$16 sps:$4 sm:$0xff]  }
 0x38d   :  { %5968 = vmatpush1.bf16.msra.mxu1 %v8277_v51  ;;  %5928 = vmatprep.subr.bf16.mxu0 %v8282_v5  ;;  %v2283_v51 = vunpack.c.l.b16 %v2181_v36  ;;  %v2342_v5 = vrot.slane %v2303_v20, 7  ;;  %v8355_v36 = vld [vmem:[#allocation2 + $0x288] ss:$16 sps:$4 sm:$0xff]  }
 0x38e   :  { %5969 = vmatprep.subr.bf16.mxu1 %v8285_v6  ;;  %v8330_v6 = vld [vmem:[#allocation2 + $0x1104] ss:$16 sps:$4 sm:$0xff]   ;;  %v8358_v20 = vld [vmem:[#allocation2 + $0x68] ss:$16 sps:$4 sm:$0xff]  }
 0x390   :  { %5929 = vmatpush1.bf16.msra.mxu0 %v8280_v0  ;;  %v8333_v0 = vld [vmem:[#allocation2 + $0x1304] ss:$16 sps:$4 sm:$0xff]  }
 0x391   :  { %5970 = vmatpush1.bf16.msra.mxu1 %v8283_v57  ;;  %5930 = vmatprep.subr.bf16.mxu0 %v8288_v38  ;;  %v8331_v57 = vld [vmem:[#allocation2 + $0x1300] ss:$16 sps:$4 sm:$0xff]   ;;  %v2339_v38 = vsel %vm2306_vm6, %v2338_v26, %v2281_v55  ;;  %v8369_v26 = vld [vmem:[#allocation2 + $0x24c] ss:$16 sps:$4 sm:$0xff]  }
 0x392   :  { %5971 = vmatprep.subr.bf16.mxu1 %v8291_v1  ;;  %v2343_v1 = vsel %vm2306_vm6, %v2342_v5, %v2283_v51  ;;  %v8372_v55 = vld [vmem:[#allocation2 + $0x2c] ss:$16 sps:$4 sm:$0xff]   ;;  %v8370_v5 = vld [vmem:[#allocation2 + $0x28] ss:$16 sps:$4 sm:$0xff]  }
 0x393   :  { %v8375_v51 = vld [vmem:[#allocation2 + $0x22c] ss:$16 sps:$4 sm:$0xff]  }
 0x394   :  { %5931 = vmatpush2.bf16.msra.mxu0 %v8286_v62  ;;  %v8336_v62 = vld [vmem:[#allocation2 + $0xec] ss:$16 sps:$4 sm:$0xff]  }
 0x395   :  { %5972 = vmatpush2.bf16.msra.mxu1 %v8289_v14  ;;  %5932 = vmatprep.subr.bf16.mxu0 %v8294_v8  ;;  %v8339_v14 = vld [vmem:[#allocation2 + $0x2ec] ss:$16 sps:$4 sm:$0xff]   ;;  %v8334_v8 = vld [vmem:[#allocation2 + $0xe8] ss:$16 sps:$4 sm:$0xff]  }
 0x396   :  { %5973 = vmatprep.subr.bf16.mxu1 %v8297_v63  ;;  %v8337_v63 = vld [vmem:[#allocation2 + $0x2e8] ss:$16 sps:$4 sm:$0xff]  }
 0x398   :  { %5933 = vmatpush2.bf16.msra.mxu0 %v8292_v19  ;;  %v9560_v19 = vpack.c.b16 %v2339_v38, %v2339_v38  ;;  %v8379_v38 = vld [vmem:[#allocation2 + $0x208] ss:$16 sps:$4 sm:$0xff]  }
 0x399   :  { %5974 = vmatpush2.bf16.msra.mxu1 %v8295_v21  ;;  %5934 = vmatprep.subr.bf16.mxu0 %v8300_v37  ;;  %v9562_v21 = vpack.c.b16 %v2343_v1, %v2343_v1  ;;  %v8342_v37 = vld [vmem:[#allocation2 + $0xcc] ss:$16 sps:$4 sm:$0xff]  }
 0x39a   :  { %5975 = vmatprep.subr.bf16.mxu1 %v8303_v43  ;;  %v8345_v43 = vld [vmem:[#allocation2 + $0x2cc] ss:$16 sps:$4 sm:$0xff]  }
 0x39b   :  { %v8384_v1 = vld [vmem:[#allocation2 + $0x1ec] ss:$16 sps:$4 sm:$0xff]  }
 0x39c   :  { %5935 = vmatpush2.bf16.msra.mxu0 %v8298_v40  ;;  %v8340_v40 = vld [vmem:[#allocation2 + $0xc8] ss:$16 sps:$4 sm:$0xff]  }
 0x39d   :  { %5976 = vmatpush2.bf16.msra.mxu1 %v8301_v48  ;;  %5936 = vmatprep.subr.bf16.mxu0 %v8306_v12  ;;  %v8343_v48 = vld [vmem:[#allocation2 + $0x2c8] ss:$16 sps:$4 sm:$0xff]  }
 0x39e   :  { %5977 = vmatprep.subr.bf16.mxu1 %v8309_v32 }
 0x3a0   :  { %5937 = vmatpush2.bf16.msra.mxu0 %v8304_v59 }
 0x3a1   :  { %5978 = vmatpush2.bf16.msra.mxu1 %v8307_v61  ;;  %5938 = vmatprep.subr.bf16.mxu0 %v8312_v39 }
 0x3a2   :  { %5979 = vmatprep.subr.bf16.mxu1 %v8315_v13  ;;  %v8348_v13 = vld [vmem:[#allocation2 + $0xac] ss:$16 sps:$4 sm:$0xff]  }
 0x3a4   :  { %5939 = vmatpush2.bf16.msra.mxu0 %v8310_v25 }
 0x3a5   :  { %5980 = vmatpush2.bf16.msra.mxu1 %v8313_v4  ;;  %5940 = vmatprep.subr.bf16.mxu0 %v8318_v16  ;;  %v8349_v16 = vld [vmem:[#allocation2 + $0x2a8] ss:$16 sps:$4 sm:$0xff]  }
 0x3a6   :  { %5981 = vmatprep.subr.bf16.mxu1 %v8321_v11 }
 0x3a8   :  { %5941 = vmatpush2.bf16.msra.mxu0 %v8316_v41 }
 0x3a9   :  { %5982 = vmatpush2.bf16.msra.mxu1 %v8319_v28  ;;  %5942 = vmatprep.subr.bf16.mxu0 %v8324_v56  ;;  %v8361_v56 = vld [vmem:[#allocation2 + $0x268] ss:$16 sps:$4 sm:$0xff]  }
 0x3aa   :  { %5983 = vmatprep.subr.bf16.mxu1 %v8327_v17  ;;  %v8366_v17 = vld [vmem:[#allocation2 + $0x4c] ss:$16 sps:$4 sm:$0xff]  }
 0x3ac   :  { %5943 = vmatpush2.bf16.msra.mxu0 %v8322_v54  ;;  %v8364_v54 = vld [vmem:[#allocation2 + $0x48] ss:$16 sps:$4 sm:$0xff]  }
 0x3ad   :  { %5984 = vmatpush2.bf16.msra.mxu1 %v8325_v58  ;;  %5944 = vmatprep.subr.bf16.mxu0 %v8330_v6  ;;  %v8367_v58 = vld [vmem:[#allocation2 + $0x248] ss:$16 sps:$4 sm:$0xff]  }
 0x3ae   :  { %5985 = vmatprep.subr.bf16.mxu1 %v8333_v0  ;;  %v8373_v6 = vld [vmem:[#allocation2 + $0x228] ss:$16 sps:$4 sm:$0xff]   ;;  %v8378_v0 = vld [vmem:[#allocation2 + $0xc] ss:$16 sps:$4 sm:$0xff]  }
 0x3b0   :  { %5945 = vmatpush2.bf16.msra.mxu0 %v8328_v49  ;;  %v8381_v49 = vld [vmem:[#allocation2 + $0x20c] ss:$16 sps:$4 sm:$0xff]  }
 0x3b1   :  { %5986 = vmatpush2.bf16.msra.mxu1 %v8331_v57  ;;  %5996 = vmatprep.subr.bf16.mxu0 %v8336_v62  ;;  %v8376_v57 = vld [vmem:[#allocation2 + $0x8] ss:$16 sps:$4 sm:$0xff]   ;;  %v8387_v62 = vld [vmem:[#allocation2 + $0x3ec] ss:$16 sps:$4 sm:$0xff]  }
 0x3b2   :  { %6037 = vmatprep.subr.bf16.mxu1 %v8339_v14  ;;  %v8382_v14 = vld [vmem:[#allocation2 + $0x1e8] ss:$16 sps:$4 sm:$0xff]  }
 0x3b3   :  { %v5702_v12 = vpop.f32.mrf.mxu0  ;;  %5947 = vmatmul.mubr.bf16.vlgmr.msra.gmra.mxu0 %v9560_v19 }
 0x3b4   :  { %v5743_v32 = vpop.f32.mrf.mxu1  ;;  %5988 = vmatmul.mubr.bf16.vlgmr.msra.gmra.mxu1 %v9562_v21  ;;  %v5703_v59 = vadd.f32 %v5702_v12, %v9542_v22  ;;  %5997 = vmatpush1.bf16.msra.mxu0 %v8334_v8  ;;  %v8385_v8 = vld [vmem:[#allocation2 + $0x3e8] ss:$16 sps:$4 sm:$0xff]   ;;  %v8399_v12 = vld [vmem:[#allocation2 + $0x3ac] ss:$16 sps:$4 sm:$0xff]  }
 0x3b5   :  { %6038 = vmatpush1.bf16.msra.mxu1 %v8337_v63  ;;  %v5704_v61 = vpop.f32.mrf.mxu0  ;;  %5998 = vmatprep.subr.bf16.mxu0 %v8342_v37  ;;  %v8390_v63 = vld [vmem:[#allocation2 + $0x1cc] ss:$16 sps:$4 sm:$0xff]  }
 0x3b6   :  { %v5745_v39 = vpop.f32.mrf.mxu1  ;;  %6039 = vmatprep.subr.bf16.mxu1 %v8345_v43  ;;  %v9567_v25 = vadd.f32 %v5743_v32, %v5703_v59  ;;  %v5705_v4 = vadd.f32 %v5704_v61, %v9546_v2  ;;  %6028 = vmatprep.mubr.bf16.mxu0 %v9379_v27  ;;  %v8352_v2 = vld [vmem:[#allocation2 + $0x88] ss:$16 sps:$4 sm:$0xff]   ;;  %v8360_v27 = vld [vmem:[#allocation2 + $0x6c] ss:$16 sps:$4 sm:$0xff]  }
 0x3b7   :  { %6069 = vmatprep.mubr.bf16.mxu1 %v9382_v31  ;;  %v5706_v11 = vpop.f32.mrf.mxu0  ;;  %v8363_v31 = vld [vmem:[#allocation2 + $0x26c] ss:$16 sps:$4 sm:$0xff]   ;;  %v8388_v43 = vld [vmem:[#allocation2 + $0x1c8] ss:$16 sps:$4 sm:$0xff]  }
 0x3b8   :  { %v5747_v22 = vpop.f32.mrf.mxu1  ;;  %v9572_v7 = vadd.f32 %v5745_v39, %v5705_v4  ;;  %5999 = vmatpush1.bf16.msra.mxu0 %v8340_v40  ;;  %v8393_v37 = vld [vmem:[#allocation2 + $0x3cc] ss:$16 sps:$4 sm:$0xff]   ;;  %v8391_v40 = vld [vmem:[#allocation2 + $0x3c8] ss:$16 sps:$4 sm:$0xff]  }
 0x3b9   :  { %6040 = vmatpush1.bf16.msra.mxu1 %v8343_v48  ;;  %v5707_v41 = vpop.f32.mrf.mxu0  ;;  %6000 = vmatprep.subr.bf16.mxu0 %v8348_v13  ;;  %v8396_v48 = vld [vmem:[#allocation2 + $0x1ac] ss:$16 sps:$4 sm:$0xff]   ;;  %v8394_v32 = vld [vmem:[#allocation2 + $0x1a8] ss:$16 sps:$4 sm:$0xff]  }
 0x3ba   :  { %v5748_v28 = vpop.f32.mrf.mxu1  ;;  %6041 = vmatprep.subr.bf16.mxu1 %v8351_v46  ;;  %v8397_v59 = vld [vmem:[#allocation2 + $0x3a8] ss:$16 sps:$4 sm:$0xff]   ;;  %v8402_v61 = vld [vmem:[#allocation2 + $0x18c] ss:$16 sps:$4 sm:$0xff]  }
 0x3bb   :  { %v8405_v39 = vld [vmem:[#allocation2 + $0x38c] ss:$16 sps:$4 sm:$0xff]   ;;  %v8400_v13 = vld [vmem:[#allocation2 + $0x188] ss:$16 sps:$4 sm:$0xff]  }
 0x3bc   :  { %6001 = vmatpush1.bf16.msra.mxu0 %v8346_v29  ;;  %v8403_v46 = vld [vmem:[#allocation2 + $0x388] ss:$16 sps:$4 sm:$0xff]   ;;  %v8408_v4 = vld [vmem:[#allocation2 + $0x16c] ss:$16 sps:$4 sm:$0xff]  }
 0x3bd   :  { %6042 = vmatpush1.bf16.msra.mxu1 %v8349_v16  ;;  %6002 = vmatprep.subr.bf16.mxu0 %v8354_v50  ;;  %v8411_v29 = vld [vmem:[#allocation2 + $0x36c] ss:$16 sps:$4 sm:$0xff]   ;;  %v8406_v16 = vld [vmem:[#allocation2 + $0x168] ss:$16 sps:$4 sm:$0xff]  }
 0x3be   :  { %6043 = vmatprep.subr.bf16.mxu1 %v8357_v47  ;;  %v8409_v11 = vld [vmem:[#allocation2 + $0x368] ss:$16 sps:$4 sm:$0xff]   ;;  %v8414_v22 = vld [vmem:[#allocation2 + $0x14c] ss:$16 sps:$4 sm:$0xff]  }
 0x3bf   :  { %v8417_v41 = vld [vmem:[#allocation2 + $0x34c] ss:$16 sps:$4 sm:$0xff]   ;;  %v8412_v28 = vld [vmem:[#allocation2 + $0x148] ss:$16 sps:$4 sm:$0xff]  }
 0x3c0   :  { %6003 = vmatpush1.bf16.msra.mxu0 %v8352_v2  ;;  %v8415_v50 = vld [vmem:[#allocation2 + $0x348] ss:$16 sps:$4 sm:$0xff]   ;;  %v8420_v47 = vld [vmem:[#allocation2 + $0x12c] ss:$16 sps:$4 sm:$0xff]  }
 0x3c1   :  { %6044 = vmatpush1.bf16.msra.mxu1 %v8355_v36  ;;  %6004 = vmatprep.subr.bf16.mxu0 %v8360_v27  ;;  %v8423_v2 = vld [vmem:[#allocation2 + $0x32c] ss:$16 sps:$4 sm:$0xff]   ;;  %v8418_v36 = vld [vmem:[#allocation2 + $0x128] ss:$16 sps:$4 sm:$0xff]  }
 0x3c2   :  { %6045 = vmatprep.subr.bf16.mxu1 %v8363_v31  ;;  %v8421_v27 = vld [vmem:[#allocation2 + $0x328] ss:$16 sps:$4 sm:$0xff]   ;;  %v8426_v31 = vld [vmem:[#allocation2 + $0x10c] ss:$16 sps:$4 sm:$0xff]  }
 0x3c4   :  { %6005 = vmatpush1.bf16.msra.mxu0 %v8358_v20  ;;  %v8429_v20 = vld [vmem:[#allocation2 + $0x30c] ss:$16 sps:$4 sm:$0xff]  }
 0x3c5   :  { %6046 = vmatpush1.bf16.msra.mxu1 %v8361_v56  ;;  %6006 = vmatprep.subr.bf16.mxu0 %v8366_v17  ;;  %v8424_v56 = vld [vmem:[#allocation2 + $0x108] ss:$16 sps:$4 sm:$0xff]  }
 0x3c6   :  { %6047 = vmatprep.subr.bf16.mxu1 %v8369_v26  ;;  %v8427_v17 = vld [vmem:[#allocation2 + $0x308] ss:$16 sps:$4 sm:$0xff]   ;;  %v8432_v26 = vld [vmem:[#allocation2 + $0x4ec] ss:$16 sps:$4 sm:$0xff]  }
 0x3c8   :  { %6007 = vmatpush1.bf16.msra.mxu0 %v8364_v54  ;;  %v8435_v54 = vld [vmem:[#allocation2 + $0x6ec] ss:$16 sps:$4 sm:$0xff]  }
 0x3c9   :  { %6048 = vmatpush1.bf16.msra.mxu1 %v8367_v58  ;;  %6008 = vmatprep.subr.bf16.mxu0 %v8372_v55  ;;  %v8430_v58 = vld [vmem:[#allocation2 + $0x4e8] ss:$16 sps:$4 sm:$0xff]  }
 0x3ca   :  { %6049 = vmatprep.subr.bf16.mxu1 %v8375_v51  ;;  %v8433_v55 = vld [vmem:[#allocation2 + $0x6e8] ss:$16 sps:$4 sm:$0xff]   ;;  %v8438_v51 = vld [vmem:[#allocation2 + $0x4cc] ss:$16 sps:$4 sm:$0xff]  }
 0x3cc   :  { %6009 = vmatpush1.bf16.msra.mxu0 %v8370_v5  ;;  %v8441_v5 = vld [vmem:[#allocation2 + $0x6cc] ss:$16 sps:$4 sm:$0xff]  }
 0x3cd   :  { %6050 = vmatpush1.bf16.msra.mxu1 %v8373_v6  ;;  %6010 = vmatprep.subr.bf16.mxu0 %v8378_v0  ;;  %v8436_v6 = vld [vmem:[#allocation2 + $0x4c8] ss:$16 sps:$4 sm:$0xff]  }
 0x3ce   :  { %6051 = vmatprep.subr.bf16.mxu1 %v8381_v49  ;;  %v8439_v0 = vld [vmem:[#allocation2 + $0x6c8] ss:$16 sps:$4 sm:$0xff]  }
 0x3d0   :  { %6011 = vmatpush1.bf16.msra.mxu0 %v8376_v57 }
 0x3d1   :  { %6052 = vmatpush1.bf16.msra.mxu1 %v8379_v38  ;;  %6012 = vmatprep.subr.bf16.mxu0 %v8384_v1 }
 0x3d2   :  { %6053 = vmatprep.subr.bf16.mxu1 %v8387_v62 }
 0x3d4   :  { %6013 = vmatpush2.bf16.msra.mxu0 %v8382_v14  ;;  %v8444_v14 = vld [vmem:[#allocation2 + $0x4ac] ss:$16 sps:$4 sm:$0xff]  }
 0x3d5   :  { %6054 = vmatpush2.bf16.msra.mxu1 %v8385_v8  ;;  %6014 = vmatprep.subr.bf16.mxu0 %v8390_v63  ;;  %v8447_v8 = vld [vmem:[#allocation2 + $0x6ac] ss:$16 sps:$4 sm:$0xff]  }
 0x3d6   :  { %6055 = vmatprep.subr.bf16.mxu1 %v8393_v37 }
 0x3d8   :  { %6015 = vmatpush2.bf16.msra.mxu0 %v8388_v43  ;;  %v8442_v43 = vld [vmem:[#allocation2 + $0x4a8] ss:$16 sps:$4 sm:$0xff]  }
 0x3d9   :  { %6056 = vmatpush2.bf16.msra.mxu1 %v8391_v40  ;;  %6016 = vmatprep.subr.bf16.mxu0 %v8396_v48  ;;  %v8445_v40 = vld [vmem:[#allocation2 + $0x6a8] ss:$16 sps:$4 sm:$0xff]  }
 0x3da   :  { %6057 = vmatprep.subr.bf16.mxu1 %v8399_v12 }
 0x3dc   :  { %6017 = vmatpush2.bf16.msra.mxu0 %v8394_v32  ;;  %v8450_v32 = vld [vmem:[#allocation2 + $0x48c] ss:$16 sps:$4 sm:$0xff]  }
 0x3dd   :  { %6058 = vmatpush2.bf16.msra.mxu1 %v8397_v59  ;;  %6018 = vmatprep.subr.bf16.mxu0 %v8402_v61  ;;  %v8453_v59 = vld [vmem:[#allocation2 + $0x68c] ss:$16 sps:$4 sm:$0xff]   ;;  %v8451_v61 = vld [vmem:[#allocation2 + $0x688] ss:$16 sps:$4 sm:$0xff]  }
 0x3de   :  { %6059 = vmatprep.subr.bf16.mxu1 %v8405_v39  ;;  %v8454_v39 = vld [vmem:[#allocation2 + $0x468] ss:$16 sps:$4 sm:$0xff]  }
 0x3e0   :  { %6019 = vmatpush2.bf16.msra.mxu0 %v8400_v13  ;;  %v8457_v13 = vld [vmem:[#allocation2 + $0x668] ss:$16 sps:$4 sm:$0xff]  }
 0x3e1   :  { %6060 = vmatpush2.bf16.msra.mxu1 %v8403_v46  ;;  %6020 = vmatprep.subr.bf16.mxu0 %v8408_v4  ;;  %v8462_v46 = vld [vmem:[#allocation2 + $0x44c] ss:$16 sps:$4 sm:$0xff]  }
 0x3e2   :  { %6061 = vmatprep.subr.bf16.mxu1 %v8411_v29  ;;  %v8465_v4 = vld [vmem:[#allocation2 + $0x64c] ss:$16 sps:$4 sm:$0xff]   ;;  %v8460_v29 = vld [vmem:[#allocation2 + $0x448] ss:$16 sps:$4 sm:$0xff]  }
 0x3e4   :  { %6021 = vmatpush2.bf16.msra.mxu0 %v8406_v16  ;;  %v8463_v16 = vld [vmem:[#allocation2 + $0x648] ss:$16 sps:$4 sm:$0xff]  }
 0x3e5   :  { %6062 = vmatpush2.bf16.msra.mxu1 %v8409_v11  ;;  %6022 = vmatprep.subr.bf16.mxu0 %v8414_v22  ;;  %v8468_v11 = vld [vmem:[#allocation2 + $0x42c] ss:$16 sps:$4 sm:$0xff]  }
 0x3e6   :  { %6063 = vmatprep.subr.bf16.mxu1 %v8417_v41  ;;  %v8471_v22 = vld [vmem:[#allocation2 + $0x62c] ss:$16 sps:$4 sm:$0xff]   ;;  %v8466_v41 = vld [vmem:[#allocation2 + $0x428] ss:$16 sps:$4 sm:$0xff]  }
 0x3e8   :  { %6023 = vmatpush2.bf16.msra.mxu0 %v8412_v28  ;;  %v8469_v28 = vld [vmem:[#allocation2 + $0x628] ss:$16 sps:$4 sm:$0xff]  }
 0x3e9   :  { %6064 = vmatpush2.bf16.msra.mxu1 %v8415_v50  ;;  %6024 = vmatprep.subr.bf16.mxu0 %v8420_v47  ;;  %v8474_v50 = vld [vmem:[#allocation2 + $0x40c] ss:$16 sps:$4 sm:$0xff]  }
 0x3ea   :  { %6065 = vmatprep.subr.bf16.mxu1 %v8423_v2  ;;  %v8477_v47 = vld [vmem:[#allocation2 + $0x60c] ss:$16 sps:$4 sm:$0xff]   ;;  %v8472_v2 = vld [vmem:[#allocation2 + $0x408] ss:$16 sps:$4 sm:$0xff]  }
 0x3ec   :  { %6025 = vmatpush2.bf16.msra.mxu0 %v8418_v36  ;;  %v8475_v36 = vld [vmem:[#allocation2 + $0x608] ss:$16 sps:$4 sm:$0xff]  }
 0x3ed   :  { %6066 = vmatpush2.bf16.msra.mxu1 %v8421_v27  ;;  %6026 = vmatprep.subr.bf16.mxu0 %v8426_v31  ;;  %v8480_v27 = vld [vmem:[#allocation2 + $0x5ec] ss:$16 sps:$4 sm:$0xff]  }
 0x3ee   :  { %6067 = vmatprep.subr.bf16.mxu1 %v8429_v20  ;;  %v8483_v31 = vld [vmem:[#allocation2 + $0x7ec] ss:$16 sps:$4 sm:$0xff]   ;;  %v8478_v20 = vld [vmem:[#allocation2 + $0x5e8] ss:$16 sps:$4 sm:$0xff]  }
 0x3f0   :  { %6027 = vmatpush2.bf16.msra.mxu0 %v8424_v56  ;;  %v8481_v56 = vld [vmem:[#allocation2 + $0x7e8] ss:$16 sps:$4 sm:$0xff]  }
 0x3f1   :  { %6068 = vmatpush2.bf16.msra.mxu1 %v8427_v17  ;;  %6078 = vmatprep.subr.bf16.mxu0 %v8432_v26  ;;  %v8486_v17 = vld [vmem:[#allocation2 + $0x5cc] ss:$16 sps:$4 sm:$0xff]  }
 0x3f2   :  { %6119 = vmatprep.subr.bf16.mxu1 %v8435_v54  ;;  %v8489_v26 = vld [vmem:[#allocation2 + $0x7cc] ss:$16 sps:$4 sm:$0xff]   ;;  %v8484_v54 = vld [vmem:[#allocation2 + $0x5c8] ss:$16 sps:$4 sm:$0xff]  }
 0x3f3   :  { %v5784_v49 = vpop.f32.mrf.mxu0  ;;  %6029 = vmatmul.mubr.bf16.vlgmr.msra.gmra.mxu0 %v9410_v24 }
 0x3f4   :  { %v5825_v57 = vpop.f32.mrf.mxu1  ;;  %6070 = vmatmul.mubr.bf16.vlgmr.msra.gmra.mxu1 %v9412_v23  ;;  %v5785_v38 = vadd.f32 %v5784_v49, %v9567_v25  ;;  %6079 = vmatpush1.bf16.msra.mxu0 %v8430_v58  ;;  %v8487_v58 = vld [vmem:[#allocation2 + $0x7c8] ss:$16 sps:$4 sm:$0xff]   ;;  %v8501_v49 = vld [vmem:[#allocation2 + $0x78c] ss:$16 sps:$4 sm:$0xff]  }
 0x3f5   :  { %6120 = vmatpush1.bf16.msra.mxu1 %v8433_v55  ;;  %v5786_v1 = vpop.f32.mrf.mxu0  ;;  %6080 = vmatprep.subr.bf16.mxu0 %v8438_v51  ;;  %v8492_v55 = vld [vmem:[#allocation2 + $0x5ac] ss:$16 sps:$4 sm:$0xff]  }
 0x3f6   :  { %v5827_v62 = vpop.f32.mrf.mxu1  ;;  %6121 = vmatprep.subr.bf16.mxu1 %v8441_v5  ;;  %v9577_v63 = vadd.f32 %v5825_v57, %v5785_v38  ;;  %v5787_v37 = vadd.f32 %v5786_v1, %v9572_v7  ;;  %6110 = vmatprep.mubr.bf16.mxu0 %v9416_v35  ;;  %v8448_v7 = vld [vmem:[#allocation2 + $0x488] ss:$16 sps:$4 sm:$0xff]   ;;  %v8456_v35 = vld [vmem:[#allocation2 + $0x46c] ss:$16 sps:$4 sm:$0xff]  }
 0x3f7   :  { %6151 = vmatprep.mubr.bf16.mxu1 %v9418_v44  ;;  %v5788_v24 = vpop.f32.mrf.mxu0  ;;  %v8459_v44 = vld [vmem:[#allocation2 + $0x66c] ss:$16 sps:$4 sm:$0xff]   ;;  %v8490_v5 = vld [vmem:[#allocation2 + $0x5a8] ss:$16 sps:$4 sm:$0xff]  }
 0x3f8   :  { %v5829_v23 = vpop.f32.mrf.mxu1  ;;  %v9582_v25 = vadd.f32 %v5827_v62, %v5787_v37  ;;  %6081 = vmatpush1.bf16.msra.mxu0 %v8436_v6  ;;  %v8495_v51 = vld [vmem:[#allocation2 + $0x7ac] ss:$16 sps:$4 sm:$0xff]   ;;  %v8493_v6 = vld [vmem:[#allocation2 + $0x7a8] ss:$16 sps:$4 sm:$0xff]  }
 0x3f9   :  { %6122 = vmatpush1.bf16.msra.mxu1 %v8439_v0  ;;  %v5789_v48 = vpop.f32.mrf.mxu0  ;;  %6082 = vmatprep.subr.bf16.mxu0 %v8444_v14  ;;  %v8498_v0 = vld [vmem:[#allocation2 + $0x58c] ss:$16 sps:$4 sm:$0xff]   ;;  %v8496_v57 = vld [vmem:[#allocation2 + $0x588] ss:$16 sps:$4 sm:$0xff]  }
 0x3fa   :  { %v5830_v12 = vpop.f32.mrf.mxu1  ;;  %6123 = vmatprep.subr.bf16.mxu1 %v8447_v8  ;;  %v8499_v38 = vld [vmem:[#allocation2 + $0x788] ss:$16 sps:$4 sm:$0xff]   ;;  %v8504_v1 = vld [vmem:[#allocation2 + $0x56c] ss:$16 sps:$4 sm:$0xff]  }
 0x3fb   :  { %v8507_v62 = vld [vmem:[#allocation2 + $0x76c] ss:$16 sps:$4 sm:$0xff]   ;;  %v8502_v14 = vld [vmem:[#allocation2 + $0x568] ss:$16 sps:$4 sm:$0xff]  }
 0x3fc   :  { %6083 = vmatpush1.bf16.msra.mxu0 %v8442_v43  ;;  %v8505_v8 = vld [vmem:[#allocation2 + $0x768] ss:$16 sps:$4 sm:$0xff]   ;;  %v8510_v37 = vld [vmem:[#allocation2 + $0x54c] ss:$16 sps:$4 sm:$0xff]  }
 0x3fd   :  { %6124 = vmatpush1.bf16.msra.mxu1 %v8445_v40  ;;  %6084 = vmatprep.subr.bf16.mxu0 %v8450_v32  ;;  %v8513_v43 = vld [vmem:[#allocation2 + $0x74c] ss:$16 sps:$4 sm:$0xff]   ;;  %v8508_v40 = vld [vmem:[#allocation2 + $0x548] ss:$16 sps:$4 sm:$0xff]  }
 0x3fe   :  { %6125 = vmatprep.subr.bf16.mxu1 %v8453_v59  ;;  %v8511_v24 = vld [vmem:[#allocation2 + $0x748] ss:$16 sps:$4 sm:$0xff]   ;;  %v8516_v23 = vld [vmem:[#allocation2 + $0x52c] ss:$16 sps:$4 sm:$0xff]  }
 0x3ff   :  { %v8519_v48 = vld [vmem:[#allocation2 + $0x72c] ss:$16 sps:$4 sm:$0xff]   ;;  %v8514_v12 = vld [vmem:[#allocation2 + $0x528] ss:$16 sps:$4 sm:$0xff]  }
 0x400   :  { %6085 = vmatpush1.bf16.msra.mxu0 %v8448_v7  ;;  %v8517_v32 = vld [vmem:[#allocation2 + $0x728] ss:$16 sps:$4 sm:$0xff]   ;;  %v8522_v59 = vld [vmem:[#allocation2 + $0x50c] ss:$16 sps:$4 sm:$0xff]  }
 0x401   :  { %6126 = vmatpush1.bf16.msra.mxu1 %v8451_v61  ;;  %6086 = vmatprep.subr.bf16.mxu0 %v8456_v35  ;;  %v8525_v7 = vld [vmem:[#allocation2 + $0x70c] ss:$16 sps:$4 sm:$0xff]   ;;  %v8520_v61 = vld [vmem:[#allocation2 + $0x508] ss:$16 sps:$4 sm:$0xff]  }
 0x402   :  { %6127 = vmatprep.subr.bf16.mxu1 %v8459_v44  ;;  %v8523_v35 = vld [vmem:[#allocation2 + $0x708] ss:$16 sps:$4 sm:$0xff]   ;;  %v8528_v44 = vld [vmem:[#allocation2 + $0x8ec] ss:$16 sps:$4 sm:$0xff]  }
 0x404   :  { %6087 = vmatpush1.bf16.msra.mxu0 %v8454_v39  ;;  %v8531_v39 = vld [vmem:[#allocation2 + $0xaec] ss:$16 sps:$4 sm:$0xff]  }
 0x405   :  { %6128 = vmatpush1.bf16.msra.mxu1 %v8457_v13  ;;  %6088 = vmatprep.subr.bf16.mxu0 %v8462_v46  ;;  %v8526_v13 = vld [vmem:[#allocation2 + $0x8e8] ss:$16 sps:$4 sm:$0xff]  }
 0x406   :  { %6129 = vmatprep.subr.bf16.mxu1 %v8465_v4  ;;  %v8529_v46 = vld [vmem:[#allocation2 + $0xae8] ss:$16 sps:$4 sm:$0xff]   ;;  %v8534_v4 = vld [vmem:[#allocation2 + $0x8cc] ss:$16 sps:$4 sm:$0xff]  }
 0x408   :  { %6089 = vmatpush1.bf16.msra.mxu0 %v8460_v29  ;;  %v8537_v29 = vld [vmem:[#allocation2 + $0xacc] ss:$16 sps:$4 sm:$0xff]  }
 0x409   :  { %6130 = vmatpush1.bf16.msra.mxu1 %v8463_v16  ;;  %6090 = vmatprep.subr.bf16.mxu0 %v8468_v11 }
 0x40a   :  { %6131 = vmatprep.subr.bf16.mxu1 %v8471_v22 }
 0x40c   :  { %6091 = vmatpush1.bf16.msra.mxu0 %v8466_v41  ;;  %v8532_v41 = vld [vmem:[#allocation2 + $0x8c8] ss:$16 sps:$4 sm:$0xff]  }
 0x40d   :  { %6132 = vmatpush1.bf16.msra.mxu1 %v8469_v28  ;;  %6092 = vmatprep.subr.bf16.mxu0 %v8474_v50  ;;  %v8535_v28 = vld [vmem:[#allocation2 + $0xac8] ss:$16 sps:$4 sm:$0xff]  }
 0x40e   :  { %6133 = vmatprep.subr.bf16.mxu1 %v8477_v47 }
 0x410   :  { %6093 = vmatpush1.bf16.msra.mxu0 %v8472_v2  ;;  %v8540_v2 = vld [vmem:[#allocation2 + $0x8ac] ss:$16 sps:$4 sm:$0xff]  }
 0x411   :  { %6134 = vmatpush1.bf16.msra.mxu1 %v8475_v36  ;;  %6094 = vmatprep.subr.bf16.mxu0 %v8480_v27  ;;  %v8543_v36 = vld [vmem:[#allocation2 + $0xaac] ss:$16 sps:$4 sm:$0xff]  }
 0x412   :  { %6135 = vmatprep.subr.bf16.mxu1 %v8483_v31 }
 0x414   :  { %6095 = vmatpush2.bf16.msra.mxu0 %v8478_v20  ;;  %v8538_v20 = vld [vmem:[#allocation2 + $0x8a8] ss:$16 sps:$4 sm:$0xff]  }
 0x415   :  { %6136 = vmatpush2.bf16.msra.mxu1 %v8481_v56  ;;  %6096 = vmatprep.subr.bf16.mxu0 %v8486_v17  ;;  %v8541_v56 = vld [vmem:[#allocation2 + $0xaa8] ss:$16 sps:$4 sm:$0xff]  }
 0x416   :  { %6137 = vmatprep.subr.bf16.mxu1 %v8489_v26 }
 0x418   :  { %6097 = vmatpush2.bf16.msra.mxu0 %v8484_v54  ;;  %v8546_v54 = vld [vmem:[#allocation2 + $0x88c] ss:$16 sps:$4 sm:$0xff]  }
 0x419   :  { %6138 = vmatpush2.bf16.msra.mxu1 %v8487_v58  ;;  %6098 = vmatprep.subr.bf16.mxu0 %v8492_v55  ;;  %v8549_v58 = vld [vmem:[#allocation2 + $0xa8c] ss:$16 sps:$4 sm:$0xff]  }
 0x41a   :  { %6139 = vmatprep.subr.bf16.mxu1 %v8495_v51  ;;  %v8555_v55 = vld [vmem:[#allocation2 + $0xa6c] ss:$16 sps:$4 sm:$0xff]   ;;  %v8550_v51 = vld [vmem:[#allocation2 + $0x868] ss:$16 sps:$4 sm:$0xff]  }
 0x41c   :  { %6099 = vmatpush2.bf16.msra.mxu0 %v8490_v5  ;;  %v8553_v5 = vld [vmem:[#allocation2 + $0xa68] ss:$16 sps:$4 sm:$0xff]  }
 0x41d   :  { %6140 = vmatpush2.bf16.msra.mxu1 %v8493_v6  ;;  %6100 = vmatprep.subr.bf16.mxu0 %v8498_v0  ;;  %v8558_v6 = vld [vmem:[#allocation2 + $0x84c] ss:$16 sps:$4 sm:$0xff]  }
 0x41e   :  { %6141 = vmatprep.subr.bf16.mxu1 %v8501_v49  ;;  %v8561_v0 = vld [vmem:[#allocation2 + $0xa4c] ss:$16 sps:$4 sm:$0xff]   ;;  %v8556_v49 = vld [vmem:[#allocation2 + $0x848] ss:$16 sps:$4 sm:$0xff]  }
 0x420   :  { %6101 = vmatpush2.bf16.msra.mxu0 %v8496_v57  ;;  %v8559_v57 = vld [vmem:[#allocation2 + $0xa48] ss:$16 sps:$4 sm:$0xff]  }
 0x421   :  { %6142 = vmatpush2.bf16.msra.mxu1 %v8499_v38  ;;  %6102 = vmatprep.subr.bf16.mxu0 %v8504_v1  ;;  %v8564_v38 = vld [vmem:[#allocation2 + $0x82c] ss:$16 sps:$4 sm:$0xff]  }
 0x422   :  { %6143 = vmatprep.subr.bf16.mxu1 %v8507_v62  ;;  %v8567_v1 = vld [vmem:[#allocation2 + $0xa2c] ss:$16 sps:$4 sm:$0xff]   ;;  %v8562_v62 = vld [vmem:[#allocation2 + $0x828] ss:$16 sps:$4 sm:$0xff]  }
 0x424   :  { %6103 = vmatpush2.bf16.msra.mxu0 %v8502_v14  ;;  %v8565_v14 = vld [vmem:[#allocation2 + $0xa28] ss:$16 sps:$4 sm:$0xff]  }
 0x425   :  { %6144 = vmatpush2.bf16.msra.mxu1 %v8505_v8  ;;  %6104 = vmatprep.subr.bf16.mxu0 %v8510_v37  ;;  %v8570_v8 = vld [vmem:[#allocation2 + $0x80c] ss:$16 sps:$4 sm:$0xff]  }
 0x426   :  { %6145 = vmatprep.subr.bf16.mxu1 %v8513_v43  ;;  %v8573_v37 = vld [vmem:[#allocation2 + $0xa0c] ss:$16 sps:$4 sm:$0xff]   ;;  %v8568_v43 = vld [vmem:[#allocation2 + $0x808] ss:$16 sps:$4 sm:$0xff]  }
 0x428   :  { %6105 = vmatpush2.bf16.msra.mxu0 %v8508_v40  ;;  %v8571_v40 = vld [vmem:[#allocation2 + $0xa08] ss:$16 sps:$4 sm:$0xff]  }
 0x429   :  { %6146 = vmatpush2.bf16.msra.mxu1 %v8511_v24  ;;  %6106 = vmatprep.subr.bf16.mxu0 %v8516_v23  ;;  %v8576_v24 = vld [vmem:[#allocation2 + $0x9ec] ss:$16 sps:$4 sm:$0xff]  }
 0x42a   :  { %6147 = vmatprep.subr.bf16.mxu1 %v8519_v48  ;;  %v8579_v23 = vld [vmem:[#allocation2 + $0xbec] ss:$16 sps:$4 sm:$0xff]   ;;  %v8574_v48 = vld [vmem:[#allocation2 + $0x9e8] ss:$16 sps:$4 sm:$0xff]  }
 0x42c   :  { %6107 = vmatpush2.bf16.msra.mxu0 %v8514_v12  ;;  %v8577_v12 = vld [vmem:[#allocation2 + $0xbe8] ss:$16 sps:$4 sm:$0xff]  }
 0x42d   :  { %6148 = vmatpush2.bf16.msra.mxu1 %v8517_v32  ;;  %6108 = vmatprep.subr.bf16.mxu0 %v8522_v59  ;;  %v8582_v32 = vld [vmem:[#allocation2 + $0x9cc] ss:$16 sps:$4 sm:$0xff]  }
 0x42e   :  { %6149 = vmatprep.subr.bf16.mxu1 %v8525_v7  ;;  %v8585_v59 = vld [vmem:[#allocation2 + $0xbcc] ss:$16 sps:$4 sm:$0xff]   ;;  %v8580_v7 = vld [vmem:[#allocation2 + $0x9c8] ss:$16 sps:$4 sm:$0xff]  }
 0x430   :  { %6109 = vmatpush2.bf16.msra.mxu0 %v8520_v61  ;;  %v8583_v61 = vld [vmem:[#allocation2 + $0xbc8] ss:$16 sps:$4 sm:$0xff]  }
 0x431   :  { %6150 = vmatpush2.bf16.msra.mxu1 %v8523_v35  ;;  %6160 = vmatprep.subr.bf16.mxu0 %v8528_v44  ;;  %v8588_v35 = vld [vmem:[#allocation2 + $0x9ac] ss:$16 sps:$4 sm:$0xff]  }
 0x432   :  { %6201 = vmatprep.subr.bf16.mxu1 %v8531_v39  ;;  %v8591_v44 = vld [vmem:[#allocation2 + $0xbac] ss:$16 sps:$4 sm:$0xff]   ;;  %v8586_v39 = vld [vmem:[#allocation2 + $0x9a8] ss:$16 sps:$4 sm:$0xff]  }
 0x433   :  { %v5866_v16 = vpop.f32.mrf.mxu0  ;;  %6111 = vmatmul.mubr.bf16.vlgmr.msra.gmra.mxu0 %v9450_v42 }
 0x434   :  { %v5907_v11 = vpop.f32.mrf.mxu1  ;;  %6152 = vmatmul.mubr.bf16.vlgmr.msra.gmra.mxu1 %v9452_v18  ;;  %v5867_v22 = vadd.f32 %v5866_v16, %v9577_v63  ;;  %6161 = vmatpush1.bf16.msra.mxu0 %v8526_v13  ;;  %v8589_v13 = vld [vmem:[#allocation2 + $0xba8] ss:$16 sps:$4 sm:$0xff]  }
 0x435   :  { %6202 = vmatpush1.bf16.msra.mxu1 %v8529_v46  ;;  %v5868_v50 = vpop.f32.mrf.mxu0  ;;  %6162 = vmatprep.subr.bf16.mxu0 %v8534_v4  ;;  %v8594_v46 = vld [vmem:[#allocation2 + $0x98c] ss:$16 sps:$4 sm:$0xff]   ;;  %v8595_v16 = vld [vmem:[#allocation2 + $0xb88] ss:$16 sps:$4 sm:$0xff]  }
 0x436   :  { %v5909_v47 = vpop.f32.mrf.mxu1  ;;  %6203 = vmatprep.subr.bf16.mxu1 %v8537_v29  ;;  %v9587_v27 = vadd.f32 %v5907_v11, %v5867_v22  ;;  %v5869_v31 = vadd.f32 %v5868_v50, %v9582_v25  ;;  %6192 = vmatprep.mubr.bf16.mxu0 %v9456_v34  ;;  %v8544_v25 = vld [vmem:[#allocation2 + $0x888] ss:$16 sps:$4 sm:$0xff]   ;;  %v8597_v4 = vld [vmem:[#allocation2 + $0xb8c] ss:$16 sps:$4 sm:$0xff]  }
 0x437   :  { %6233 = vmatprep.mubr.bf16.mxu1 %v9458_v45  ;;  %v5870_v42 = vpop.f32.mrf.mxu0  ;;  %v8547_v34 = vld [vmem:[#allocation2 + $0xa88] ss:$16 sps:$4 sm:$0xff]   ;;  %v8552_v45 = vld [vmem:[#allocation2 + $0x86c] ss:$16 sps:$4 sm:$0xff]  }
 0x438   :  { %v5911_v18 = vpop.f32.mrf.mxu1  ;;  %v9592_v63 = vadd.f32 %v5909_v47, %v5869_v31  ;;  %6163 = vmatpush1.bf16.msra.mxu0 %v8532_v41  ;;  %v8592_v29 = vld [vmem:[#allocation2 + $0x988] ss:$16 sps:$4 sm:$0xff]   ;;  %v8600_v11 = vld [vmem:[#allocation2 + $0x96c] ss:$16 sps:$4 sm:$0xff]  }
 0x439   :  { %6204 = vmatpush1.bf16.msra.mxu1 %v8535_v28  ;;  %v5871_v17 = vpop.f32.mrf.mxu0  ;;  %6164 = vmatprep.subr.bf16.mxu0 %v8540_v2  ;;  %v8603_v22 = vld [vmem:[#allocation2 + $0xb6c] ss:$16 sps:$4 sm:$0xff]   ;;  %v8598_v41 = vld [vmem:[#allocation2 + $0x968] ss:$16 sps:$4 sm:$0xff]  }
 0x43a   :  { %v5912_v26 = vpop.f32.mrf.mxu1  ;;  %6205 = vmatprep.subr.bf16.mxu1 %v8543_v36  ;;  %v8601_v28 = vld [vmem:[#allocation2 + $0xb68] ss:$16 sps:$4 sm:$0xff]   ;;  %v8606_v50 = vld [vmem:[#allocation2 + $0x94c] ss:$16 sps:$4 sm:$0xff]  }
 0x43b   :  { %v8609_v47 = vld [vmem:[#allocation2 + $0xb4c] ss:$16 sps:$4 sm:$0xff]   ;;  %v8604_v2 = vld [vmem:[#allocation2 + $0x948] ss:$16 sps:$4 sm:$0xff]  }
 0x43c   :  { %6165 = vmatpush1.bf16.msra.mxu0 %v8538_v20  ;;  %v8607_v36 = vld [vmem:[#allocation2 + $0xb48] ss:$16 sps:$4 sm:$0xff]   ;;  %v8612_v31 = vld [vmem:[#allocation2 + $0x92c] ss:$16 sps:$4 sm:$0xff]  }
 0x43d   :  { %6206 = vmatpush1.bf16.msra.mxu1 %v8541_v56  ;;  %6166 = vmatprep.subr.bf16.mxu0 %v8546_v54  ;;  %v8615_v42 = vld [vmem:[#allocation2 + $0xb2c] ss:$16 sps:$4 sm:$0xff]   ;;  %v8610_v18 = vld [vmem:[#allocation2 + $0x928] ss:$16 sps:$4 sm:$0xff]  }
 0x43e   :  { %6207 = vmatprep.subr.bf16.mxu1 %v8549_v58  ;;  %v8613_v20 = vld [vmem:[#allocation2 + $0xb28] ss:$16 sps:$4 sm:$0xff]   ;;  %v8618_v56 = vld [vmem:[#allocation2 + $0x90c] ss:$16 sps:$4 sm:$0xff]  }
 0x43f   :  { %v8621_v17 = vld [vmem:[#allocation2 + $0xb0c] ss:$16 sps:$4 sm:$0xff]   ;;  %v8616_v26 = vld [vmem:[#allocation2 + $0x908] ss:$16 sps:$4 sm:$0xff]  }
 0x440   :  { %6167 = vmatpush1.bf16.msra.mxu0 %v8544_v25  ;;  %v8619_v54 = vld [vmem:[#allocation2 + $0xb08] ss:$16 sps:$4 sm:$0xff]   ;;  %v8624_v58 = vld [vmem:[#allocation2 + $0xcec] ss:$16 sps:$4 sm:$0xff]  }
 0x441   :  { %6208 = vmatpush1.bf16.msra.mxu1 %v8547_v34  ;;  %6168 = vmatprep.subr.bf16.mxu0 %v8552_v45  ;;  %v8627_v25 = vld [vmem:[#allocation2 + $0xeec] ss:$16 sps:$4 sm:$0xff]   ;;  %v8622_v34 = vld [vmem:[#allocation2 + $0xce8] ss:$16 sps:$4 sm:$0xff]  }
 0x442   :  { %6209 = vmatprep.subr.bf16.mxu1 %v8555_v55  ;;  %v8625_v45 = vld [vmem:[#allocation2 + $0xee8] ss:$16 sps:$4 sm:$0xff]   ;;  %v8630_v55 = vld [vmem:[#allocation2 + $0xccc] ss:$16 sps:$4 sm:$0xff]  }
 0x444   :  { %6169 = vmatpush1.bf16.msra.mxu0 %v8550_v51  ;;  %v8633_v51 = vld [vmem:[#allocation2 + $0xecc] ss:$16 sps:$4 sm:$0xff]  }
 0x445   :  { %6210 = vmatpush1.bf16.msra.mxu1 %v8553_v5  ;;  %6170 = vmatprep.subr.bf16.mxu0 %v8558_v6 }
 0x446   :  { %6211 = vmatprep.subr.bf16.mxu1 %v8561_v0 }
 0x448   :  { %6171 = vmatpush1.bf16.msra.mxu0 %v8556_v49  ;;  %v8628_v49 = vld [vmem:[#allocation2 + $0xcc8] ss:$16 sps:$4 sm:$0xff]  }
 0x449   :  { %6212 = vmatpush1.bf16.msra.mxu1 %v8559_v57  ;;  %6172 = vmatprep.subr.bf16.mxu0 %v8564_v38  ;;  %v8631_v57 = vld [vmem:[#allocation2 + $0xec8] ss:$16 sps:$4 sm:$0xff]  }
 0x44a   :  { %6213 = vmatprep.subr.bf16.mxu1 %v8567_v1 }
 0x44c   :  { %6173 = vmatpush1.bf16.msra.mxu0 %v8562_v62  ;;  %v8636_v62 = vld [vmem:[#allocation2 + $0xcac] ss:$16 sps:$4 sm:$0xff]  }
 0x44d   :  { %6214 = vmatpush1.bf16.msra.mxu1 %v8565_v14  ;;  %6174 = vmatprep.subr.bf16.mxu0 %v8570_v8  ;;  %v8639_v14 = vld [vmem:[#allocation2 + $0xeac] ss:$16 sps:$4 sm:$0xff]  }
 0x44e   :  { %6215 = vmatprep.subr.bf16.mxu1 %v8573_v37 }
 0x450   :  { %6175 = vmatpush1.bf16.msra.mxu0 %v8568_v43  ;;  %v8634_v43 = vld [vmem:[#allocation2 + $0xca8] ss:$16 sps:$4 sm:$0xff]  }
 0x451   :  { %6216 = vmatpush1.bf16.msra.mxu1 %v8571_v40  ;;  %6176 = vmatprep.subr.bf16.mxu0 %v8576_v24  ;;  %v8637_v40 = vld [vmem:[#allocation2 + $0xea8] ss:$16 sps:$4 sm:$0xff]  }
 0x452   :  { %6217 = vmatprep.subr.bf16.mxu1 %v8579_v23 }
 0x454   :  { %6177 = vmatpush2.bf16.msra.mxu0 %v8574_v48  ;;  %v8642_v48 = vld [vmem:[#allocation2 + $0xc8c] ss:$16 sps:$4 sm:$0xff]  }
 0x455   :  { %6218 = vmatpush2.bf16.msra.mxu1 %v8577_v12  ;;  %6178 = vmatprep.subr.bf16.mxu0 %v8582_v32  ;;  %v8645_v12 = vld [vmem:[#allocation2 + $0xe8c] ss:$16 sps:$4 sm:$0xff]  }
 0x456   :  { %6219 = vmatprep.subr.bf16.mxu1 %v8585_v59  ;;  %v8651_v32 = vld [vmem:[#allocation2 + $0xe6c] ss:$16 sps:$4 sm:$0xff]   ;;  %v8646_v59 = vld [vmem:[#allocation2 + $0xc68] ss:$16 sps:$4 sm:$0xff]  }
 0x458   :  { %6179 = vmatpush2.bf16.msra.mxu0 %v8580_v7  ;;  %v8649_v7 = vld [vmem:[#allocation2 + $0xe68] ss:$16 sps:$4 sm:$0xff]  }
 0x459   :  { %6220 = vmatpush2.bf16.msra.mxu1 %v8583_v61  ;;  %6180 = vmatprep.subr.bf16.mxu0 %v8588_v35  ;;  %v8654_v61 = vld [vmem:[#allocation2 + $0xc4c] ss:$16 sps:$4 sm:$0xff]  }
 0x45a   :  { %6221 = vmatprep.subr.bf16.mxu1 %v8591_v44  ;;  %v8657_v35 = vld [vmem:[#allocation2 + $0xe4c] ss:$16 sps:$4 sm:$0xff]   ;;  %v8652_v44 = vld [vmem:[#allocation2 + $0xc48] ss:$16 sps:$4 sm:$0xff]  }
 0x45c   :  { %6181 = vmatpush2.bf16.msra.mxu0 %v8586_v39  ;;  %v8655_v39 = vld [vmem:[#allocation2 + $0xe48] ss:$16 sps:$4 sm:$0xff]  }
 0x45d   :  { %6222 = vmatpush2.bf16.msra.mxu1 %v8589_v13  ;;  %6182 = vmatprep.subr.bf16.mxu0 %v8594_v46  ;;  %v8660_v13 = vld [vmem:[#allocation2 + $0xc2c] ss:$16 sps:$4 sm:$0xff]  }
 0x45e   :  { %6223 = vmatprep.subr.bf16.mxu1 %v8597_v4  ;;  %v8663_v46 = vld [vmem:[#allocation2 + $0xe2c] ss:$16 sps:$4 sm:$0xff]   ;;  %v8658_v4 = vld [vmem:[#allocation2 + $0xc28] ss:$16 sps:$4 sm:$0xff]  }
 0x460   :  { %6183 = vmatpush2.bf16.msra.mxu0 %v8592_v29  ;;  %v8661_v29 = vld [vmem:[#allocation2 + $0xe28] ss:$16 sps:$4 sm:$0xff]  }
 0x461   :  { %6224 = vmatpush2.bf16.msra.mxu1 %v8595_v16  ;;  %6184 = vmatprep.subr.bf16.mxu0 %v8600_v11  ;;  %v8666_v16 = vld [vmem:[#allocation2 + $0xc0c] ss:$16 sps:$4 sm:$0xff]  }
 0x462   :  { %6225 = vmatprep.subr.bf16.mxu1 %v8603_v22  ;;  %v8669_v11 = vld [vmem:[#allocation2 + $0xe0c] ss:$16 sps:$4 sm:$0xff]   ;;  %v8664_v22 = vld [vmem:[#allocation2 + $0xc08] ss:$16 sps:$4 sm:$0xff]  }
 0x464   :  { %6185 = vmatpush2.bf16.msra.mxu0 %v8598_v41  ;;  %v8667_v41 = vld [vmem:[#allocation2 + $0xe08] ss:$16 sps:$4 sm:$0xff]  }
 0x465   :  { %6226 = vmatpush2.bf16.msra.mxu1 %v8601_v28  ;;  %6186 = vmatprep.subr.bf16.mxu0 %v8606_v50  ;;  %v8672_v28 = vld [vmem:[#allocation2 + $0xdec] ss:$16 sps:$4 sm:$0xff]  }
 0x466   :  { %6227 = vmatprep.subr.bf16.mxu1 %v8609_v47  ;;  %v8675_v50 = vld [vmem:[#allocation2 + $0xfec] ss:$16 sps:$4 sm:$0xff]   ;;  %v8670_v47 = vld [vmem:[#allocation2 + $0xde8] ss:$16 sps:$4 sm:$0xff]  }
 0x468   :  { %6187 = vmatpush2.bf16.msra.mxu0 %v8604_v2  ;;  %v8673_v2 = vld [vmem:[#allocation2 + $0xfe8] ss:$16 sps:$4 sm:$0xff]  }
 0x469   :  { %6228 = vmatpush2.bf16.msra.mxu1 %v8607_v36  ;;  %6188 = vmatprep.subr.bf16.mxu0 %v8612_v31  ;;  %v8678_v36 = vld [vmem:[#allocation2 + $0xdcc] ss:$16 sps:$4 sm:$0xff]  }
 0x46a   :  { %6229 = vmatprep.subr.bf16.mxu1 %v8615_v42  ;;  %v8681_v31 = vld [vmem:[#allocation2 + $0xfcc] ss:$16 sps:$4 sm:$0xff]   ;;  %v8676_v42 = vld [vmem:[#allocation2 + $0xdc8] ss:$16 sps:$4 sm:$0xff]  }
 0x46c   :  { %6189 = vmatpush2.bf16.msra.mxu0 %v8610_v18  ;;  %v8679_v18 = vld [vmem:[#allocation2 + $0xfc8] ss:$16 sps:$4 sm:$0xff]  }
 0x46d   :  { %6230 = vmatpush2.bf16.msra.mxu1 %v8613_v20  ;;  %6190 = vmatprep.subr.bf16.mxu0 %v8618_v56  ;;  %v8684_v20 = vld [vmem:[#allocation2 + $0xdac] ss:$16 sps:$4 sm:$0xff]  }
 0x46e   :  { %6231 = vmatprep.subr.bf16.mxu1 %v8621_v17  ;;  %v8687_v56 = vld [vmem:[#allocation2 + $0xfac] ss:$16 sps:$4 sm:$0xff]   ;;  %v8682_v17 = vld [vmem:[#allocation2 + $0xda8] ss:$16 sps:$4 sm:$0xff]  }
 0x470   :  { %6191 = vmatpush2.bf16.msra.mxu0 %v8616_v26  ;;  %v8685_v26 = vld [vmem:[#allocation2 + $0xfa8] ss:$16 sps:$4 sm:$0xff]  }
 0x471   :  { %6232 = vmatpush2.bf16.msra.mxu1 %v8619_v54  ;;  %6242 = vmatprep.subr.bf16.mxu0 %v8624_v58  ;;  %v8690_v54 = vld [vmem:[#allocation2 + $0xd8c] ss:$16 sps:$4 sm:$0xff]  }
 0x472   :  { %6283 = vmatprep.subr.bf16.mxu1 %v8627_v25  ;;  %v8693_v58 = vld [vmem:[#allocation2 + $0xf8c] ss:$16 sps:$4 sm:$0xff]   ;;  %v8688_v25 = vld [vmem:[#allocation2 + $0xd88] ss:$16 sps:$4 sm:$0xff]  }
 0x473   :  { %v5948_v5 = vpop.f32.mrf.mxu0  ;;  %6193 = vmatmul.mubr.bf16.vlgmr.msra.gmra.mxu0 %v9490_v10 }
 0x474   :  { %v5989_v6 = vpop.f32.mrf.mxu1  ;;  %6234 = vmatmul.mubr.bf16.vlgmr.msra.gmra.mxu1 %v9492_v30  ;;  %v5949_v0 = vadd.f32 %v5948_v5, %v9587_v27  ;;  %6243 = vmatpush1.bf16.msra.mxu0 %v8622_v34  ;;  %v8691_v34 = vld [vmem:[#allocation2 + $0xf88] ss:$16 sps:$4 sm:$0xff]  }
 0x475   :  { %6284 = vmatpush1.bf16.msra.mxu1 %v8625_v45  ;;  %v5950_v38 = vpop.f32.mrf.mxu0  ;;  %6244 = vmatprep.subr.bf16.mxu0 %v8630_v55  ;;  %v8696_v45 = vld [vmem:[#allocation2 + $0xd6c] ss:$16 sps:$4 sm:$0xff]   ;;  %v8697_v5 = vld [vmem:[#allocation2 + $0xf68] ss:$16 sps:$4 sm:$0xff]  }
 0x476   :  { %v5991_v1 = vpop.f32.mrf.mxu1  ;;  %6285 = vmatprep.subr.bf16.mxu1 %v8633_v51  ;;  %v9597_v8 = vadd.f32 %v5989_v6, %v5949_v0  ;;  %v5951_v37 = vadd.f32 %v5950_v38, %v9592_v63  ;;  %6274 = vmatprep.mubr.bf16.mxu0 %v9496_v53  ;;  %v8640_v63 = vld [vmem:[#allocation2 + $0xc88] ss:$16 sps:$4 sm:$0xff]   ;;  %v8699_v55 = vld [vmem:[#allocation2 + $0xf6c] ss:$16 sps:$4 sm:$0xff]  }
 0x477   :  { %6315 = vmatprep.mubr.bf16.mxu1 %v9498_v33  ;;  %v5952_v10 = vpop.f32.mrf.mxu0  ;;  %v8643_v53 = vld [vmem:[#allocation2 + $0xe88] ss:$16 sps:$4 sm:$0xff]   ;;  %v8648_v33 = vld [vmem:[#allocation2 + $0xc6c] ss:$16 sps:$4 sm:$0xff]  }
 0x478   :  { %v5993_v30 = vpop.f32.mrf.mxu1  ;;  %v9602_v27 = vadd.f32 %v5991_v1, %v5951_v37  ;;  %6245 = vmatpush1.bf16.msra.mxu0 %v8628_v49  ;;  %v8694_v51 = vld [vmem:[#allocation2 + $0xd68] ss:$16 sps:$4 sm:$0xff]   ;;  %v8702_v6 = vld [vmem:[#allocation2 + $0xd4c] ss:$16 sps:$4 sm:$0xff]  }
 0x479   :  { %6286 = vmatpush1.bf16.msra.mxu1 %v8631_v57  ;;  %v5953_v24 = vpop.f32.mrf.mxu0  ;;  %6246 = vmatprep.subr.bf16.mxu0 %v8636_v62  ;;  %v8705_v0 = vld [vmem:[#allocation2 + $0xf4c] ss:$16 sps:$4 sm:$0xff]   ;;  %v8700_v49 = vld [vmem:[#allocation2 + $0xd48] ss:$16 sps:$4 sm:$0xff]  }
 0x47a   :  { %v5994_v23 = vpop.f32.mrf.mxu1  ;;  %6287 = vmatprep.subr.bf16.mxu1 %v8639_v14  ;;  %v8703_v57 = vld [vmem:[#allocation2 + $0xf48] ss:$16 sps:$4 sm:$0xff]   ;;  %v8708_v38 = vld [vmem:[#allocation2 + $0xd2c] ss:$16 sps:$4 sm:$0xff]  }
 0x47b   :  { %v8711_v1 = vld [vmem:[#allocation2 + $0xf2c] ss:$16 sps:$4 sm:$0xff]   ;;  %v8706_v62 = vld [vmem:[#allocation2 + $0xd28] ss:$16 sps:$4 sm:$0xff]  }
 0x47c   :  { %6247 = vmatpush1.bf16.msra.mxu0 %v8634_v43  ;;  %v8709_v14 = vld [vmem:[#allocation2 + $0xf28] ss:$16 sps:$4 sm:$0xff]   ;;  %v8714_v37 = vld [vmem:[#allocation2 + $0xd0c] ss:$16 sps:$4 sm:$0xff]  }
 0x47d   :  { %6288 = vmatpush1.bf16.msra.mxu1 %v8637_v40  ;;  %6248 = vmatprep.subr.bf16.mxu0 %v8642_v48  ;;  %v8717_v10 = vld [vmem:[#allocation2 + $0xf0c] ss:$16 sps:$4 sm:$0xff]   ;;  %v8712_v30 = vld [vmem:[#allocation2 + $0xd08] ss:$16 sps:$4 sm:$0xff]   ;;  %v2215_v40 = vsub.s32 2, %v9278_v3  ;;  %v2219_v48 = vsub.s32 3, %v9278_v3 }
 0x47e   :  { %6289 = vmatprep.subr.bf16.mxu1 %v8645_v12  ;;  %v8715_v43 = vld [vmem:[#allocation2 + $0xf08] ss:$16 sps:$4 sm:$0xff]   ;;  %v8720_v24 = vld [vmem:[#allocation2 + $0x10ec] ss:$16 sps:$4 sm:$0xff]   ;;  %v8846_v12 = vld [vmem:[#allocation12] sm:$0xf] }
 0x47f   :  { %v8723_v23 = vld [vmem:[#allocation2 + $0x12ec] ss:$16 sps:$4 sm:$0xff]   ;;  %v8724_v3 = vld [vmem:[#allocation2 + $0x10c8] ss:$16 sps:$4 sm:$0xff]  }
 0x480   :  { %6249 = vmatpush1.bf16.msra.mxu0 %v8640_v63  ;;  %v2216_v63 = vrot.slane %v8846_v12, %v2215_v40  ;;  %v8781_v40 = vld [vmem:[#allocation2 + $0x13a8] ss:$16 sps:$4 sm:$0xff]  }
 0x481   :  { %6290 = vmatpush1.bf16.msra.mxu1 %v8643_v53  ;;  %6250 = vmatprep.subr.bf16.mxu0 %v8648_v33  ;;  %v8718_v53 = vld [vmem:[#allocation2 + $0x10e8] ss:$16 sps:$4 sm:$0xff]  }
 0x482   :  { %6291 = vmatprep.subr.bf16.mxu1 %v8651_v32  ;;  %v8721_v33 = vld [vmem:[#allocation2 + $0x12e8] ss:$16 sps:$4 sm:$0xff]   ;;  %v8726_v32 = vld [vmem:[#allocation2 + $0x10cc] ss:$16 sps:$4 sm:$0xff]  }
 0x484   :  { %6251 = vmatpush1.bf16.msra.mxu0 %v8646_v59  ;;  %v8729_v59 = vld [vmem:[#allocation2 + $0x12cc] ss:$16 sps:$4 sm:$0xff]  }
 0x485   :  { %6292 = vmatpush1.bf16.msra.mxu1 %v8649_v7  ;;  %6252 = vmatprep.subr.bf16.mxu0 %v8654_v61  ;;  %v2220_v7 = vrot.slane %v8846_v12, %v2219_v48  ;;  %v8784_v48 = vld [vmem:[#allocation2 + $0x1188] ss:$16 sps:$4 sm:$0xff]  }
 0x486   :  { %6293 = vmatprep.subr.bf16.mxu1 %v8657_v35  ;;  %v8787_v12 = vld [vmem:[#allocation2 + $0x1388] ss:$16 sps:$4 sm:$0xff]  }
 0x488   :  { %6253 = vmatpush1.bf16.msra.mxu0 %v8652_v44 }
 0x489   :  { %6294 = vmatpush1.bf16.msra.mxu1 %v8655_v39  ;;  %6254 = vmatprep.subr.bf16.mxu0 %v8660_v13  ;;  %v8727_v39 = vld [vmem:[#allocation2 + $0x12c8] ss:$16 sps:$4 sm:$0xff]  }
 0x48a   :  { %6295 = vmatprep.subr.bf16.mxu1 %v8663_v46 }
 0x48c   :  { %6255 = vmatpush1.bf16.msra.mxu0 %v8658_v4  ;;  %v8732_v4 = vld [vmem:[#allocation2 + $0x10ac] ss:$16 sps:$4 sm:$0xff]  }
 0x48d   :  { %6296 = vmatpush1.bf16.msra.mxu1 %v8661_v29  ;;  %6256 = vmatprep.subr.bf16.mxu0 %v8666_v16  ;;  %v8735_v29 = vld [vmem:[#allocation2 + $0x12ac] ss:$16 sps:$4 sm:$0xff]  }
 0x48e   :  { %6297 = vmatprep.subr.bf16.mxu1 %v8669_v11 }
 0x490   :  { %6257 = vmatpush1.bf16.msra.mxu0 %v8664_v22 }
 0x491   :  { %6298 = vmatpush1.bf16.msra.mxu1 %v8667_v41  ;;  %6258 = vmatprep.subr.bf16.mxu0 %v8672_v28  ;;  %v8730_v41 = vld [vmem:[#allocation2 + $0x10a8] ss:$16 sps:$4 sm:$0xff]  }
 0x492   :  { %6299 = vmatprep.subr.bf16.mxu1 %v8675_v50  ;;  %v8733_v28 = vld [vmem:[#allocation2 + $0x12a8] ss:$16 sps:$4 sm:$0xff]  }
 0x494   :  { %6259 = vmatpush2.bf16.msra.mxu0 %v8670_v47 }
 0x495   :  { %6300 = vmatpush2.bf16.msra.mxu1 %v8673_v2  ;;  %6260 = vmatprep.subr.bf16.mxu0 %v8678_v36  ;;  %v8738_v2 = vld [vmem:[#allocation2 + $0x108c] ss:$16 sps:$4 sm:$0xff]  }
 0x496   :  { %6301 = vmatprep.subr.bf16.mxu1 %v8681_v31  ;;  %v8741_v36 = vld [vmem:[#allocation2 + $0x128c] ss:$16 sps:$4 sm:$0xff]   ;;  %v8736_v31 = vld [vmem:[#allocation2 + $0x1088] ss:$16 sps:$4 sm:$0xff]  }
 0x498   :  { %6261 = vmatpush2.bf16.msra.mxu0 %v8676_v42  ;;  %v8747_v42 = vld [vmem:[#allocation2 + $0x126c] ss:$16 sps:$4 sm:$0xff]  }
 0x499   :  { %6302 = vmatpush2.bf16.msra.mxu1 %v8679_v18  ;;  %6262 = vmatprep.subr.bf16.mxu0 %v8684_v20  ;;  %v8742_v18 = vld [vmem:[#allocation2 + $0x1068] ss:$16 sps:$4 sm:$0xff]  }
 0x49a   :  { %6303 = vmatprep.subr.bf16.mxu1 %v8687_v56  ;;  %v8745_v20 = vld [vmem:[#allocation2 + $0x1268] ss:$16 sps:$4 sm:$0xff]   ;;  %v8750_v56 = vld [vmem:[#allocation2 + $0x104c] ss:$16 sps:$4 sm:$0xff]  }
 0x49c   :  { %6263 = vmatpush2.bf16.msra.mxu0 %v8682_v17  ;;  %v8753_v17 = vld [vmem:[#allocation2 + $0x124c] ss:$16 sps:$4 sm:$0xff]  }
 0x49d   :  { %6304 = vmatpush2.bf16.msra.mxu1 %v8685_v26  ;;  %6264 = vmatprep.subr.bf16.mxu0 %v8690_v54  ;;  %v8748_v26 = vld [vmem:[#allocation2 + $0x1048] ss:$16 sps:$4 sm:$0xff]  }
 0x49e   :  { %6305 = vmatprep.subr.bf16.mxu1 %v8693_v58  ;;  %v8751_v54 = vld [vmem:[#allocation2 + $0x1248] ss:$16 sps:$4 sm:$0xff]   ;;  %v8756_v58 = vld [vmem:[#allocation2 + $0x102c] ss:$16 sps:$4 sm:$0xff]  }
 0x4a0   :  { %6265 = vmatpush2.bf16.msra.mxu0 %v8688_v25  ;;  %v8759_v25 = vld [vmem:[#allocation2 + $0x122c] ss:$16 sps:$4 sm:$0xff]  }
 0x4a1   :  { %6306 = vmatpush2.bf16.msra.mxu1 %v8691_v34  ;;  %6266 = vmatprep.subr.bf16.mxu0 %v8696_v45  ;;  %v8754_v34 = vld [vmem:[#allocation2 + $0x1028] ss:$16 sps:$4 sm:$0xff]  }
 0x4a2   :  { %6307 = vmatprep.subr.bf16.mxu1 %v8699_v55  ;;  %v8757_v45 = vld [vmem:[#allocation2 + $0x1228] ss:$16 sps:$4 sm:$0xff]   ;;  %v8762_v55 = vld [vmem:[#allocation2 + $0x100c] ss:$16 sps:$4 sm:$0xff]  }
 0x4a4   :  { %6267 = vmatpush2.bf16.msra.mxu0 %v8694_v51  ;;  %v8765_v51 = vld [vmem:[#allocation2 + $0x120c] ss:$16 sps:$4 sm:$0xff]  }
 0x4a5   :  { %6308 = vmatpush2.bf16.msra.mxu1 %v8697_v5  ;;  %6268 = vmatprep.subr.bf16.mxu0 %v8702_v6  ;;  %v8760_v5 = vld [vmem:[#allocation2 + $0x1008] ss:$16 sps:$4 sm:$0xff]  }
 0x4a6   :  { %6309 = vmatprep.subr.bf16.mxu1 %v8705_v0  ;;  %v8763_v6 = vld [vmem:[#allocation2 + $0x1208] ss:$16 sps:$4 sm:$0xff]   ;;  %v8768_v0 = vld [vmem:[#allocation2 + $0x11ec] ss:$16 sps:$4 sm:$0xff]  }
 0x4a8   :  { %6269 = vmatpush2.bf16.msra.mxu0 %v8700_v49  ;;  %v8771_v49 = vld [vmem:[#allocation2 + $0x13ec] ss:$16 sps:$4 sm:$0xff]  }
 0x4a9   :  { %6310 = vmatpush2.bf16.msra.mxu1 %v8703_v57  ;;  %6270 = vmatprep.subr.bf16.mxu0 %v8708_v38  ;;  %v8766_v57 = vld [vmem:[#allocation2 + $0x11e8] ss:$16 sps:$4 sm:$0xff]  }
 0x4aa   :  { %6311 = vmatprep.subr.bf16.mxu1 %v8711_v1  ;;  %v8769_v38 = vld [vmem:[#allocation2 + $0x13e8] ss:$16 sps:$4 sm:$0xff]   ;;  %v8774_v1 = vld [vmem:[#allocation2 + $0x11cc] ss:$16 sps:$4 sm:$0xff]  }
 0x4ac   :  { %6271 = vmatpush2.bf16.msra.mxu0 %v8706_v62  ;;  %v8777_v62 = vld [vmem:[#allocation2 + $0x13cc] ss:$16 sps:$4 sm:$0xff]  }
 0x4ad   :  { %6312 = vmatpush2.bf16.msra.mxu1 %v8709_v14  ;;  %6272 = vmatprep.subr.bf16.mxu0 %v8714_v37  ;;  %v8772_v14 = vld [vmem:[#allocation2 + $0x11c8] ss:$16 sps:$4 sm:$0xff]  }
 0x4ae   :  { %6313 = vmatprep.subr.bf16.mxu1 %v8717_v10  ;;  %v8775_v37 = vld [vmem:[#allocation2 + $0x13c8] ss:$16 sps:$4 sm:$0xff]   ;;  %v8780_v10 = vld [vmem:[#allocation2 + $0x11ac] ss:$16 sps:$4 sm:$0xff]  }
 0x4b0   :  { %6273 = vmatpush2.bf16.msra.mxu0 %v8712_v30  ;;  %v8783_v30 = vld [vmem:[#allocation2 + $0x13ac] ss:$16 sps:$4 sm:$0xff]  }
 0x4b1   :  { %6314 = vmatpush2.bf16.msra.mxu1 %v8715_v43  ;;  %6324 = vmatprep.subr.bf16.mxu0 %v8720_v24  ;;  %v8778_v43 = vld [vmem:[#allocation2 + $0x11a8] ss:$16 sps:$4 sm:$0xff]   ;;  %v8786_v24 = vld [vmem:[#allocation2 + $0x118c] ss:$16 sps:$4 sm:$0xff]  }
 0x4b2   :  { %6365 = vmatprep.subr.bf16.mxu1 %v8723_v23  ;;  %v8789_v23 = vld [vmem:[#allocation2 + $0x138c] ss:$16 sps:$4 sm:$0xff]  }
 0x4b3   :  { %v6030_v61 = vpop.f32.mrf.mxu0  ;;  %6275 = vmatmul.mubr.bf16.vlgmr.msra.gmra.mxu0 %v9528_v60 }
 0x4b4   :  { %v6071_v35 = vpop.f32.mrf.mxu1  ;;  %6316 = vmatmul.mubr.bf16.vlgmr.msra.gmra.mxu1 %v9530_v52  ;;  %v6031_v44 = vadd.f32 %v6030_v61, %v2216_v63  ;;  %6325 = vmatpush1.bf16.msra.mxu0 %v8718_v53  ;;  %v8792_v63 = vld [vmem:[#allocation2 + $0x116c] ss:$16 sps:$4 sm:$0xff]   ;;  %v8796_v61 = vld [vmem:[#allocation2 + $0x1148] ss:$16 sps:$4 sm:$0xff]  }
 0x4b5   :  { %6366 = vmatpush1.bf16.msra.mxu1 %v8721_v33  ;;  %v6032_v13 = vpop.f32.mrf.mxu0  ;;  %6326 = vmatprep.subr.bf16.mxu0 %v8726_v32  ;;  %v8795_v53 = vld [vmem:[#allocation2 + $0x136c] ss:$16 sps:$4 sm:$0xff]   ;;  %v8790_v33 = vld [vmem:[#allocation2 + $0x1168] ss:$16 sps:$4 sm:$0xff]  }
 0x4b6   :  { %v6073_v46 = vpop.f32.mrf.mxu1  ;;  %6367 = vmatprep.subr.bf16.mxu1 %v8729_v59  ;;  %v9608_v16 = vadd.f32 %v6071_v35, %v6031_v44  ;;  %v6033_v11 = vadd.f32 %v6032_v13, %v2220_v7  ;;  %6356 = vmatprep.mubr.bf16.mxu0 %v9536_v9  ;;  %v8739_v9 = vld [vmem:[#allocation2 + $0x1288] ss:$16 sps:$4 sm:$0xff]   ;;  %v8798_v59 = vld [vmem:[#allocation2 + $0x114c] ss:$16 sps:$4 sm:$0xff]  }
 0x4b7   :  { %6397 = vmatprep.mubr.bf16.mxu1 %v9538_v15  ;;  %v6034_v60 = vpop.f32.mrf.mxu0  ;;  %v8744_v15 = vld [vmem:[#allocation2 + $0x106c] ss:$16 sps:$4 sm:$0xff]   ;;  %v8793_v32 = vld [vmem:[#allocation2 + $0x1368] ss:$16 sps:$4 sm:$0xff]  }
 0x4b8   :  { %v6075_v52 = vpop.f32.mrf.mxu1  ;;  %v9612_v22 = vadd.f32 %v6073_v46, %v6033_v11  ;;  %6327 = vmatpush1.bf16.msra.mxu0 %v8724_v3  ;;  %v8801_v7 = vld [vmem:[#allocation2 + $0x134c] ss:$16 sps:$4 sm:$0xff]   ;;  %v8799_v35 = vld [vmem:[#allocation2 + $0x1348] ss:$16 sps:$4 sm:$0xff]   ;;  %v8814_v60 = vld [vmem:[#allocation13 + $0x78] sm:$0xff]  }
 0x4b9   :  { %6368 = vmatpush1.bf16.msra.mxu1 %v8727_v39  ;;  %v6035_v50 = vpop.f32.mrf.mxu0  ;;  %6328 = vmatprep.subr.bf16.mxu0 %v8732_v4  ;;  %v8804_v44 = vld [vmem:[#allocation2 + $0x112c] ss:$16 sps:$4 sm:$0xff]   ;;  %v8802_v39 = vld [vmem:[#allocation2 + $0x1128] ss:$16 sps:$4 sm:$0xff]   ;;  %v6407_v52 = vmax.f32 %v9602_v27, 0.0  ;;  %v8818_v27 = vld [vmem:[#allocation13 + $0x68] sm:$0xff]  }
 0x4ba   :  { %v6076_v47 = vpop.f32.mrf.mxu1  ;;  %6369 = vmatprep.subr.bf16.mxu1 %v8735_v29  ;;  %v8807_v3 = vld [vmem:[#allocation2 + $0x132c] ss:$16 sps:$4 sm:$0xff]   ;;  %v8805_v13 = vld [vmem:[#allocation2 + $0x1328] ss:$16 sps:$4 sm:$0xff]  }
 0x4bb   :  { %v8810_v46 = vld [vmem:[#allocation2 + $0x110c] ss:$16 sps:$4 sm:$0xff]   ;;  %v8808_v29 = vld [vmem:[#allocation2 + $0x1108] ss:$16 sps:$4 sm:$0xff]   ;;  %v6475_v50 = vpack.c.bf16 %v6407_v52, %v6407_v52 }
 0x4bc   :  { %6329 = vmatpush1.bf16.msra.mxu0 %v8730_v41  ;;  %v8813_v4 = vld [vmem:[#allocation2 + $0x130c] ss:$16 sps:$4 sm:$0xff]   ;;  %v8811_v11 = vld [vmem:[#allocation2 + $0x1308] ss:$16 sps:$4 sm:$0xff]   ;;  %v8815_v41 = vld [vmem:[#allocation13 + $0x38] sm:$0xff]  }
 0x4bd   :  { %6370 = vmatpush1.bf16.msra.mxu1 %v8733_v28  ;;  %6330 = vmatprep.subr.bf16.mxu0 %v8738_v2  ;;  %v8816_v28 = vld [vmem:[#allocation13 + $0x70] sm:$0xff]  }
 0x4be   :  { %6371 = vmatprep.subr.bf16.mxu1 %v8741_v36 }
 0x4c0   :  { %6331 = vmatpush1.bf16.msra.mxu0 %v8736_v31  ;;  %v8817_v31 = vld [vmem:[#allocation13 + $0x30] sm:$0xff]  }
 0x4c1   :  { %6372 = vmatpush1.bf16.msra.mxu1 %v8739_v9  ;;  %6332 = vmatprep.subr.bf16.mxu0 %v8744_v15 }
 0x4c2   :  { %6373 = vmatprep.subr.bf16.mxu1 %v8747_v42 }
 0x4c4   :  { %6333 = vmatpush1.bf16.msra.mxu0 %v8742_v18 }
 0x4c5   :  { %6374 = vmatpush1.bf16.msra.mxu1 %v8745_v20  ;;  %6334 = vmatprep.subr.bf16.mxu0 %v8750_v56 }
 0x4c6   :  { %6375 = vmatprep.subr.bf16.mxu1 %v8753_v17 }
 0x4c8   :  { %6335 = vmatpush1.bf16.msra.mxu0 %v8748_v26  ;;  %v8819_v26 = vld [vmem:[#allocation13 + $0x28] sm:$0xff]  }
 0x4c9   :  { %6376 = vmatpush1.bf16.msra.mxu1 %v8751_v54  ;;  %6336 = vmatprep.subr.bf16.mxu0 %v8756_v58  ;;  %v8831_v58 = vld [vmem:[#allocation13 + $0xb8] sm:$0xff]  }
 0x4ca   :  { %6377 = vmatprep.subr.bf16.mxu1 %v8759_v25  ;;  %v8832_v25 = vld [vmem:[#allocation13 + $0xf0] sm:$0xff]  }
 0x4cc   :  { %6337 = vmatpush1.bf16.msra.mxu0 %v8754_v34  ;;  %v8821_v34 = vld [vmem:[#allocation13 + $0x20] sm:$0xff]  }
 0x4cd   :  { %6378 = vmatpush1.bf16.msra.mxu1 %v8757_v45  ;;  %6338 = vmatprep.subr.bf16.mxu0 %v8762_v55  ;;  %v8833_v45 = vld [vmem:[#allocation13 + $0xb0] sm:$0xff]   ;;  %v8822_v55 = vld [vmem:[#allocation13 + $0x58] sm:$0xff]  }
 0x4ce   :  { %6379 = vmatprep.subr.bf16.mxu1 %v8765_v51  ;;  %v8823_v51 = vld [vmem:[#allocation13 + $0x18] sm:$0xff]  }
 0x4d0   :  { %6339 = vmatpush1.bf16.msra.mxu0 %v8760_v5  ;;  %v8835_v5 = vld [vmem:[#allocation13 + $0xa8] sm:$0xff]  }
 0x4d1   :  { %6380 = vmatpush1.bf16.msra.mxu1 %v8763_v6  ;;  %6340 = vmatprep.subr.bf16.mxu0 %v8768_v0  ;;  %v8824_v6 = vld [vmem:[#allocation13 + $0x50] sm:$0xff]   ;;  %v8836_v0 = vld [vmem:[#allocation13 + $0xe0] sm:$0xff]  }
 0x4d2   :  { %6381 = vmatprep.subr.bf16.mxu1 %v8771_v49  ;;  %v8825_v49 = vld [vmem:[#allocation13 + $0x10] sm:$0xff]  }
 0x4d4   :  { %6341 = vmatpush2.bf16.msra.mxu0 %v8766_v57  ;;  %v8837_v57 = vld [vmem:[#allocation13 + $0xa0] sm:$0xff]  }
 0x4d5   :  { %6382 = vmatpush2.bf16.msra.mxu1 %v8769_v38  ;;  %6342 = vmatprep.subr.bf16.mxu0 %v8774_v1  ;;  %v8826_v38 = vld [vmem:[#allocation13 + $0x48] sm:$0xff]   ;;  %v8838_v1 = vld [vmem:[#allocation13 + $0xd8] sm:$0xff]  }
 0x4d6   :  { %6383 = vmatprep.subr.bf16.mxu1 %v8777_v62  ;;  %v8827_v62 = vld [vmem:[#allocation13 + $0x8] sm:$0xff]  }
 0x4d8   :  { %6343 = vmatpush2.bf16.msra.mxu0 %v8772_v14  ;;  %v8839_v14 = vld [vmem:[#allocation13 + $0x98] sm:$0xff]  }
 0x4d9   :  { %6384 = vmatpush2.bf16.msra.mxu1 %v8775_v37  ;;  %6344 = vmatprep.subr.bf16.mxu0 %v8780_v10  ;;  %v8828_v37 = vld [vmem:[#allocation13 + $0x40] sm:$0xff]  }
 0x4da   :  { %6385 = vmatprep.subr.bf16.mxu1 %v8783_v30  ;;  %v8829_v10 = vld [vmem:[#allocation13] sm:$0xff]   ;;  %v6406_v30 = vmax.f32 %v9597_v8, 0.0 }
 0x4dc   :  { %6345 = vmatpush2.bf16.msra.mxu0 %v8778_v43  ;;  %v6474_v43 = vpack.c.bf16 %v6406_v30, %v6406_v30 }
 0x4dd   :  { %6386 = vmatpush2.bf16.msra.mxu1 %v8781_v40  ;;  %6346 = vmatprep.subr.bf16.mxu0 %v8786_v24  ;;  %v8840_v40 = vld [vmem:[#allocation13 + $0xd0] sm:$0xff]  }
 0x4de   :  { %6387 = vmatprep.subr.bf16.mxu1 %v8789_v23  ;;  %v8841_v24 = vld [vmem:[#allocation13 + $0x90] sm:$0xff]  }
 0x4e0   :  { %6347 = vmatpush2.bf16.msra.mxu0 %v8784_v48 }
 0x4e1   :  { %6388 = vmatpush2.bf16.msra.mxu1 %v8787_v12  ;;  %6348 = vmatprep.subr.bf16.mxu0 %v8792_v63 }
 0x4e2   :  { %6389 = vmatprep.subr.bf16.mxu1 %v8795_v53 }
 0x4e4   :  { %6349 = vmatpush2.bf16.msra.mxu0 %v8790_v33  ;;  %v8842_v33 = vld [vmem:[#allocation13 + $0xc8] sm:$0xff]  }
 0x4e5   :  { %6390 = vmatpush2.bf16.msra.mxu1 %v8793_v32  ;;  %6350 = vmatprep.subr.bf16.mxu0 %v8798_v59 }
 0x4e6   :  { %6391 = vmatprep.subr.bf16.mxu1 %v8801_v7  ;;  %v8843_v7 = vld [vmem:[#allocation13 + $0x88] sm:$0xff]  }
 0x4e8   :  { %6351 = vmatpush2.bf16.msra.mxu0 %v8796_v61 }
 0x4e9   :  { %6392 = vmatpush2.bf16.msra.mxu1 %v8799_v35  ;;  %6352 = vmatprep.subr.bf16.mxu0 %v8804_v44 }
 0x4ea   :  { %6393 = vmatprep.subr.bf16.mxu1 %v8807_v3 }
 0x4ec   :  { %6353 = vmatpush2.bf16.msra.mxu0 %v8802_v39  ;;  %v8844_v39 = vld [vmem:[#allocation13 + $0xc0] sm:$0xff]  }
 0x4ed   :  { %6394 = vmatpush2.bf16.msra.mxu1 %v8805_v13  ;;  %6354 = vmatprep.subr.bf16.mxu0 %v8810_v46  ;;  %v8845_v13 = vld [vmem:[#allocation13 + $0x80] sm:$0xff]  }
 0x4ee   :  { %6395 = vmatprep.subr.bf16.mxu1 %v8813_v4 }
 0x4f0   :  { %6355 = vmatpush2.bf16.msra.mxu0 %v8808_v29 }
 0x4f1   :  { %6396 = vmatpush2.bf16.msra.mxu1 %v8811_v11  ;;  %7603 = vmatprep.subr.bf16.mxu0 %v8814_v60 }
 0x4f3   :  { %v6112_v47 = vpop.f32.mrf.mxu0  ;;  %6357 = vmatmul.mubr.bf16.vlgmr.msra.gmra.mxu0 %v9560_v19  ;;  %v8820_v19 = vld [vmem:[#allocation13 + $0x60] sm:$0xff]  }
 0x4f4   :  { %v6153_v2 = vpop.f32.mrf.mxu1  ;;  %6398 = vmatmul.mubr.bf16.vlgmr.msra.gmra.mxu1 %v9562_v21  ;;  %v6113_v36 = vadd.f32 %v6112_v47, %v9608_v16  ;;  %7604 = vmatpush3.bf16.msra.mxu0 %v8815_v41  ;;  %v8830_v16 = vld [vmem:[#allocation13 + $0xf8] sm:$0xff]  }
 0x4f5   :  { %6709 = vmatprep.mubr.bf16.mxu0 %v6475_v50  ;;  %v6114_v9 = vpop.f32.mrf.mxu0  ;;  %7605 = vmatprep.subr.bf16.mxu0 %v8816_v28 }
 0x4f6   :  { %v6155_v15 = vpop.f32.mrf.mxu1  ;;  %v6154_v42 = vadd.f32 %v6153_v2, %v6113_v36  ;;  %v6115_v18 = vadd.f32 %v6114_v9, %v9612_v22  ;;  %7625 = vmatprep.subr.bf16.mxu1 %v8830_v16  ;;  %v8834_v22 = vld [vmem:[#allocation13 + $0xe8] sm:$0xff]  }
 0x4f7   :  { %v6116_v20 = vpop.f32.mrf.mxu0  ;;  %7626 = vmatpush3.bf16.msra.mxu1 %v8831_v58 }
 0x4f8   :  { %v6157_v56 = vpop.f32.mrf.mxu1  ;;  %v6156_v17 = vadd.f32 %v6155_v15, %v6115_v18  ;;  %7606 = vmatpush3.bf16.msra.mxu0 %v8817_v31  ;;  %7627 = vmatprep.subr.bf16.mxu1 %v8832_v25 }
 0x4f9   :  { %v6117_v54 = vpop.f32.mrf.mxu0  ;;  %7607 = vmatprep.subr.bf16.mxu0 %v8818_v27 }
 0x4fa   :  { %v6158_v21 = vpop.f32.mrf.mxu1 }
 0x4fb   :  { %7628 = vmatpush3.bf16.msra.mxu1 %v8833_v45 }
 0x4fc   :  { %7608 = vmatpush3.bf16.msra.mxu0 %v8819_v26  ;;  %7629 = vmatprep.subr.bf16.mxu1 %v8834_v22 }
 0x4fd   :  { %7609 = vmatprep.subr.bf16.mxu0 %v8820_v19 }
 0x4ff   :  { %7630 = vmatpush3.bf16.msra.mxu1 %v8835_v5  ;;  %v7569_v5 = vld [vmem:[#allocation15] ss:$0 sm:$0xff] }
 0x500   :  { %7610 = vmatpush3.bf16.msra.mxu0 %v8821_v34  ;;  %7631 = vmatprep.subr.bf16.mxu1 %v8836_v0 }
 0x501   :  { %7611 = vmatprep.subr.bf16.mxu0 %v8822_v55 }
 0x503   :  { %7632 = vmatpush3.bf16.msra.mxu1 %v8837_v57 }
 0x504   :  { %7612 = vmatpush3.bf16.msra.mxu0 %v8823_v51  ;;  %7633 = vmatprep.subr.bf16.mxu1 %v8838_v1 }
 0x505   :  { %7613 = vmatprep.subr.bf16.mxu0 %v8824_v6 }
 0x507   :  { %7634 = vmatpush3.bf16.msra.mxu1 %v8839_v14 }
 0x508   :  { %7614 = vmatpush3.bf16.msra.mxu0 %v8825_v49  ;;  %7635 = vmatprep.subr.bf16.mxu1 %v8840_v40 }
 0x509   :  { %7615 = vmatprep.subr.bf16.mxu0 %v8826_v38 }
 0x50b   :  { %7636 = vmatpush3.bf16.msra.mxu1 %v8841_v24 }
 0x50c   :  { %7616 = vmatpush3.bf16.msra.mxu0 %v8827_v62  ;;  %7637 = vmatprep.subr.bf16.mxu1 %v8842_v33 }
 0x50d   :  { %7617 = vmatprep.subr.bf16.mxu0 %v8828_v37 }
 0x50f   :  { %7638 = vmatpush3.bf16.msra.mxu1 %v8843_v7 }
 0x510   :  { %7618 = vmatpush3.bf16.msra.mxu0 %v8829_v10  ;;  %7639 = vmatprep.subr.bf16.mxu1 %v8844_v39 }
 0x513   :  { %6710 = vmatmul.mubr.bf16.vlgmr.msra.gmra.mxu0 %v6474_v43  ;;  %7640 = vmatpush3.bf16.msra.mxu1 %v8845_v13 }
 0x533   :  { %v6194_v23 = vpop.f32.mrf.mxu0 }
 0x534   :  { %v6235_v48 = vpop.f32.mrf.mxu1  ;;  %v6195_v12 = vadd.f32 %v6194_v23, %v6154_v42 }
 0x535   :  { %v6196_v63 = vpop.f32.mrf.mxu0 }
 0x536   :  { %v6237_v53 = vpop.f32.mrf.mxu1  ;;  %v6236_v32 = vadd.f32 %v6235_v48, %v6195_v12  ;;  %v6197_v59 = vadd.f32 %v6196_v63, %v6156_v17 }
 0x537   :  { %v6198_v61 = vpop.f32.mrf.mxu0 }
 0x538   :  { %v6239_v35 = vpop.f32.mrf.mxu1  ;;  %v6238_v8 = vadd.f32 %v6237_v53, %v6197_v59 }
 0x539   :  { %v6199_v44 = vpop.f32.mrf.mxu0 }
 0x53a   :  { %v6240_v3 = vpop.f32.mrf.mxu1 }
 0x573   :  { %v6276_v46 = vpop.f32.mrf.mxu0 }
 0x574   :  { %v6317_v4 = vpop.f32.mrf.mxu1  ;;  %v6277_v29 = vadd.f32 %v6276_v46, %v6236_v32 }
 0x575   :  { %v6278_v11 = vpop.f32.mrf.mxu0 }
 0x576   :  { %v6319_v60 = vpop.f32.mrf.mxu1  ;;  %v6318_v52 = vadd.f32 %v6317_v4, %v6277_v29  ;;  %v6279_v2 = vadd.f32 %v6278_v11, %v6238_v8 }
 0x577   :  { %v6280_v41 = vpop.f32.mrf.mxu0 }
 0x578   :  { %v6321_v28 = vpop.f32.mrf.mxu1  ;;  %v6320_v9 = vadd.f32 %v6319_v60, %v6279_v2 }
 0x579   :  { %v6281_v50 = vpop.f32.mrf.mxu0 }
 0x57a   :  { %v6322_v47 = vpop.f32.mrf.mxu1 }
 0x5b3   :  { %v6358_v36 = vpop.f32.mrf.mxu0 }
 0x5b4   :  { %v6399_v31 = vpop.f32.mrf.mxu1  ;;  %v6359_v15 = vadd.f32 %v6358_v36, %v6318_v52 }
 0x5b5   :  { %v6360_v27 = vpop.f32.mrf.mxu0 }
 0x5b6   :  { %v6401_v42 = vpop.f32.mrf.mxu1  ;;  %v6400_v18 = vadd.f32 %v6399_v31, %v6359_v15  ;;  %v6361_v20 = vadd.f32 %v6360_v27, %v6320_v9 }
 0x5b7   :  { %v6362_v56 = vpop.f32.mrf.mxu0 }
 0x5b8   :  { %v6403_v17 = vpop.f32.mrf.mxu1  ;;  %v6402_v26 = vadd.f32 %v6401_v42, %v6361_v20  ;;  %v6408_v19 = vmax.f32 %v6400_v18, 0.0 }
 0x5b9   :  { %v6363_v54 = vpop.f32.mrf.mxu0 }
 0x5ba   :  { %v6404_v21 = vpop.f32.mrf.mxu1  ;;  %v6409_v16 = vmax.f32 %v6402_v26, 0.0  ;;  %v6476_v25 = vpack.c.bf16 %v6408_v19, %v6408_v19 }
 0x5bc   :  { %v6477_v58 = vpack.c.bf16 %v6409_v16, %v6409_v16 }
 0x5be   :  { %6749 = vmatprep.mubr.bf16.mxu1 %v6477_v58 }
 0x5bf   :  { %6750 = vmatmul.mubr.bf16.vlgmr.msra.gmra.mxu1 %v6476_v25 }
 0x5d3   :  { %v7619_v34 = vpop.f32.mrf.mxu0 }
 0x5d5   :  { %v7620_v45 = vpop.f32.mrf.mxu0 }
 0x5d6   :  { %v7621_v55 = vadd.f32 %v7620_v45, %v7619_v34 }
 0x5d7   :  { %v7622_v22 = vpop.f32.mrf.mxu0 }
 0x5d8   :  { %v6712_v49 = vadd.f32 %v7621_v55, %v7569_v5 }
 0x5d9   :  { %v7623_v51 = vpop.f32.mrf.mxu0 }
 0x67f   :  { %v7641_v6 = vpop.f32.mrf.mxu1 }
 0x681   :  { %v7642_v0 = vpop.f32.mrf.mxu1 }
 0x682   :  { %v7643_v57 = vadd.f32 %v7642_v0, %v7641_v6 }
 0x683   :  { %v7644_v38 = vpop.f32.mrf.mxu1 }
 0x684   :  { %v6752_v1 = vadd.f32 %v7643_v57, %v6712_v49 }
 0x685   :  { %v7645_v62 = vpop.f32.mrf.mxu1 }
 0x686   :  { %v6757_v14 = vmax.f32 %v6752_v1, 0.0 }
 0x688   :  { %6758 = vst [vmem:[#allocation16] sm:$0x3] %v6757_v14 }
 0x689   :  { %9018 = shalt.err (!%p9015_p2)
}
 0x68a   :  { %6768 = dma.vmem_to_hbm [thread:$0]  %s6766_s2, 32, %s9633_s10, [#allocation6]  }
 0x68b   :  { %9037 = dma.done.wait [#allocation6], 32  }
 0x68c   :  { %9038 = vsyncadd [#allocation6], 4294967264 }
 0x68d   :  { %6772 = vsyncpa [#allocation5], 1 }
 0x68e   :  { %6773 = vsyncpa [#allocation8], 1 }
 0x68f   :  { %6774 = vsyncpa [#allocation11], 1 }
 0x690   :  { %6775 = vsyncpa [#allocation14], 1 }
 0x691   :  { %6776 = vsyncpa [#allocation6], 1 }
 0x692   :  { %6777 = vsyncmov [#allocation3] }
 0x695   :  { %s6778_s25 = vpop.sfrf %6777 }
 0x696   :  { %p7602_p3 = scmp.ne.s32.totalorder %s6778_s25, 0 }
 0x698   :  { %6782 = shalt.err (%p7602_p3)  }

</bundles_post_ra>
